<compile_context>
chip_gen: v6e
topology: v6e:2x2x1
jax: 0.10.0
libtpu: 0.0.40
codegen_flags: <defaults>
</compile_context>

<pallas_src>
import jax
import jax.numpy as jnp
from jax.experimental import pallas as pl
from jax.experimental.pallas import tpu as pltpu

# ---- scaled-down hyperparameters (same structure as the PyTorch module) ----
HEAD_SIZE = 16
NUM_HEADS = 4
N_EMBD = NUM_HEADS * HEAD_SIZE          # 64
BLOCK_SIZE = 32
N_LAYERS = 2
VOCAB_SIZE = 64
VOCAB_PAD = 128                         # lane-dense lm_head output
LN_EPS = 1e-5                           # torch.nn.LayerNorm default
NEG_BIG = -1e30                         # finite "-inf" for masked scores / pad logits


# ------------------------------ shared helpers -------------------------------
def _layernorm(x, g, b):
    mu = jnp.mean(x, axis=-1, keepdims=True)
    xc = x - mu
    var = jnp.mean(xc * xc, axis=-1, keepdims=True)
    return xc * jax.lax.rsqrt(var + LN_EPS) * g + b


def _bf16(a):
    return a.astype(jnp.bfloat16)


# --------------------------- fused forward kernel ---------------------------
def make_fused_kernel(B, T):
    BT = B * T
    C = N_EMBD

    def kernel(idx_ref, tok_ref, pos_ref,
               ln1g_ref, ln1b_ref, wqkv_ref, wp_ref, bp_ref,
               ln2g_ref, ln2b_ref, w1_ref, b1_ref, w2_ref, b2_ref,
               lnfg_ref, lnfb_ref, lmw_ref, lmb_ref, o_ref):
        # ---- fused embedding: x = one_hot(idx) @ tok_emb + pos  (one MXU matmul) ----
        idx = idx_ref[...]                                            # (BT, 1) int32
        vocab_iota = jax.lax.broadcasted_iota(jnp.int32, (BT, VOCAB_SIZE), 1)
        one_hot = (idx == vocab_iota).astype(jnp.bfloat16)            # (BT, V) bf16
        x = jnp.dot(one_hot, tok_ref[...],
                    preferred_element_type=jnp.float32)               # (BT, C) f32
        pos = pos_ref[0:T, :]                                         # (T, C) f32
        x = x + jnp.concatenate([pos] * B, axis=0)                    # per-batch tile

        # Causal mask built once, reused by every layer / head (broadcast over B).
        row = jax.lax.broadcasted_iota(jnp.int32, (T, T), 0)
        col = jax.lax.broadcasted_iota(jnp.int32, (T, T), 1)
        causal = (col <= row)[None, :, :]                             # (1, T, T)
        neg_big = jnp.float32(NEG_BIG)
        scale = jnp.float32(HEAD_SIZE ** -0.5)

        for l in range(N_LAYERS):                  # static unroll; weights VMEM-resident
            # --- LN1 + causal multi-head self-attention + projection + residual ---
            xn = _layernorm(x, ln1g_ref[l], ln1b_ref[l])
            # Fused QKV matmul.  (On v5e the 64/128-lane slices below cost a couple of
            # lane rotates; on v6e/v7x the fused 192-wide form is the better trade.)
            qkv = jnp.dot(_bf16(xn), wqkv_ref[l],
                          preferred_element_type=jnp.float32)          # (BT, 3C) f32
            q3 = qkv[:, :C].reshape(B, T, C)
            k3 = qkv[:, C:2 * C].reshape(B, T, C)
            v3 = qkv[:, 2 * C:].reshape(B, T, C)
            wp_l = wp_ref[l]                                           # (C, C) bf16

            att = None
            for h in range(NUM_HEADS):             # static unroll; batched over B
                lo = h * HEAD_SIZE
                qh = q3[:, :, lo:lo + HEAD_SIZE]
                kh = k3[:, :, lo:lo + HEAD_SIZE]
                vh = v3[:, :, lo:lo + HEAD_SIZE]
                wei = jnp.einsum('bqd,bkd->bqk', qh, kh,
                                 preferred_element_type=jnp.float32) * scale
                wei = jnp.where(causal, wei, neg_big)
                # Keep the row-max subtraction (exp-overflow safety for arbitrary inputs).
                wei = wei - jnp.max(wei, axis=-1, keepdims=True)
                p = jnp.exp(wei)
                p = p * pl.reciprocal(jnp.sum(p, axis=-1, keepdims=True), approx=True)
                oh = jnp.einsum('bqk,bkd->bqd', p, vh,
                                preferred_element_type=jnp.float32)    # (B, T, Hs)
                # Accumulate output projection per head -> no last-axis concatenate.
                contrib = jnp.dot(_bf16(oh.reshape(BT, HEAD_SIZE)),
                                  wp_l[lo:lo + HEAD_SIZE, :],
                                  preferred_element_type=jnp.float32)  # (BT, C)
                att = contrib if att is None else att + contrib
            x = x + att + bp_ref[l]                 # proj bias added once; dropout = id

            # --- LN2 + FFN (Linear -> ReLU -> Linear) + residual ---
            xn2 = _layernorm(x, ln2g_ref[l], ln2b_ref[l])
            h1 = jnp.dot(_bf16(xn2), w1_ref[l],
                         preferred_element_type=jnp.float32) + b1_ref[l]
            h1 = jnp.maximum(h1, 0.0)
            x = x + jnp.dot(_bf16(h1), w2_ref[l],
                            preferred_element_type=jnp.float32) + b2_ref[l]

        # --- final LayerNorm + lm_head (lane-dense 128; pad columns masked) ---
        xn = _layernorm(x, lnfg_ref[...], lnfb_ref[...])
        logits = jnp.dot(_bf16(xn), lmw_ref[...],
                         preferred_element_type=jnp.float32) + lmb_ref[...]
        pad_col = jax.lax.broadcasted_iota(jnp.int32, (BT, VOCAB_PAD), 1)
        o_ref[...] = jnp.where(pad_col < VOCAB_SIZE, logits, neg_big)

    return kernel


# ------------------------------ pallas wrapper -------------------------------
WEIGHT_KEYS = ("tok_emb", "pos_emb", "ln1_g", "ln1_b", "wqkv", "wp", "bp",
               "ln2_g", "ln2_b", "w1", "b1", "w2", "b2", "lnf_g", "lnf_b",
               "lm_w", "lm_b")


def _cost_estimate(B, T, inputs):
    C, V, BT = N_EMBD, VOCAB_SIZE, B * T
    per_layer = (2 * BT * C * 3 * C                                  # fused QKV
                 + NUM_HEADS * 2 * B * T * T * HEAD_SIZE * 2         # scores + PV
                 + NUM_HEADS * 2 * BT * HEAD_SIZE * C                # per-head proj
                 + 2 * BT * C * 4 * C + 2 * BT * 4 * C * C)          # FFN
    flops = 2 * BT * V * C + N_LAYERS * per_layer + 2 * BT * C * VOCAB_PAD
    transcendentals = N_LAYERS * NUM_HEADS * B * T * T               # softmax exps
    out_bytes = BT * VOCAB_PAD * 4
    bytes_accessed = int(sum(int(a.size) * a.dtype.itemsize for a in inputs) + out_bytes)
    return pl.CostEstimate(flops=int(flops), transcendentals=int(transcendentals),
                           bytes_accessed=bytes_accessed)


def run_arapoet_fused(idx, params):
    """Single fused pallas_call: embeddings + all blocks + final LN + lm_head."""
    B, T = idx.shape
    assert T % 8 == 0 and T <= BLOCK_SIZE, "demo requires sublane-aligned T <= block_size"
    idx_col = idx.reshape(B * T, 1).astype(jnp.int32)
    inputs = [idx_col] + [params[k] for k in WEIGHT_KEYS]
    vmem = pl.BlockSpec(memory_space=pltpu.MemorySpace.VMEM)
    # No grid: whole batch in one step (single-TC v5e/v6e have nothing to parallelize;
    # for v7x re-introduce a "parallel" batch axis only when per-core work justifies it).
    out = pl.pallas_call(
        make_fused_kernel(B, T),
        out_shape=jax.ShapeDtypeStruct((B * T, VOCAB_PAD), jnp.float32),
        in_specs=[vmem] * len(inputs),
        out_specs=vmem,
        cost_estimate=_cost_estimate(B, T, inputs),
    )(*inputs)
    return out.reshape(B, T, VOCAB_PAD)             # pad cols already masked to -1e30


# ------------------------------ parameter init -------------------------------
def init_params(key):
    keys = iter(jax.random.split(key, 256))

    def uniform(shape, bound):
        return jax.random.uniform(next(keys), shape, jnp.float32, -bound, bound)

    def linear(in_d, out_d, bias=True):
        bound = in_d ** -0.5
        w = uniform((in_d, out_d), bound)
        if not bias:
            return w
        return w, uniform((1, out_d), bound)

    L, C, H, Hs, V = N_LAYERS, N_EMBD, NUM_HEADS, HEAD_SIZE, VOCAB_SIZE

    tok_emb = jax.random.normal(next(keys), (V, C), jnp.float32)
    pos_emb = jax.random.normal(next(keys), (BLOCK_SIZE, C), jnp.float32)

    ln1_g, ln1_b, ln2_g, ln2_b = [], [], [], []
    wqkv, wp, bp, w1, b1, w2, b2 = [], [], [], [], [], [], []
    for _ in range(L):
        ln1_g.append(jnp.ones((1, C), jnp.float32))
        ln1_b.append(jnp.zeros((1, C), jnp.float32))
        ln2_g.append(jnp.ones((1, C), jnp.float32))
        ln2_b.append(jnp.zeros((1, C), jnp.float32))
        # per-head key/query/value projections (no bias), concatenated over heads,
        # then fused into a single (C, 3C) QKV weight.
        wq = jnp.concatenate([linear(C, Hs, bias=False) for _ in range(H)], axis=1)
        wk = jnp.concatenate([linear(C, Hs, bias=False) for _ in range(H)], axis=1)
        wv = jnp.concatenate([linear(C, Hs, bias=False) for _ in range(H)], axis=1)
        wqkv.append(jnp.concatenate([wq, wk, wv], axis=1))
        w, b = linear(C, C);        wp.append(w); bp.append(b)
        w, b = linear(C, 4 * C);    w1.append(w); b1.append(b)
        w, b = linear(4 * C, C);    w2.append(w); b2.append(b)

    lm_w, lm_b = linear(C, V)
    lm_w = jnp.pad(lm_w, ((0, 0), (0, VOCAB_PAD - V)))   # lane-dense padding
    lm_b = jnp.pad(lm_b, ((0, 0), (0, VOCAB_PAD - V)))

    # NOTE: weights are stored/multiplied in bf16 (f32 accumulation) — a deliberate
    # numerics deviation from the f32 PyTorch module, mirrored by the reference below.
    return dict(
        tok_emb=tok_emb.astype(jnp.bfloat16), pos_emb=pos_emb,
        ln1_g=jnp.stack(ln1_g), ln1_b=jnp.stack(ln1_b),
        ln2_g=jnp.stack(ln2_g), ln2_b=jnp.stack(ln2_b),
        wqkv=jnp.stack(wqkv).astype(jnp.bfloat16),
        wp=jnp.stack(wp).astype(jnp.bfloat16), bp=jnp.stack(bp),
        w1=jnp.stack(w1).astype(jnp.bfloat16), b1=jnp.stack(b1),
        w2=jnp.stack(w2).astype(jnp.bfloat16), b2=jnp.stack(b2),
        lnf_g=jnp.ones((1, C), jnp.float32), lnf_b=jnp.zeros((1, C), jnp.float32),
        lm_w=lm_w.astype(jnp.bfloat16), lm_b=lm_b,
    )


# ------------------------------ model forward --------------------------------
def arapoet_forward(params, idx, targets=None):
    B, T = idx.shape
    logits_pad = run_arapoet_fused(idx, params)               # single fused Pallas call
    logits = logits_pad[:, :, :VOCAB_SIZE]                    # user-facing shape
    loss = None
    if targets is not None:
        # pad columns are masked to -1e30 in-kernel, so log_softmax over the padded
        # width is identical to log_softmax over the real vocab.
        flat = logits_pad.reshape(B * T, VOCAB_PAD)
        logp = jax.nn.log_softmax(flat, axis=-1)
        loss = -jnp.mean(jnp.take_along_axis(logp, targets.reshape(B * T, 1), axis=1))
    return logits, loss


# ------------------------- pure-JAX reference (check) -------------------------
def _reference_forward(params, idx):
    B, T = idx.shape
    C = N_EMBD
    tok = jnp.take(params["tok_emb"].astype(jnp.float32), idx, axis=0)
    x = tok + params["pos_emb"][:T][None]
    causal = jnp.arange(T)[None, :] <= jnp.arange(T)[:, None]

    def mm(a, w):   # same bf16-operand / f32-accumulate convention as the kernel
        return jnp.dot(a.astype(jnp.bfloat16), w, preferred_element_type=jnp.float32)

    for l in range(N_LAYERS):
        xn = _layernorm(x, params["ln1_g"][l], params["ln1_b"][l])
        qkv = mm(xn, params["wqkv"][l])
        q, k, v = qkv[..., :C], qkv[..., C:2 * C], qkv[..., 2 * C:]
        outs = []
        for h in range(NUM_HEADS):
            lo = h * HEAD_SIZE
            qh, kh, vh = (t[..., lo:lo + HEAD_SIZE] for t in (q, k, v))
            wei = jnp.einsum("btd,bsd->bts", qh, kh) * HEAD_SIZE ** -0.5
            wei = jnp.where(causal[None], wei, -jnp.inf)
            wei = jax.nn.softmax(wei, axis=-1)
            outs.append(jnp.einsum("bts,bsd->btd", wei, vh))
        att = jnp.concatenate(outs, axis=-1)
        x = x + (mm(att, params["wp"][l]) + params["bp"][l])
        xn2 = _layernorm(x, params["ln2_g"][l], params["ln2_b"][l])
        h1 = jnp.maximum(mm(xn2, params["w1"][l]) + params["b1"][l], 0.0)
        x = x + (mm(h1, params["w2"][l]) + params["b2"][l])
    xn = _layernorm(x, params["lnf_g"], params["lnf_b"])
    logits = mm(xn, params["lm_w"]) + params["lm_b"]
    return logits[..., :VOCAB_SIZE]


if __name__ == "__main__":
    key = jax.random.PRNGKey(0)
    pkey, ikey = jax.random.split(key)
    params = init_params(pkey)

    B, T = 2, 16
    idx = jax.random.randint(ikey, (B, T), 0, VOCAB_SIZE, dtype=jnp.int32)

    logits, loss = jax.jit(arapoet_forward)(params, idx)
    logits = jax.block_until_ready(logits)
    assert logits.shape == (B, T, VOCAB_SIZE)
    assert loss is None

    ref = _reference_forward(params, idx)
    # Tolerance covers the EUP approximate-reciprocal softmax (not mirrored in the
    # reference) plus MXU accumulation-order differences; bf16 operand rounding IS
    # mirrored, so the remaining gap is small.
    assert jnp.allclose(logits, ref, atol=1e-2, rtol=1e-2), "Pallas vs reference mismatch"

    # TODO(synk): autoregressive `generate` (torch.multinomial sampling loop) is host-side
    # control flow and is intentionally not implemented as a kernel.
    print("KERNEL_OK")
</pallas_src>

<mosaic_0001>
module attributes {stable_mosaic.version = 11 : i64} {
  func.func @kernel(%arg0: memref<32x1xi32, #tpu.memory_space<vmem>>, %arg1: memref<64x64xbf16, #tpu.memory_space<vmem>>, %arg2: memref<32x64xf32, #tpu.memory_space<vmem>>, %arg3: memref<2x1x64xf32, #tpu.memory_space<vmem>>, %arg4: memref<2x1x64xf32, #tpu.memory_space<vmem>>, %arg5: memref<2x64x192xbf16, #tpu.memory_space<vmem>>, %arg6: memref<2x64x64xbf16, #tpu.memory_space<vmem>>, %arg7: memref<2x1x64xf32, #tpu.memory_space<vmem>>, %arg8: memref<2x1x64xf32, #tpu.memory_space<vmem>>, %arg9: memref<2x1x64xf32, #tpu.memory_space<vmem>>, %arg10: memref<2x64x256xbf16, #tpu.memory_space<vmem>>, %arg11: memref<2x1x256xf32, #tpu.memory_space<vmem>>, %arg12: memref<2x256x64xbf16, #tpu.memory_space<vmem>>, %arg13: memref<2x1x64xf32, #tpu.memory_space<vmem>>, %arg14: memref<1x64xf32, #tpu.memory_space<vmem>>, %arg15: memref<1x64xf32, #tpu.memory_space<vmem>>, %arg16: memref<64x128xbf16, #tpu.memory_space<vmem>>, %arg17: memref<1x128xf32, #tpu.memory_space<vmem>>, %arg18: memref<32x128xf32, #tpu.memory_space<vmem>>) attributes {dimension_semantics = [], scalar_prefetch = 0 : i64, scratch_operands = 0 : i64, tpu.core_type = #tpu.core_type<tc>} {
    %c0 = arith.constant 0 : index
    %c0_0 = arith.constant 0 : index
    %0 = vector.load %arg0[%c0, %c0_0] : memref<32x1xi32, #tpu.memory_space<vmem>>, vector<32x1xi32>
    %1 = tpu.iota {dimensions = array<i32: 1>} : vector<32x64xi32>
    %2 = vector.broadcast %0 : vector<32x1xi32> to vector<32x64xi32>
    %3 = arith.cmpi eq, %2, %1 : vector<32x64xi32>
    %4 = arith.extui %3 : vector<32x64xi1> to vector<32x64xi32>
    %5 = arith.sitofp %4 : vector<32x64xi32> to vector<32x64xf32>
    %6 = arith.truncf %5 : vector<32x64xf32> to vector<32x64xbf16>
    %c0_1 = arith.constant 0 : index
    %c0_2 = arith.constant 0 : index
    %7 = vector.load %arg1[%c0_1, %c0_2] : memref<64x64xbf16, #tpu.memory_space<vmem>>, vector<64x64xbf16>
    %cst = arith.constant dense<0.000000e+00> : vector<32x64xf32>
    %8 = tpu.matmul %6, %7, %cst {dimension_numbers = #tpu.dot_dimension_numbers<[1], [0], [0], [1], [0, 0, 1, 1], [], []>} : vector<32x64xbf16>, vector<64x64xbf16>, vector<32x64xf32> -> vector<32x64xf32>
    %c0_3 = arith.constant 0 : index
    %c0_4 = arith.constant 0 : index
    %9 = vector.load %arg2[%c0_3, %c0_4] : memref<32x64xf32, #tpu.memory_space<vmem>>, vector<16x64xf32>
    %10 = tpu.concatenate %9, %9 in 0 : vector<16x64xf32>, vector<16x64xf32> -> vector<32x64xf32>
    %11 = arith.addf %8, %10 : vector<32x64xf32>
    %12 = tpu.iota {dimensions = array<i32: 0>} : vector<16x16xi32>
    %13 = tpu.iota {dimensions = array<i32: 1>} : vector<16x16xi32>
    %14 = arith.cmpi sle, %13, %12 : vector<16x16xi32>
    %15 = vector.shape_cast %14 : vector<16x16xi1> to vector<1x16x16xi1>
    %c0_5 = arith.constant 0 : index
    %c0_6 = arith.constant 0 : index
    %c0_7 = arith.constant 0 : index
    %16 = vector.load %arg3[%c0_5, %c0_6, %c0_7] : memref<2x1x64xf32, #tpu.memory_space<vmem>>, vector<1x1x64xf32>
    %17 = vector.shape_cast %16 : vector<1x1x64xf32> to vector<1x64xf32>
    %c0_8 = arith.constant 0 : index
    %c0_9 = arith.constant 0 : index
    %c0_10 = arith.constant 0 : index
    %18 = vector.load %arg4[%c0_8, %c0_9, %c0_10] : memref<2x1x64xf32, #tpu.memory_space<vmem>>, vector<1x1x64xf32>
    %19 = vector.shape_cast %18 : vector<1x1x64xf32> to vector<1x64xf32>
    %cst_11 = arith.constant dense<0.000000e+00> : vector<32xf32>
    %20 = vector.multi_reduction <add>, %11, %cst_11 [1] : vector<32x64xf32> to vector<32xf32>
    %21 = vector.shape_cast %20 : vector<32xf32> to vector<32x1xf32>
    %cst_12 = arith.constant 6.400000e+01 : f32
    %22 = vector.broadcast %cst_12 : f32 to vector<32x1xf32>
    %23 = arith.divf %21, %22 : vector<32x1xf32>
    %24 = vector.broadcast %23 : vector<32x1xf32> to vector<32x64xf32>
    %25 = arith.subf %11, %24 : vector<32x64xf32>
    %26 = arith.mulf %25, %25 : vector<32x64xf32>
    %cst_13 = arith.constant dense<0.000000e+00> : vector<32xf32>
    %27 = vector.multi_reduction <add>, %26, %cst_13 [1] : vector<32x64xf32> to vector<32xf32>
    %28 = vector.shape_cast %27 : vector<32xf32> to vector<32x1xf32>
    %cst_14 = arith.constant 6.400000e+01 : f32
    %29 = vector.broadcast %cst_14 : f32 to vector<32x1xf32>
    %30 = arith.divf %28, %29 : vector<32x1xf32>
    %cst_15 = arith.constant 9.99999974E-6 : f32
    %31 = vector.broadcast %cst_15 : f32 to vector<32x1xf32>
    %32 = arith.addf %30, %31 : vector<32x1xf32>
    %33 = math.rsqrt %32 : vector<32x1xf32>
    %34 = vector.broadcast %33 : vector<32x1xf32> to vector<32x64xf32>
    %35 = arith.mulf %25, %34 : vector<32x64xf32>
    %36 = vector.broadcast %17 : vector<1x64xf32> to vector<32x64xf32>
    %37 = arith.mulf %35, %36 : vector<32x64xf32>
    %38 = vector.broadcast %19 : vector<1x64xf32> to vector<32x64xf32>
    %39 = arith.addf %37, %38 : vector<32x64xf32>
    %40 = arith.truncf %39 : vector<32x64xf32> to vector<32x64xbf16>
    %c0_16 = arith.constant 0 : index
    %c0_17 = arith.constant 0 : index
    %c0_18 = arith.constant 0 : index
    %41 = vector.load %arg5[%c0_16, %c0_17, %c0_18] : memref<2x64x192xbf16, #tpu.memory_space<vmem>>, vector<1x64x192xbf16>
    %42 = vector.shape_cast %41 : vector<1x64x192xbf16> to vector<64x192xbf16>
    %cst_19 = arith.constant dense<0.000000e+00> : vector<32x192xf32>
    %43 = tpu.matmul %40, %42, %cst_19 {dimension_numbers = #tpu.dot_dimension_numbers<[1], [0], [0], [1], [0, 0, 1, 1], [], []>} : vector<32x64xbf16>, vector<64x192xbf16>, vector<32x192xf32> -> vector<32x192xf32>
    %44 = vector.extract_strided_slice %43 {offsets = [0, 0], sizes = [32, 64], strides = [1, 1]} : vector<32x192xf32> to vector<32x64xf32>
    %45 = vector.shape_cast %44 : vector<32x64xf32> to vector<2x16x64xf32>
    %46 = vector.extract_strided_slice %43 {offsets = [0, 64], sizes = [32, 64], strides = [1, 1]} : vector<32x192xf32> to vector<32x64xf32>
    %47 = vector.shape_cast %46 : vector<32x64xf32> to vector<2x16x64xf32>
    %48 = vector.extract_strided_slice %43 {offsets = [0, 128], sizes = [32, 64], strides = [1, 1]} : vector<32x192xf32> to vector<32x64xf32>
    %49 = vector.shape_cast %48 : vector<32x64xf32> to vector<2x16x64xf32>
    %c0_20 = arith.constant 0 : index
    %c0_21 = arith.constant 0 : index
    %c0_22 = arith.constant 0 : index
    %50 = vector.load %arg6[%c0_20, %c0_21, %c0_22] : memref<2x64x64xbf16, #tpu.memory_space<vmem>>, vector<1x64x64xbf16>
    %51 = vector.shape_cast %50 : vector<1x64x64xbf16> to vector<64x64xbf16>
    %52 = vector.extract_strided_slice %45 {offsets = [0, 0, 0], sizes = [2, 16, 16], strides = [1, 1, 1]} : vector<2x16x64xf32> to vector<2x16x16xf32>
    %53 = vector.extract_strided_slice %47 {offsets = [0, 0, 0], sizes = [2, 16, 16], strides = [1, 1, 1]} : vector<2x16x64xf32> to vector<2x16x16xf32>
    %54 = vector.extract_strided_slice %49 {offsets = [0, 0, 0], sizes = [2, 16, 16], strides = [1, 1, 1]} : vector<2x16x64xf32> to vector<2x16x16xf32>
    "tpu.trace_start"() <{level = 10 : i32, message = "bqd,bkd->bqk"}> : () -> ()
    %cst_23 = arith.constant dense<0.000000e+00> : vector<2x16x16xf32>
    %55 = tpu.matmul %52, %53, %cst_23 {dimension_numbers = #tpu.dot_dimension_numbers<[2], [2], [1], [1], [0, 0, 0, 1, 1, 1], [0], [0]>} : vector<2x16x16xf32>, vector<2x16x16xf32>, vector<2x16x16xf32> -> vector<2x16x16xf32>
    "tpu.trace_stop"() : () -> ()
    %cst_24 = arith.constant 2.500000e-01 : f32
    %56 = vector.broadcast %cst_24 : f32 to vector<2x16x16xf32>
    %57 = arith.mulf %55, %56 : vector<2x16x16xf32>
    %cst_25 = arith.constant -1.000000e+30 : f32
    %58 = vector.shape_cast %15 : vector<1x16x16xi1> to vector<1x16x16xi1>
    %59 = vector.broadcast %58 : vector<1x16x16xi1> to vector<2x16x16xi1>
    %60 = vector.broadcast %cst_25 : f32 to vector<2x16x16xf32>
    %61 = arith.select %59, %57, %60 : vector<2x16x16xi1>, vector<2x16x16xf32>
    %cst_26 = arith.constant dense<0xFF800000> : vector<2x16xf32>
    %62 = vector.multi_reduction <maximumf>, %61, %cst_26 [2] : vector<2x16x16xf32> to vector<2x16xf32>
    %63 = vector.shape_cast %62 : vector<2x16xf32> to vector<2x16x1xf32>
    %64 = vector.broadcast %63 : vector<2x16x1xf32> to vector<2x16x16xf32>
    %65 = arith.subf %61, %64 : vector<2x16x16xf32>
    %66 = math.exp %65 : vector<2x16x16xf32>
    %cst_27 = arith.constant dense<0.000000e+00> : vector<2x16xf32>
    %67 = vector.multi_reduction <add>, %66, %cst_27 [2] : vector<2x16x16xf32> to vector<2x16xf32>
    %68 = vector.shape_cast %67 : vector<2x16xf32> to vector<2x16x1xf32>
    %69 = tpu.reciprocal %68 {approx = true} : vector<2x16x1xf32> -> vector<2x16x1xf32>
    %70 = vector.broadcast %69 : vector<2x16x1xf32> to vector<2x16x16xf32>
    %71 = arith.mulf %66, %70 : vector<2x16x16xf32>
    "tpu.trace_start"() <{level = 10 : i32, message = "bqk,bkd->bqd"}> : () -> ()
    %cst_28 = arith.constant dense<0.000000e+00> : vector<2x16x16xf32>
    %72 = tpu.matmul %71, %54, %cst_28 {dimension_numbers = #tpu.dot_dimension_numbers<[2], [1], [1], [2], [0, 0, 0, 1, 1, 2], [0], [0]>} : vector<2x16x16xf32>, vector<2x16x16xf32>, vector<2x16x16xf32> -> vector<2x16x16xf32>
    "tpu.trace_stop"() : () -> ()
    %73 = vector.shape_cast %72 : vector<2x16x16xf32> to vector<32x16xf32>
    %74 = arith.truncf %73 : vector<32x16xf32> to vector<32x16xbf16>
    %75 = vector.extract_strided_slice %51 {offsets = [0, 0], sizes = [16, 64], strides = [1, 1]} : vector<64x64xbf16> to vector<16x64xbf16>
    %cst_29 = arith.constant dense<0.000000e+00> : vector<32x64xf32>
    %76 = tpu.matmul %74, %75, %cst_29 {dimension_numbers = #tpu.dot_dimension_numbers<[1], [0], [0], [1], [0, 0, 1, 1], [], []>} : vector<32x16xbf16>, vector<16x64xbf16>, vector<32x64xf32> -> vector<32x64xf32>
    %77 = vector.extract_strided_slice %45 {offsets = [0, 0, 16], sizes = [2, 16, 16], strides = [1, 1, 1]} : vector<2x16x64xf32> to vector<2x16x16xf32>
    %78 = vector.extract_strided_slice %47 {offsets = [0, 0, 16], sizes = [2, 16, 16], strides = [1, 1, 1]} : vector<2x16x64xf32> to vector<2x16x16xf32>
    %79 = vector.extract_strided_slice %49 {offsets = [0, 0, 16], sizes = [2, 16, 16], strides = [1, 1, 1]} : vector<2x16x64xf32> to vector<2x16x16xf32>
    "tpu.trace_start"() <{level = 10 : i32, message = "bqd,bkd->bqk"}> : () -> ()
    %cst_30 = arith.constant dense<0.000000e+00> : vector<2x16x16xf32>
    %80 = tpu.matmul %77, %78, %cst_30 {dimension_numbers = #tpu.dot_dimension_numbers<[2], [2], [1], [1], [0, 0, 0, 1, 1, 1], [0], [0]>} : vector<2x16x16xf32>, vector<2x16x16xf32>, vector<2x16x16xf32> -> vector<2x16x16xf32>
    "tpu.trace_stop"() : () -> ()
    %cst_31 = arith.constant 2.500000e-01 : f32
    %81 = vector.broadcast %cst_31 : f32 to vector<2x16x16xf32>
    %82 = arith.mulf %80, %81 : vector<2x16x16xf32>
    %cst_32 = arith.constant -1.000000e+30 : f32
    %83 = vector.shape_cast %15 : vector<1x16x16xi1> to vector<1x16x16xi1>
    %84 = vector.broadcast %83 : vector<1x16x16xi1> to vector<2x16x16xi1>
    %85 = vector.broadcast %cst_32 : f32 to vector<2x16x16xf32>
    %86 = arith.select %84, %82, %85 : vector<2x16x16xi1>, vector<2x16x16xf32>
    %cst_33 = arith.constant dense<0xFF800000> : vector<2x16xf32>
    %87 = vector.multi_reduction <maximumf>, %86, %cst_33 [2] : vector<2x16x16xf32> to vector<2x16xf32>
    %88 = vector.shape_cast %87 : vector<2x16xf32> to vector<2x16x1xf32>
    %89 = vector.broadcast %88 : vector<2x16x1xf32> to vector<2x16x16xf32>
    %90 = arith.subf %86, %89 : vector<2x16x16xf32>
    %91 = math.exp %90 : vector<2x16x16xf32>
    %cst_34 = arith.constant dense<0.000000e+00> : vector<2x16xf32>
    %92 = vector.multi_reduction <add>, %91, %cst_34 [2] : vector<2x16x16xf32> to vector<2x16xf32>
    %93 = vector.shape_cast %92 : vector<2x16xf32> to vector<2x16x1xf32>
    %94 = tpu.reciprocal %93 {approx = true} : vector<2x16x1xf32> -> vector<2x16x1xf32>
    %95 = vector.broadcast %94 : vector<2x16x1xf32> to vector<2x16x16xf32>
    %96 = arith.mulf %91, %95 : vector<2x16x16xf32>
    "tpu.trace_start"() <{level = 10 : i32, message = "bqk,bkd->bqd"}> : () -> ()
    %cst_35 = arith.constant dense<0.000000e+00> : vector<2x16x16xf32>
    %97 = tpu.matmul %96, %79, %cst_35 {dimension_numbers = #tpu.dot_dimension_numbers<[2], [1], [1], [2], [0, 0, 0, 1, 1, 2], [0], [0]>} : vector<2x16x16xf32>, vector<2x16x16xf32>, vector<2x16x16xf32> -> vector<2x16x16xf32>
    "tpu.trace_stop"() : () -> ()
    %98 = vector.shape_cast %97 : vector<2x16x16xf32> to vector<32x16xf32>
    %99 = arith.truncf %98 : vector<32x16xf32> to vector<32x16xbf16>
    %100 = vector.extract_strided_slice %51 {offsets = [16, 0], sizes = [16, 64], strides = [1, 1]} : vector<64x64xbf16> to vector<16x64xbf16>
    %cst_36 = arith.constant dense<0.000000e+00> : vector<32x64xf32>
    %101 = tpu.matmul %99, %100, %cst_36 {dimension_numbers = #tpu.dot_dimension_numbers<[1], [0], [0], [1], [0, 0, 1, 1], [], []>} : vector<32x16xbf16>, vector<16x64xbf16>, vector<32x64xf32> -> vector<32x64xf32>
    %102 = arith.addf %76, %101 : vector<32x64xf32>
    %103 = vector.extract_strided_slice %45 {offsets = [0, 0, 32], sizes = [2, 16, 16], strides = [1, 1, 1]} : vector<2x16x64xf32> to vector<2x16x16xf32>
    %104 = vector.extract_strided_slice %47 {offsets = [0, 0, 32], sizes = [2, 16, 16], strides = [1, 1, 1]} : vector<2x16x64xf32> to vector<2x16x16xf32>
    %105 = vector.extract_strided_slice %49 {offsets = [0, 0, 32], sizes = [2, 16, 16], strides = [1, 1, 1]} : vector<2x16x64xf32> to vector<2x16x16xf32>
    "tpu.trace_start"() <{level = 10 : i32, message = "bqd,bkd->bqk"}> : () -> ()
    %cst_37 = arith.constant dense<0.000000e+00> : vector<2x16x16xf32>
    %106 = tpu.matmul %103, %104, %cst_37 {dimension_numbers = #tpu.dot_dimension_numbers<[2], [2], [1], [1], [0, 0, 0, 1, 1, 1], [0], [0]>} : vector<2x16x16xf32>, vector<2x16x16xf32>, vector<2x16x16xf32> -> vector<2x16x16xf32>
    "tpu.trace_stop"() : () -> ()
    %cst_38 = arith.constant 2.500000e-01 : f32
    %107 = vector.broadcast %cst_38 : f32 to vector<2x16x16xf32>
    %108 = arith.mulf %106, %107 : vector<2x16x16xf32>
    %cst_39 = arith.constant -1.000000e+30 : f32
    %109 = vector.shape_cast %15 : vector<1x16x16xi1> to vector<1x16x16xi1>
    %110 = vector.broadcast %109 : vector<1x16x16xi1> to vector<2x16x16xi1>
    %111 = vector.broadcast %cst_39 : f32 to vector<2x16x16xf32>
    %112 = arith.select %110, %108, %111 : vector<2x16x16xi1>, vector<2x16x16xf32>
    %cst_40 = arith.constant dense<0xFF800000> : vector<2x16xf32>
    %113 = vector.multi_reduction <maximumf>, %112, %cst_40 [2] : vector<2x16x16xf32> to vector<2x16xf32>
    %114 = vector.shape_cast %113 : vector<2x16xf32> to vector<2x16x1xf32>
    %115 = vector.broadcast %114 : vector<2x16x1xf32> to vector<2x16x16xf32>
    %116 = arith.subf %112, %115 : vector<2x16x16xf32>
    %117 = math.exp %116 : vector<2x16x16xf32>
    %cst_41 = arith.constant dense<0.000000e+00> : vector<2x16xf32>
    %118 = vector.multi_reduction <add>, %117, %cst_41 [2] : vector<2x16x16xf32> to vector<2x16xf32>
    %119 = vector.shape_cast %118 : vector<2x16xf32> to vector<2x16x1xf32>
    %120 = tpu.reciprocal %119 {approx = true} : vector<2x16x1xf32> -> vector<2x16x1xf32>
    %121 = vector.broadcast %120 : vector<2x16x1xf32> to vector<2x16x16xf32>
    %122 = arith.mulf %117, %121 : vector<2x16x16xf32>
    "tpu.trace_start"() <{level = 10 : i32, message = "bqk,bkd->bqd"}> : () -> ()
    %cst_42 = arith.constant dense<0.000000e+00> : vector<2x16x16xf32>
    %123 = tpu.matmul %122, %105, %cst_42 {dimension_numbers = #tpu.dot_dimension_numbers<[2], [1], [1], [2], [0, 0, 0, 1, 1, 2], [0], [0]>} : vector<2x16x16xf32>, vector<2x16x16xf32>, vector<2x16x16xf32> -> vector<2x16x16xf32>
    "tpu.trace_stop"() : () -> ()
    %124 = vector.shape_cast %123 : vector<2x16x16xf32> to vector<32x16xf32>
    %125 = arith.truncf %124 : vector<32x16xf32> to vector<32x16xbf16>
    %126 = vector.extract_strided_slice %51 {offsets = [32, 0], sizes = [16, 64], strides = [1, 1]} : vector<64x64xbf16> to vector<16x64xbf16>
    %cst_43 = arith.constant dense<0.000000e+00> : vector<32x64xf32>
    %127 = tpu.matmul %125, %126, %cst_43 {dimension_numbers = #tpu.dot_dimension_numbers<[1], [0], [0], [1], [0, 0, 1, 1], [], []>} : vector<32x16xbf16>, vector<16x64xbf16>, vector<32x64xf32> -> vector<32x64xf32>
    %128 = arith.addf %102, %127 : vector<32x64xf32>
    %129 = vector.extract_strided_slice %45 {offsets = [0, 0, 48], sizes = [2, 16, 16], strides = [1, 1, 1]} : vector<2x16x64xf32> to vector<2x16x16xf32>
    %130 = vector.extract_strided_slice %47 {offsets = [0, 0, 48], sizes = [2, 16, 16], strides = [1, 1, 1]} : vector<2x16x64xf32> to vector<2x16x16xf32>
    %131 = vector.extract_strided_slice %49 {offsets = [0, 0, 48], sizes = [2, 16, 16], strides = [1, 1, 1]} : vector<2x16x64xf32> to vector<2x16x16xf32>
    "tpu.trace_start"() <{level = 10 : i32, message = "bqd,bkd->bqk"}> : () -> ()
    %cst_44 = arith.constant dense<0.000000e+00> : vector<2x16x16xf32>
    %132 = tpu.matmul %129, %130, %cst_44 {dimension_numbers = #tpu.dot_dimension_numbers<[2], [2], [1], [1], [0, 0, 0, 1, 1, 1], [0], [0]>} : vector<2x16x16xf32>, vector<2x16x16xf32>, vector<2x16x16xf32> -> vector<2x16x16xf32>
    "tpu.trace_stop"() : () -> ()
    %cst_45 = arith.constant 2.500000e-01 : f32
    %133 = vector.broadcast %cst_45 : f32 to vector<2x16x16xf32>
    %134 = arith.mulf %132, %133 : vector<2x16x16xf32>
    %cst_46 = arith.constant -1.000000e+30 : f32
    %135 = vector.shape_cast %15 : vector<1x16x16xi1> to vector<1x16x16xi1>
    %136 = vector.broadcast %135 : vector<1x16x16xi1> to vector<2x16x16xi1>
    %137 = vector.broadcast %cst_46 : f32 to vector<2x16x16xf32>
    %138 = arith.select %136, %134, %137 : vector<2x16x16xi1>, vector<2x16x16xf32>
    %cst_47 = arith.constant dense<0xFF800000> : vector<2x16xf32>
    %139 = vector.multi_reduction <maximumf>, %138, %cst_47 [2] : vector<2x16x16xf32> to vector<2x16xf32>
    %140 = vector.shape_cast %139 : vector<2x16xf32> to vector<2x16x1xf32>
    %141 = vector.broadcast %140 : vector<2x16x1xf32> to vector<2x16x16xf32>
    %142 = arith.subf %138, %141 : vector<2x16x16xf32>
    %143 = math.exp %142 : vector<2x16x16xf32>
    %cst_48 = arith.constant dense<0.000000e+00> : vector<2x16xf32>
    %144 = vector.multi_reduction <add>, %143, %cst_48 [2] : vector<2x16x16xf32> to vector<2x16xf32>
    %145 = vector.shape_cast %144 : vector<2x16xf32> to vector<2x16x1xf32>
    %146 = tpu.reciprocal %145 {approx = true} : vector<2x16x1xf32> -> vector<2x16x1xf32>
    %147 = vector.broadcast %146 : vector<2x16x1xf32> to vector<2x16x16xf32>
    %148 = arith.mulf %143, %147 : vector<2x16x16xf32>
    "tpu.trace_start"() <{level = 10 : i32, message = "bqk,bkd->bqd"}> : () -> ()
    %cst_49 = arith.constant dense<0.000000e+00> : vector<2x16x16xf32>
    %149 = tpu.matmul %148, %131, %cst_49 {dimension_numbers = #tpu.dot_dimension_numbers<[2], [1], [1], [2], [0, 0, 0, 1, 1, 2], [0], [0]>} : vector<2x16x16xf32>, vector<2x16x16xf32>, vector<2x16x16xf32> -> vector<2x16x16xf32>
    "tpu.trace_stop"() : () -> ()
    %150 = vector.shape_cast %149 : vector<2x16x16xf32> to vector<32x16xf32>
    %151 = arith.truncf %150 : vector<32x16xf32> to vector<32x16xbf16>
    %152 = vector.extract_strided_slice %51 {offsets = [48, 0], sizes = [16, 64], strides = [1, 1]} : vector<64x64xbf16> to vector<16x64xbf16>
    %cst_50 = arith.constant dense<0.000000e+00> : vector<32x64xf32>
    %153 = tpu.matmul %151, %152, %cst_50 {dimension_numbers = #tpu.dot_dimension_numbers<[1], [0], [0], [1], [0, 0, 1, 1], [], []>} : vector<32x16xbf16>, vector<16x64xbf16>, vector<32x64xf32> -> vector<32x64xf32>
    %154 = arith.addf %128, %153 : vector<32x64xf32>
    %155 = arith.addf %11, %154 : vector<32x64xf32>
    %c0_51 = arith.constant 0 : index
    %c0_52 = arith.constant 0 : index
    %c0_53 = arith.constant 0 : index
    %156 = vector.load %arg7[%c0_51, %c0_52, %c0_53] : memref<2x1x64xf32, #tpu.memory_space<vmem>>, vector<1x1x64xf32>
    %157 = vector.shape_cast %156 : vector<1x1x64xf32> to vector<1x64xf32>
    %158 = vector.broadcast %157 : vector<1x64xf32> to vector<32x64xf32>
    %159 = arith.addf %155, %158 : vector<32x64xf32>
    %c0_54 = arith.constant 0 : index
    %c0_55 = arith.constant 0 : index
    %c0_56 = arith.constant 0 : index
    %160 = vector.load %arg8[%c0_54, %c0_55, %c0_56] : memref<2x1x64xf32, #tpu.memory_space<vmem>>, vector<1x1x64xf32>
    %161 = vector.shape_cast %160 : vector<1x1x64xf32> to vector<1x64xf32>
    %c0_57 = arith.constant 0 : index
    %c0_58 = arith.constant 0 : index
    %c0_59 = arith.constant 0 : index
    %162 = vector.load %arg9[%c0_57, %c0_58, %c0_59] : memref<2x1x64xf32, #tpu.memory_space<vmem>>, vector<1x1x64xf32>
    %163 = vector.shape_cast %162 : vector<1x1x64xf32> to vector<1x64xf32>
    %cst_60 = arith.constant dense<0.000000e+00> : vector<32xf32>
    %164 = vector.multi_reduction <add>, %159, %cst_60 [1] : vector<32x64xf32> to vector<32xf32>
    %165 = vector.shape_cast %164 : vector<32xf32> to vector<32x1xf32>
    %cst_61 = arith.constant 6.400000e+01 : f32
    %166 = vector.broadcast %cst_61 : f32 to vector<32x1xf32>
    %167 = arith.divf %165, %166 : vector<32x1xf32>
    %168 = vector.broadcast %167 : vector<32x1xf32> to vector<32x64xf32>
    %169 = arith.subf %159, %168 : vector<32x64xf32>
    %170 = arith.mulf %169, %169 : vector<32x64xf32>
    %cst_62 = arith.constant dense<0.000000e+00> : vector<32xf32>
    %171 = vector.multi_reduction <add>, %170, %cst_62 [1] : vector<32x64xf32> to vector<32xf32>
    %172 = vector.shape_cast %171 : vector<32xf32> to vector<32x1xf32>
    %cst_63 = arith.constant 6.400000e+01 : f32
    %173 = vector.broadcast %cst_63 : f32 to vector<32x1xf32>
    %174 = arith.divf %172, %173 : vector<32x1xf32>
    %cst_64 = arith.constant 9.99999974E-6 : f32
    %175 = vector.broadcast %cst_64 : f32 to vector<32x1xf32>
    %176 = arith.addf %174, %175 : vector<32x1xf32>
    %177 = math.rsqrt %176 : vector<32x1xf32>
    %178 = vector.broadcast %177 : vector<32x1xf32> to vector<32x64xf32>
    %179 = arith.mulf %169, %178 : vector<32x64xf32>
    %180 = vector.broadcast %161 : vector<1x64xf32> to vector<32x64xf32>
    %181 = arith.mulf %179, %180 : vector<32x64xf32>
    %182 = vector.broadcast %163 : vector<1x64xf32> to vector<32x64xf32>
    %183 = arith.addf %181, %182 : vector<32x64xf32>
    %184 = arith.truncf %183 : vector<32x64xf32> to vector<32x64xbf16>
    %c0_65 = arith.constant 0 : index
    %c0_66 = arith.constant 0 : index
    %c0_67 = arith.constant 0 : index
    %185 = vector.load %arg10[%c0_65, %c0_66, %c0_67] : memref<2x64x256xbf16, #tpu.memory_space<vmem>>, vector<1x64x256xbf16>
    %186 = vector.shape_cast %185 : vector<1x64x256xbf16> to vector<64x256xbf16>
    %cst_68 = arith.constant dense<0.000000e+00> : vector<32x256xf32>
    %187 = tpu.matmul %184, %186, %cst_68 {dimension_numbers = #tpu.dot_dimension_numbers<[1], [0], [0], [1], [0, 0, 1, 1], [], []>} : vector<32x64xbf16>, vector<64x256xbf16>, vector<32x256xf32> -> vector<32x256xf32>
    %c0_69 = arith.constant 0 : index
    %c0_70 = arith.constant 0 : index
    %c0_71 = arith.constant 0 : index
    %188 = vector.load %arg11[%c0_69, %c0_70, %c0_71] : memref<2x1x256xf32, #tpu.memory_space<vmem>>, vector<1x1x256xf32>
    %189 = vector.shape_cast %188 : vector<1x1x256xf32> to vector<1x256xf32>
    %190 = vector.broadcast %189 : vector<1x256xf32> to vector<32x256xf32>
    %191 = arith.addf %187, %190 : vector<32x256xf32>
    %cst_72 = arith.constant 0.000000e+00 : f32
    %192 = vector.broadcast %cst_72 : f32 to vector<32x256xf32>
    %193 = arith.maximumf %191, %192 : vector<32x256xf32>
    %194 = arith.truncf %193 : vector<32x256xf32> to vector<32x256xbf16>
    %c0_73 = arith.constant 0 : index
    %c0_74 = arith.constant 0 : index
    %c0_75 = arith.constant 0 : index
    %195 = vector.load %arg12[%c0_73, %c0_74, %c0_75] : memref<2x256x64xbf16, #tpu.memory_space<vmem>>, vector<1x256x64xbf16>
    %196 = vector.shape_cast %195 : vector<1x256x64xbf16> to vector<256x64xbf16>
    %cst_76 = arith.constant dense<0.000000e+00> : vector<32x64xf32>
    %197 = tpu.matmul %194, %196, %cst_76 {dimension_numbers = #tpu.dot_dimension_numbers<[1], [0], [0], [1], [0, 0, 1, 1], [], []>} : vector<32x256xbf16>, vector<256x64xbf16>, vector<32x64xf32> -> vector<32x64xf32>
    %198 = arith.addf %159, %197 : vector<32x64xf32>
    %c0_77 = arith.constant 0 : index
    %c0_78 = arith.constant 0 : index
    %c0_79 = arith.constant 0 : index
    %199 = vector.load %arg13[%c0_77, %c0_78, %c0_79] : memref<2x1x64xf32, #tpu.memory_space<vmem>>, vector<1x1x64xf32>
    %200 = vector.shape_cast %199 : vector<1x1x64xf32> to vector<1x64xf32>
    %201 = vector.broadcast %200 : vector<1x64xf32> to vector<32x64xf32>
    %202 = arith.addf %198, %201 : vector<32x64xf32>
    %c1 = arith.constant 1 : index
    %c0_80 = arith.constant 0 : index
    %c0_81 = arith.constant 0 : index
    %203 = vector.load %arg3[%c1, %c0_80, %c0_81] : memref<2x1x64xf32, #tpu.memory_space<vmem>>, vector<1x1x64xf32>
    %204 = vector.shape_cast %203 : vector<1x1x64xf32> to vector<1x64xf32>
    %c1_82 = arith.constant 1 : index
    %c0_83 = arith.constant 0 : index
    %c0_84 = arith.constant 0 : index
    %205 = vector.load %arg4[%c1_82, %c0_83, %c0_84] : memref<2x1x64xf32, #tpu.memory_space<vmem>>, vector<1x1x64xf32>
    %206 = vector.shape_cast %205 : vector<1x1x64xf32> to vector<1x64xf32>
    %cst_85 = arith.constant dense<0.000000e+00> : vector<32xf32>
    %207 = vector.multi_reduction <add>, %202, %cst_85 [1] : vector<32x64xf32> to vector<32xf32>
    %208 = vector.shape_cast %207 : vector<32xf32> to vector<32x1xf32>
    %cst_86 = arith.constant 6.400000e+01 : f32
    %209 = vector.broadcast %cst_86 : f32 to vector<32x1xf32>
    %210 = arith.divf %208, %209 : vector<32x1xf32>
    %211 = vector.broadcast %210 : vector<32x1xf32> to vector<32x64xf32>
    %212 = arith.subf %202, %211 : vector<32x64xf32>
    %213 = arith.mulf %212, %212 : vector<32x64xf32>
    %cst_87 = arith.constant dense<0.000000e+00> : vector<32xf32>
    %214 = vector.multi_reduction <add>, %213, %cst_87 [1] : vector<32x64xf32> to vector<32xf32>
    %215 = vector.shape_cast %214 : vector<32xf32> to vector<32x1xf32>
    %cst_88 = arith.constant 6.400000e+01 : f32
    %216 = vector.broadcast %cst_88 : f32 to vector<32x1xf32>
    %217 = arith.divf %215, %216 : vector<32x1xf32>
    %cst_89 = arith.constant 9.99999974E-6 : f32
    %218 = vector.broadcast %cst_89 : f32 to vector<32x1xf32>
    %219 = arith.addf %217, %218 : vector<32x1xf32>
    %220 = math.rsqrt %219 : vector<32x1xf32>
    %221 = vector.broadcast %220 : vector<32x1xf32> to vector<32x64xf32>
    %222 = arith.mulf %212, %221 : vector<32x64xf32>
    %223 = vector.broadcast %204 : vector<1x64xf32> to vector<32x64xf32>
    %224 = arith.mulf %222, %223 : vector<32x64xf32>
    %225 = vector.broadcast %206 : vector<1x64xf32> to vector<32x64xf32>
    %226 = arith.addf %224, %225 : vector<32x64xf32>
    %227 = arith.truncf %226 : vector<32x64xf32> to vector<32x64xbf16>
    %c1_90 = arith.constant 1 : index
    %c0_91 = arith.constant 0 : index
    %c0_92 = arith.constant 0 : index
    %228 = vector.load %arg5[%c1_90, %c0_91, %c0_92] : memref<2x64x192xbf16, #tpu.memory_space<vmem>>, vector<1x64x192xbf16>
    %229 = vector.shape_cast %228 : vector<1x64x192xbf16> to vector<64x192xbf16>
    %cst_93 = arith.constant dense<0.000000e+00> : vector<32x192xf32>
    %230 = tpu.matmul %227, %229, %cst_93 {dimension_numbers = #tpu.dot_dimension_numbers<[1], [0], [0], [1], [0, 0, 1, 1], [], []>} : vector<32x64xbf16>, vector<64x192xbf16>, vector<32x192xf32> -> vector<32x192xf32>
    %231 = vector.extract_strided_slice %230 {offsets = [0, 0], sizes = [32, 64], strides = [1, 1]} : vector<32x192xf32> to vector<32x64xf32>
    %232 = vector.shape_cast %231 : vector<32x64xf32> to vector<2x16x64xf32>
    %233 = vector.extract_strided_slice %230 {offsets = [0, 64], sizes = [32, 64], strides = [1, 1]} : vector<32x192xf32> to vector<32x64xf32>
    %234 = vector.shape_cast %233 : vector<32x64xf32> to vector<2x16x64xf32>
    %235 = vector.extract_strided_slice %230 {offsets = [0, 128], sizes = [32, 64], strides = [1, 1]} : vector<32x192xf32> to vector<32x64xf32>
    %236 = vector.shape_cast %235 : vector<32x64xf32> to vector<2x16x64xf32>
    %c1_94 = arith.constant 1 : index
    %c0_95 = arith.constant 0 : index
    %c0_96 = arith.constant 0 : index
    %237 = vector.load %arg6[%c1_94, %c0_95, %c0_96] : memref<2x64x64xbf16, #tpu.memory_space<vmem>>, vector<1x64x64xbf16>
    %238 = vector.shape_cast %237 : vector<1x64x64xbf16> to vector<64x64xbf16>
    %239 = vector.extract_strided_slice %232 {offsets = [0, 0, 0], sizes = [2, 16, 16], strides = [1, 1, 1]} : vector<2x16x64xf32> to vector<2x16x16xf32>
    %240 = vector.extract_strided_slice %234 {offsets = [0, 0, 0], sizes = [2, 16, 16], strides = [1, 1, 1]} : vector<2x16x64xf32> to vector<2x16x16xf32>
    %241 = vector.extract_strided_slice %236 {offsets = [0, 0, 0], sizes = [2, 16, 16], strides = [1, 1, 1]} : vector<2x16x64xf32> to vector<2x16x16xf32>
    "tpu.trace_start"() <{level = 10 : i32, message = "bqd,bkd->bqk"}> : () -> ()
    %cst_97 = arith.constant dense<0.000000e+00> : vector<2x16x16xf32>
    %242 = tpu.matmul %239, %240, %cst_97 {dimension_numbers = #tpu.dot_dimension_numbers<[2], [2], [1], [1], [0, 0, 0, 1, 1, 1], [0], [0]>} : vector<2x16x16xf32>, vector<2x16x16xf32>, vector<2x16x16xf32> -> vector<2x16x16xf32>
    "tpu.trace_stop"() : () -> ()
    %cst_98 = arith.constant 2.500000e-01 : f32
    %243 = vector.broadcast %cst_98 : f32 to vector<2x16x16xf32>
    %244 = arith.mulf %242, %243 : vector<2x16x16xf32>
    %cst_99 = arith.constant -1.000000e+30 : f32
    %245 = vector.shape_cast %15 : vector<1x16x16xi1> to vector<1x16x16xi1>
    %246 = vector.broadcast %245 : vector<1x16x16xi1> to vector<2x16x16xi1>
    %247 = vector.broadcast %cst_99 : f32 to vector<2x16x16xf32>
    %248 = arith.select %246, %244, %247 : vector<2x16x16xi1>, vector<2x16x16xf32>
    %cst_100 = arith.constant dense<0xFF800000> : vector<2x16xf32>
    %249 = vector.multi_reduction <maximumf>, %248, %cst_100 [2] : vector<2x16x16xf32> to vector<2x16xf32>
    %250 = vector.shape_cast %249 : vector<2x16xf32> to vector<2x16x1xf32>
    %251 = vector.broadcast %250 : vector<2x16x1xf32> to vector<2x16x16xf32>
    %252 = arith.subf %248, %251 : vector<2x16x16xf32>
    %253 = math.exp %252 : vector<2x16x16xf32>
    %cst_101 = arith.constant dense<0.000000e+00> : vector<2x16xf32>
    %254 = vector.multi_reduction <add>, %253, %cst_101 [2] : vector<2x16x16xf32> to vector<2x16xf32>
    %255 = vector.shape_cast %254 : vector<2x16xf32> to vector<2x16x1xf32>
    %256 = tpu.reciprocal %255 {approx = true} : vector<2x16x1xf32> -> vector<2x16x1xf32>
    %257 = vector.broadcast %256 : vector<2x16x1xf32> to vector<2x16x16xf32>
    %258 = arith.mulf %253, %257 : vector<2x16x16xf32>
    "tpu.trace_start"() <{level = 10 : i32, message = "bqk,bkd->bqd"}> : () -> ()
    %cst_102 = arith.constant dense<0.000000e+00> : vector<2x16x16xf32>
    %259 = tpu.matmul %258, %241, %cst_102 {dimension_numbers = #tpu.dot_dimension_numbers<[2], [1], [1], [2], [0, 0, 0, 1, 1, 2], [0], [0]>} : vector<2x16x16xf32>, vector<2x16x16xf32>, vector<2x16x16xf32> -> vector<2x16x16xf32>
    "tpu.trace_stop"() : () -> ()
    %260 = vector.shape_cast %259 : vector<2x16x16xf32> to vector<32x16xf32>
    %261 = arith.truncf %260 : vector<32x16xf32> to vector<32x16xbf16>
    %262 = vector.extract_strided_slice %238 {offsets = [0, 0], sizes = [16, 64], strides = [1, 1]} : vector<64x64xbf16> to vector<16x64xbf16>
    %cst_103 = arith.constant dense<0.000000e+00> : vector<32x64xf32>
    %263 = tpu.matmul %261, %262, %cst_103 {dimension_numbers = #tpu.dot_dimension_numbers<[1], [0], [0], [1], [0, 0, 1, 1], [], []>} : vector<32x16xbf16>, vector<16x64xbf16>, vector<32x64xf32> -> vector<32x64xf32>
    %264 = vector.extract_strided_slice %232 {offsets = [0, 0, 16], sizes = [2, 16, 16], strides = [1, 1, 1]} : vector<2x16x64xf32> to vector<2x16x16xf32>
    %265 = vector.extract_strided_slice %234 {offsets = [0, 0, 16], sizes = [2, 16, 16], strides = [1, 1, 1]} : vector<2x16x64xf32> to vector<2x16x16xf32>
    %266 = vector.extract_strided_slice %236 {offsets = [0, 0, 16], sizes = [2, 16, 16], strides = [1, 1, 1]} : vector<2x16x64xf32> to vector<2x16x16xf32>
    "tpu.trace_start"() <{level = 10 : i32, message = "bqd,bkd->bqk"}> : () -> ()
    %cst_104 = arith.constant dense<0.000000e+00> : vector<2x16x16xf32>
    %267 = tpu.matmul %264, %265, %cst_104 {dimension_numbers = #tpu.dot_dimension_numbers<[2], [2], [1], [1], [0, 0, 0, 1, 1, 1], [0], [0]>} : vector<2x16x16xf32>, vector<2x16x16xf32>, vector<2x16x16xf32> -> vector<2x16x16xf32>
    "tpu.trace_stop"() : () -> ()
    %cst_105 = arith.constant 2.500000e-01 : f32
    %268 = vector.broadcast %cst_105 : f32 to vector<2x16x16xf32>
    %269 = arith.mulf %267, %268 : vector<2x16x16xf32>
    %cst_106 = arith.constant -1.000000e+30 : f32
    %270 = vector.shape_cast %15 : vector<1x16x16xi1> to vector<1x16x16xi1>
    %271 = vector.broadcast %270 : vector<1x16x16xi1> to vector<2x16x16xi1>
    %272 = vector.broadcast %cst_106 : f32 to vector<2x16x16xf32>
    %273 = arith.select %271, %269, %272 : vector<2x16x16xi1>, vector<2x16x16xf32>
    %cst_107 = arith.constant dense<0xFF800000> : vector<2x16xf32>
    %274 = vector.multi_reduction <maximumf>, %273, %cst_107 [2] : vector<2x16x16xf32> to vector<2x16xf32>
    %275 = vector.shape_cast %274 : vector<2x16xf32> to vector<2x16x1xf32>
    %276 = vector.broadcast %275 : vector<2x16x1xf32> to vector<2x16x16xf32>
    %277 = arith.subf %273, %276 : vector<2x16x16xf32>
    %278 = math.exp %277 : vector<2x16x16xf32>
    %cst_108 = arith.constant dense<0.000000e+00> : vector<2x16xf32>
    %279 = vector.multi_reduction <add>, %278, %cst_108 [2] : vector<2x16x16xf32> to vector<2x16xf32>
    %280 = vector.shape_cast %279 : vector<2x16xf32> to vector<2x16x1xf32>
    %281 = tpu.reciprocal %280 {approx = true} : vector<2x16x1xf32> -> vector<2x16x1xf32>
    %282 = vector.broadcast %281 : vector<2x16x1xf32> to vector<2x16x16xf32>
    %283 = arith.mulf %278, %282 : vector<2x16x16xf32>
    "tpu.trace_start"() <{level = 10 : i32, message = "bqk,bkd->bqd"}> : () -> ()
    %cst_109 = arith.constant dense<0.000000e+00> : vector<2x16x16xf32>
    %284 = tpu.matmul %283, %266, %cst_109 {dimension_numbers = #tpu.dot_dimension_numbers<[2], [1], [1], [2], [0, 0, 0, 1, 1, 2], [0], [0]>} : vector<2x16x16xf32>, vector<2x16x16xf32>, vector<2x16x16xf32> -> vector<2x16x16xf32>
    "tpu.trace_stop"() : () -> ()
    %285 = vector.shape_cast %284 : vector<2x16x16xf32> to vector<32x16xf32>
    %286 = arith.truncf %285 : vector<32x16xf32> to vector<32x16xbf16>
    %287 = vector.extract_strided_slice %238 {offsets = [16, 0], sizes = [16, 64], strides = [1, 1]} : vector<64x64xbf16> to vector<16x64xbf16>
    %cst_110 = arith.constant dense<0.000000e+00> : vector<32x64xf32>
    %288 = tpu.matmul %286, %287, %cst_110 {dimension_numbers = #tpu.dot_dimension_numbers<[1], [0], [0], [1], [0, 0, 1, 1], [], []>} : vector<32x16xbf16>, vector<16x64xbf16>, vector<32x64xf32> -> vector<32x64xf32>
    %289 = arith.addf %263, %288 : vector<32x64xf32>
    %290 = vector.extract_strided_slice %232 {offsets = [0, 0, 32], sizes = [2, 16, 16], strides = [1, 1, 1]} : vector<2x16x64xf32> to vector<2x16x16xf32>
    %291 = vector.extract_strided_slice %234 {offsets = [0, 0, 32], sizes = [2, 16, 16], strides = [1, 1, 1]} : vector<2x16x64xf32> to vector<2x16x16xf32>
    %292 = vector.extract_strided_slice %236 {offsets = [0, 0, 32], sizes = [2, 16, 16], strides = [1, 1, 1]} : vector<2x16x64xf32> to vector<2x16x16xf32>
    "tpu.trace_start"() <{level = 10 : i32, message = "bqd,bkd->bqk"}> : () -> ()
    %cst_111 = arith.constant dense<0.000000e+00> : vector<2x16x16xf32>
    %293 = tpu.matmul %290, %291, %cst_111 {dimension_numbers = #tpu.dot_dimension_numbers<[2], [2], [1], [1], [0, 0, 0, 1, 1, 1], [0], [0]>} : vector<2x16x16xf32>, vector<2x16x16xf32>, vector<2x16x16xf32> -> vector<2x16x16xf32>
    "tpu.trace_stop"() : () -> ()
    %cst_112 = arith.constant 2.500000e-01 : f32
    %294 = vector.broadcast %cst_112 : f32 to vector<2x16x16xf32>
    %295 = arith.mulf %293, %294 : vector<2x16x16xf32>
    %cst_113 = arith.constant -1.000000e+30 : f32
    %296 = vector.shape_cast %15 : vector<1x16x16xi1> to vector<1x16x16xi1>
    %297 = vector.broadcast %296 : vector<1x16x16xi1> to vector<2x16x16xi1>
    %298 = vector.broadcast %cst_113 : f32 to vector<2x16x16xf32>
    %299 = arith.select %297, %295, %298 : vector<2x16x16xi1>, vector<2x16x16xf32>
    %cst_114 = arith.constant dense<0xFF800000> : vector<2x16xf32>
    %300 = vector.multi_reduction <maximumf>, %299, %cst_114 [2] : vector<2x16x16xf32> to vector<2x16xf32>
    %301 = vector.shape_cast %300 : vector<2x16xf32> to vector<2x16x1xf32>
    %302 = vector.broadcast %301 : vector<2x16x1xf32> to vector<2x16x16xf32>
    %303 = arith.subf %299, %302 : vector<2x16x16xf32>
    %304 = math.exp %303 : vector<2x16x16xf32>
    %cst_115 = arith.constant dense<0.000000e+00> : vector<2x16xf32>
    %305 = vector.multi_reduction <add>, %304, %cst_115 [2] : vector<2x16x16xf32> to vector<2x16xf32>
    %306 = vector.shape_cast %305 : vector<2x16xf32> to vector<2x16x1xf32>
    %307 = tpu.reciprocal %306 {approx = true} : vector<2x16x1xf32> -> vector<2x16x1xf32>
    %308 = vector.broadcast %307 : vector<2x16x1xf32> to vector<2x16x16xf32>
    %309 = arith.mulf %304, %308 : vector<2x16x16xf32>
    "tpu.trace_start"() <{level = 10 : i32, message = "bqk,bkd->bqd"}> : () -> ()
    %cst_116 = arith.constant dense<0.000000e+00> : vector<2x16x16xf32>
    %310 = tpu.matmul %309, %292, %cst_116 {dimension_numbers = #tpu.dot_dimension_numbers<[2], [1], [1], [2], [0, 0, 0, 1, 1, 2], [0], [0]>} : vector<2x16x16xf32>, vector<2x16x16xf32>, vector<2x16x16xf32> -> vector<2x16x16xf32>
    "tpu.trace_stop"() : () -> ()
    %311 = vector.shape_cast %310 : vector<2x16x16xf32> to vector<32x16xf32>
    %312 = arith.truncf %311 : vector<32x16xf32> to vector<32x16xbf16>
    %313 = vector.extract_strided_slice %238 {offsets = [32, 0], sizes = [16, 64], strides = [1, 1]} : vector<64x64xbf16> to vector<16x64xbf16>
    %cst_117 = arith.constant dense<0.000000e+00> : vector<32x64xf32>
    %314 = tpu.matmul %312, %313, %cst_117 {dimension_numbers = #tpu.dot_dimension_numbers<[1], [0], [0], [1], [0, 0, 1, 1], [], []>} : vector<32x16xbf16>, vector<16x64xbf16>, vector<32x64xf32> -> vector<32x64xf32>
    %315 = arith.addf %289, %314 : vector<32x64xf32>
    %316 = vector.extract_strided_slice %232 {offsets = [0, 0, 48], sizes = [2, 16, 16], strides = [1, 1, 1]} : vector<2x16x64xf32> to vector<2x16x16xf32>
    %317 = vector.extract_strided_slice %234 {offsets = [0, 0, 48], sizes = [2, 16, 16], strides = [1, 1, 1]} : vector<2x16x64xf32> to vector<2x16x16xf32>
    %318 = vector.extract_strided_slice %236 {offsets = [0, 0, 48], sizes = [2, 16, 16], strides = [1, 1, 1]} : vector<2x16x64xf32> to vector<2x16x16xf32>
    "tpu.trace_start"() <{level = 10 : i32, message = "bqd,bkd->bqk"}> : () -> ()
    %cst_118 = arith.constant dense<0.000000e+00> : vector<2x16x16xf32>
    %319 = tpu.matmul %316, %317, %cst_118 {dimension_numbers = #tpu.dot_dimension_numbers<[2], [2], [1], [1], [0, 0, 0, 1, 1, 1], [0], [0]>} : vector<2x16x16xf32>, vector<2x16x16xf32>, vector<2x16x16xf32> -> vector<2x16x16xf32>
    "tpu.trace_stop"() : () -> ()
    %cst_119 = arith.constant 2.500000e-01 : f32
    %320 = vector.broadcast %cst_119 : f32 to vector<2x16x16xf32>
    %321 = arith.mulf %319, %320 : vector<2x16x16xf32>
    %cst_120 = arith.constant -1.000000e+30 : f32
    %322 = vector.shape_cast %15 : vector<1x16x16xi1> to vector<1x16x16xi1>
    %323 = vector.broadcast %322 : vector<1x16x16xi1> to vector<2x16x16xi1>
    %324 = vector.broadcast %cst_120 : f32 to vector<2x16x16xf32>
    %325 = arith.select %323, %321, %324 : vector<2x16x16xi1>, vector<2x16x16xf32>
    %cst_121 = arith.constant dense<0xFF800000> : vector<2x16xf32>
    %326 = vector.multi_reduction <maximumf>, %325, %cst_121 [2] : vector<2x16x16xf32> to vector<2x16xf32>
    %327 = vector.shape_cast %326 : vector<2x16xf32> to vector<2x16x1xf32>
    %328 = vector.broadcast %327 : vector<2x16x1xf32> to vector<2x16x16xf32>
    %329 = arith.subf %325, %328 : vector<2x16x16xf32>
    %330 = math.exp %329 : vector<2x16x16xf32>
    %cst_122 = arith.constant dense<0.000000e+00> : vector<2x16xf32>
    %331 = vector.multi_reduction <add>, %330, %cst_122 [2] : vector<2x16x16xf32> to vector<2x16xf32>
    %332 = vector.shape_cast %331 : vector<2x16xf32> to vector<2x16x1xf32>
    %333 = tpu.reciprocal %332 {approx = true} : vector<2x16x1xf32> -> vector<2x16x1xf32>
    %334 = vector.broadcast %333 : vector<2x16x1xf32> to vector<2x16x16xf32>
    %335 = arith.mulf %330, %334 : vector<2x16x16xf32>
    "tpu.trace_start"() <{level = 10 : i32, message = "bqk,bkd->bqd"}> : () -> ()
    %cst_123 = arith.constant dense<0.000000e+00> : vector<2x16x16xf32>
    %336 = tpu.matmul %335, %318, %cst_123 {dimension_numbers = #tpu.dot_dimension_numbers<[2], [1], [1], [2], [0, 0, 0, 1, 1, 2], [0], [0]>} : vector<2x16x16xf32>, vector<2x16x16xf32>, vector<2x16x16xf32> -> vector<2x16x16xf32>
    "tpu.trace_stop"() : () -> ()
    %337 = vector.shape_cast %336 : vector<2x16x16xf32> to vector<32x16xf32>
    %338 = arith.truncf %337 : vector<32x16xf32> to vector<32x16xbf16>
    %339 = vector.extract_strided_slice %238 {offsets = [48, 0], sizes = [16, 64], strides = [1, 1]} : vector<64x64xbf16> to vector<16x64xbf16>
    %cst_124 = arith.constant dense<0.000000e+00> : vector<32x64xf32>
    %340 = tpu.matmul %338, %339, %cst_124 {dimension_numbers = #tpu.dot_dimension_numbers<[1], [0], [0], [1], [0, 0, 1, 1], [], []>} : vector<32x16xbf16>, vector<16x64xbf16>, vector<32x64xf32> -> vector<32x64xf32>
    %341 = arith.addf %315, %340 : vector<32x64xf32>
    %342 = arith.addf %202, %341 : vector<32x64xf32>
    %c1_125 = arith.constant 1 : index
    %c0_126 = arith.constant 0 : index
    %c0_127 = arith.constant 0 : index
    %343 = vector.load %arg7[%c1_125, %c0_126, %c0_127] : memref<2x1x64xf32, #tpu.memory_space<vmem>>, vector<1x1x64xf32>
    %344 = vector.shape_cast %343 : vector<1x1x64xf32> to vector<1x64xf32>
    %345 = vector.broadcast %344 : vector<1x64xf32> to vector<32x64xf32>
    %346 = arith.addf %342, %345 : vector<32x64xf32>
    %c1_128 = arith.constant 1 : index
    %c0_129 = arith.constant 0 : index
    %c0_130 = arith.constant 0 : index
    %347 = vector.load %arg8[%c1_128, %c0_129, %c0_130] : memref<2x1x64xf32, #tpu.memory_space<vmem>>, vector<1x1x64xf32>
    %348 = vector.shape_cast %347 : vector<1x1x64xf32> to vector<1x64xf32>
    %c1_131 = arith.constant 1 : index
    %c0_132 = arith.constant 0 : index
    %c0_133 = arith.constant 0 : index
    %349 = vector.load %arg9[%c1_131, %c0_132, %c0_133] : memref<2x1x64xf32, #tpu.memory_space<vmem>>, vector<1x1x64xf32>
    %350 = vector.shape_cast %349 : vector<1x1x64xf32> to vector<1x64xf32>
    %cst_134 = arith.constant dense<0.000000e+00> : vector<32xf32>
    %351 = vector.multi_reduction <add>, %346, %cst_134 [1] : vector<32x64xf32> to vector<32xf32>
    %352 = vector.shape_cast %351 : vector<32xf32> to vector<32x1xf32>
    %cst_135 = arith.constant 6.400000e+01 : f32
    %353 = vector.broadcast %cst_135 : f32 to vector<32x1xf32>
    %354 = arith.divf %352, %353 : vector<32x1xf32>
    %355 = vector.broadcast %354 : vector<32x1xf32> to vector<32x64xf32>
    %356 = arith.subf %346, %355 : vector<32x64xf32>
    %357 = arith.mulf %356, %356 : vector<32x64xf32>
    %cst_136 = arith.constant dense<0.000000e+00> : vector<32xf32>
    %358 = vector.multi_reduction <add>, %357, %cst_136 [1] : vector<32x64xf32> to vector<32xf32>
    %359 = vector.shape_cast %358 : vector<32xf32> to vector<32x1xf32>
    %cst_137 = arith.constant 6.400000e+01 : f32
    %360 = vector.broadcast %cst_137 : f32 to vector<32x1xf32>
    %361 = arith.divf %359, %360 : vector<32x1xf32>
    %cst_138 = arith.constant 9.99999974E-6 : f32
    %362 = vector.broadcast %cst_138 : f32 to vector<32x1xf32>
    %363 = arith.addf %361, %362 : vector<32x1xf32>
    %364 = math.rsqrt %363 : vector<32x1xf32>
    %365 = vector.broadcast %364 : vector<32x1xf32> to vector<32x64xf32>
    %366 = arith.mulf %356, %365 : vector<32x64xf32>
    %367 = vector.broadcast %348 : vector<1x64xf32> to vector<32x64xf32>
    %368 = arith.mulf %366, %367 : vector<32x64xf32>
    %369 = vector.broadcast %350 : vector<1x64xf32> to vector<32x64xf32>
    %370 = arith.addf %368, %369 : vector<32x64xf32>
    %371 = arith.truncf %370 : vector<32x64xf32> to vector<32x64xbf16>
    %c1_139 = arith.constant 1 : index
    %c0_140 = arith.constant 0 : index
    %c0_141 = arith.constant 0 : index
    %372 = vector.load %arg10[%c1_139, %c0_140, %c0_141] : memref<2x64x256xbf16, #tpu.memory_space<vmem>>, vector<1x64x256xbf16>
    %373 = vector.shape_cast %372 : vector<1x64x256xbf16> to vector<64x256xbf16>
    %cst_142 = arith.constant dense<0.000000e+00> : vector<32x256xf32>
    %374 = tpu.matmul %371, %373, %cst_142 {dimension_numbers = #tpu.dot_dimension_numbers<[1], [0], [0], [1], [0, 0, 1, 1], [], []>} : vector<32x64xbf16>, vector<64x256xbf16>, vector<32x256xf32> -> vector<32x256xf32>
    %c1_143 = arith.constant 1 : index
    %c0_144 = arith.constant 0 : index
    %c0_145 = arith.constant 0 : index
    %375 = vector.load %arg11[%c1_143, %c0_144, %c0_145] : memref<2x1x256xf32, #tpu.memory_space<vmem>>, vector<1x1x256xf32>
    %376 = vector.shape_cast %375 : vector<1x1x256xf32> to vector<1x256xf32>
    %377 = vector.broadcast %376 : vector<1x256xf32> to vector<32x256xf32>
    %378 = arith.addf %374, %377 : vector<32x256xf32>
    %cst_146 = arith.constant 0.000000e+00 : f32
    %379 = vector.broadcast %cst_146 : f32 to vector<32x256xf32>
    %380 = arith.maximumf %378, %379 : vector<32x256xf32>
    %381 = arith.truncf %380 : vector<32x256xf32> to vector<32x256xbf16>
    %c1_147 = arith.constant 1 : index
    %c0_148 = arith.constant 0 : index
    %c0_149 = arith.constant 0 : index
    %382 = vector.load %arg12[%c1_147, %c0_148, %c0_149] : memref<2x256x64xbf16, #tpu.memory_space<vmem>>, vector<1x256x64xbf16>
    %383 = vector.shape_cast %382 : vector<1x256x64xbf16> to vector<256x64xbf16>
    %cst_150 = arith.constant dense<0.000000e+00> : vector<32x64xf32>
    %384 = tpu.matmul %381, %383, %cst_150 {dimension_numbers = #tpu.dot_dimension_numbers<[1], [0], [0], [1], [0, 0, 1, 1], [], []>} : vector<32x256xbf16>, vector<256x64xbf16>, vector<32x64xf32> -> vector<32x64xf32>
    %385 = arith.addf %346, %384 : vector<32x64xf32>
    %c1_151 = arith.constant 1 : index
    %c0_152 = arith.constant 0 : index
    %c0_153 = arith.constant 0 : index
    %386 = vector.load %arg13[%c1_151, %c0_152, %c0_153] : memref<2x1x64xf32, #tpu.memory_space<vmem>>, vector<1x1x64xf32>
    %387 = vector.shape_cast %386 : vector<1x1x64xf32> to vector<1x64xf32>
    %388 = vector.broadcast %387 : vector<1x64xf32> to vector<32x64xf32>
    %389 = arith.addf %385, %388 : vector<32x64xf32>
    %c0_154 = arith.constant 0 : index
    %c0_155 = arith.constant 0 : index
    %390 = vector.load %arg14[%c0_154, %c0_155] : memref<1x64xf32, #tpu.memory_space<vmem>>, vector<1x64xf32>
    %c0_156 = arith.constant 0 : index
    %c0_157 = arith.constant 0 : index
    %391 = vector.load %arg15[%c0_156, %c0_157] : memref<1x64xf32, #tpu.memory_space<vmem>>, vector<1x64xf32>
    %cst_158 = arith.constant dense<0.000000e+00> : vector<32xf32>
    %392 = vector.multi_reduction <add>, %389, %cst_158 [1] : vector<32x64xf32> to vector<32xf32>
    %393 = vector.shape_cast %392 : vector<32xf32> to vector<32x1xf32>
    %cst_159 = arith.constant 6.400000e+01 : f32
    %394 = vector.broadcast %cst_159 : f32 to vector<32x1xf32>
    %395 = arith.divf %393, %394 : vector<32x1xf32>
    %396 = vector.broadcast %395 : vector<32x1xf32> to vector<32x64xf32>
    %397 = arith.subf %389, %396 : vector<32x64xf32>
    %398 = arith.mulf %397, %397 : vector<32x64xf32>
    %cst_160 = arith.constant dense<0.000000e+00> : vector<32xf32>
    %399 = vector.multi_reduction <add>, %398, %cst_160 [1] : vector<32x64xf32> to vector<32xf32>
    %400 = vector.shape_cast %399 : vector<32xf32> to vector<32x1xf32>
    %cst_161 = arith.constant 6.400000e+01 : f32
    %401 = vector.broadcast %cst_161 : f32 to vector<32x1xf32>
    %402 = arith.divf %400, %401 : vector<32x1xf32>
    %cst_162 = arith.constant 9.99999974E-6 : f32
    %403 = vector.broadcast %cst_162 : f32 to vector<32x1xf32>
    %404 = arith.addf %402, %403 : vector<32x1xf32>
    %405 = math.rsqrt %404 : vector<32x1xf32>
    %406 = vector.broadcast %405 : vector<32x1xf32> to vector<32x64xf32>
    %407 = arith.mulf %397, %406 : vector<32x64xf32>
    %408 = vector.broadcast %390 : vector<1x64xf32> to vector<32x64xf32>
    %409 = arith.mulf %407, %408 : vector<32x64xf32>
    %410 = vector.broadcast %391 : vector<1x64xf32> to vector<32x64xf32>
    %411 = arith.addf %409, %410 : vector<32x64xf32>
    %412 = arith.truncf %411 : vector<32x64xf32> to vector<32x64xbf16>
    %c0_163 = arith.constant 0 : index
    %c0_164 = arith.constant 0 : index
    %413 = vector.load %arg16[%c0_163, %c0_164] : memref<64x128xbf16, #tpu.memory_space<vmem>>, vector<64x128xbf16>
    %cst_165 = arith.constant dense<0.000000e+00> : vector<32x128xf32>
    %414 = tpu.matmul %412, %413, %cst_165 {dimension_numbers = #tpu.dot_dimension_numbers<[1], [0], [0], [1], [0, 0, 1, 1], [], []>} : vector<32x64xbf16>, vector<64x128xbf16>, vector<32x128xf32> -> vector<32x128xf32>
    %c0_166 = arith.constant 0 : index
    %c0_167 = arith.constant 0 : index
    %415 = vector.load %arg17[%c0_166, %c0_167] : memref<1x128xf32, #tpu.memory_space<vmem>>, vector<1x128xf32>
    %416 = vector.broadcast %415 : vector<1x128xf32> to vector<32x128xf32>
    %417 = arith.addf %414, %416 : vector<32x128xf32>
    %418 = tpu.iota {dimensions = array<i32: 1>} : vector<32x128xi32>
    %c64_i32 = arith.constant 64 : i32
    %419 = vector.broadcast %c64_i32 : i32 to vector<32x128xi32>
    %420 = arith.cmpi slt, %418, %419 : vector<32x128xi32>
    %cst_168 = arith.constant -1.000000e+30 : f32
    %421 = vector.broadcast %cst_168 : f32 to vector<32x128xf32>
    %422 = arith.select %420, %417, %421 : vector<32x128xi1>, vector<32x128xf32>
    %c0_169 = arith.constant 0 : index
    %c0_170 = arith.constant 0 : index
    %423 = vector.load %arg18[%c0_169, %c0_170] : memref<32x128xf32, #tpu.memory_space<vmem>>, vector<32x128xf32>
    tpu.vector_store %arg18[%c0_169, %c0_170], %422 {strides = array<i32>} : memref<32x128xf32, #tpu.memory_space<vmem>>, vector<32x128xf32>,
    return
  }
}

</mosaic_0001>

<bundles_post_ra>
// kernel: arapoet_forward.1
= control target key start
LH: loop header
LB: loop body
LE: loop exit
PB: predicated region body
PF: predicated region fallthrough
CT: control target
= control target key end

     0   :  { %s7858_s0 = inlined_call_operand.vmem [shape: s32[32,1], index: 0, kind: input, shape index: {}]   ;;  %s7859_s1 = inlined_call_operand.vmem [shape: bf16[64,64], index: 1, kind: input, shape index: {}]   ;;  %s7860_s2 = inlined_call_operand.vmem [shape: f32[32,64], index: 2, kind: input, shape index: {}]   ;;  %s7861_s3 = inlined_call_operand.vmem [shape: f32[2,1,64], index: 3, kind: input, shape index: {}]   ;;  %s7862_s4 = inlined_call_operand.vmem [shape: f32[2,1,64], index: 4, kind: input, shape index: {}]   ;;  %s7863_s5 = inlined_call_operand.vmem [shape: bf16[2,64,192], index: 5, kind: input, shape index: {}]   ;;  %s7864_s6 = inlined_call_operand.vmem [shape: bf16[2,64,64], index: 6, kind: input, shape index: {}]   ;;  %s7865_s7 = inlined_call_operand.hbm [shape: f32[2,1,64], index: 7, kind: input, shape index: {}]   ;;  %s7866_s8 = inlined_call_operand.vmem [shape: f32[2,1,64], index: 8, kind: input, shape index: {}]   ;;  %s7867_s9 = inlined_call_operand.vmem [shape: f32[2,1,64], index: 9, kind: input, shape index: {}]   ;;  %s7868_s10 = inlined_call_operand.vmem [shape: bf16[2,64,256], index: 10, kind: input, shape index: {}]   ;;  %s7869_s11 = inlined_call_operand.hbm [shape: f32[2,1,256], index: 11, kind: input, shape index: {}]   ;;  %s7870_s12 = inlined_call_operand.vmem [shape: bf16[2,256,64], index: 12, kind: input, shape index: {}]   ;;  %s7871_s13 = inlined_call_operand.hbm [shape: f32[2,1,64], index: 13, kind: input, shape index: {}]   ;;  %s7872_s14 = inlined_call_operand.vmem [shape: f32[1,64], index: 14, kind: input, shape index: {}]   ;;  %s7873_s15 = inlined_call_operand.vmem [shape: f32[1,64], index: 15, kind: input, shape index: {}]   ;;  %s7874_s16 = inlined_call_operand.vmem [shape: bf16[64,128], index: 16, kind: input, shape index: {}]   ;;  %s7875_s17 = inlined_call_operand.hbm [shape: f32[1,128], index: 17, kind: input, shape index: {}]   ;;  %s7876_s18 = inlined_call_operand.hbm [shape: f32[32,128], index: 18, kind: output, shape index: {}]  }
   0x1   :  { %7880 = sst [smem:[#allocation15_spill]] %s7858_s0 }
   0x2   :  { %7881 = sst [smem:[#allocation16_spill]] %s7859_s1 }
   0x3   :  { %7882 = sst [smem:[#allocation17_spill]] %s7860_s2 }
   0x4   :  { %23 = vsyncpa [#allocation3], 0 }
   0x5   :  { %24 = vsyncpa [#allocation6], 0 }
   0x6   :  { %25 = vsyncpa [#allocation9], 0 }
   0x7   :  { %26 = vsyncpa [#allocation4], 0  ;;  %s6617_s27 = smov [#allocation5]  }
   0x8   :  { %s64_s28 = sshll.u32 %s6617_s27, 4  ;;  %s65_s28 = int_to_ptr.vmem [resolvable:$true] %s64_s28 }
   0x9   :  { %s6517_s29 = scalar_lea.vmem %s65_s28, 64  ;;  %p6522_p1 = scmp.lt.s32.totalorder %s65_s28, %s65_s28 }
   0xa   :  { %p6518_p0 = scmp.ne.s32.totalorder %s65_s28, %s6517_s29  ;;  %p6523_p2 = scmp.lt.s32.totalorder %s6517_s29, %s6517_s29 }
   0xc   :  { %p6524_p3 = por %p6523_p2, %p6522_p1 }
   0xe   :  { %p6525_p4 = pnand %p6524_p3, %p6518_p0 }
  0x10   :  { %6528 = shalt.err (!%p6525_p4)
}
  0x11   :  { %s6618_s30 = smov 32   ;;  %s6619_s0 = smov 2  }
  0x12   :  { %70 = dma.hbm_to_vmem [thread:$0]  %s7869_s11, 64, %s65_s28, [#allocation6], %s6618_s30, %s6618_s30, %s6619_s0  }
  0x13   :  { %s6620_s20 = smov [#allocation2]  }
  0x14   :  { %s46_s21 = sshll.u32 %s6620_s20, 4  ;;  %s47_s21 = int_to_ptr.vmem [resolvable:$true] %s46_s21 }
  0x15   :  { %s6537_s22 = scalar_lea.vmem %s47_s21, 32  ;;  %p6542_p6 = scmp.lt.s32.totalorder %s47_s21, %s47_s21 }
  0x16   :  { %p6538_p5 = scmp.ne.s32.totalorder %s47_s21, %s6537_s22  ;;  %p6543_p7 = scmp.lt.s32.totalorder %s6537_s22, %s6537_s22 }
  0x18   :  { %p6544_p8 = por %p6543_p7, %p6542_p6 }
  0x1a   :  { %p6545_p9 = pnand %p6544_p8, %p6538_p5 }
  0x1c   :  { %6548 = shalt.err (!%p6545_p9)
}
  0x1d   :  { %s6621_s2 = smov 16   ;;  %s6622_s23 = smov 1  }
  0x1e   :  { %52 = dma.hbm_to_vmem [thread:$0]  %s7865_s7, 32, %s47_s21, [#allocation3], %s6621_s2, %s6621_s2, %s6622_s23  }
  0x1f   :  { %s6623_s26 = smov [#allocation7]   ;;  %s6624_s27 = smov [#allocation8]  }
  0x20   :  { %s78_s11 = sshll.u32 %s6623_s26, 4  ;;  %s97_s28 = sshll.u32 %s6624_s27, 4  ;;  %s79_s11 = int_to_ptr.vmem [resolvable:$true] %s78_s11  ;;  %s98_s28 = int_to_ptr.vmem [resolvable:$true] %s97_s28 }
  0x21   :  { %s6557_s29 = scalar_lea.vmem %s79_s11, 32  ;;  %p6562_p11 = scmp.lt.s32.totalorder %s79_s11, %s79_s11 }
  0x22   :  { %p6558_p10 = scmp.ne.s32.totalorder %s79_s11, %s6557_s29  ;;  %p6563_p12 = scmp.lt.s32.totalorder %s6557_s29, %s6557_s29 }
  0x24   :  { %p6564_p13 = por %p6563_p12, %p6562_p11 }
  0x26   :  { %p6565_p0 = pnand %p6564_p13, %p6558_p10 }
  0x28   :  { %6568 = shalt.err (!%p6565_p0)
}
  0x29   :  { %84 = dma.hbm_to_vmem [thread:$0]  %s7871_s13, 32, %s79_s11, [#allocation6], %s6621_s2, %s6621_s2, %s6622_s23  }
  0x2a   :  { %s6577_s7 = scalar_lea.vmem %s98_s28, 16  ;;  %s6581_s1 = scalar_lea.vmem %s98_s28, 32 }
  0x2b   :  { %p6578_p1 = scmp.ne.s32.totalorder %s98_s28, %s6577_s7  ;;  %p6582_p2 = scmp.lt.s32.totalorder %s98_s28, %s98_s28 }
  0x2c   :  { %p6583_p3 = scmp.lt.s32.totalorder %s6581_s1, %s6577_s7 }
  0x2e   :  { %p6584_p4 = por %p6583_p3, %p6582_p2 }
  0x30   :  { %p6585_p5 = pnand %p6584_p4, %p6578_p1 }
  0x32   :  { %6588 = shalt.err (!%p6585_p5)
}
  0x33   :  { %100 = dma.hbm_to_vmem [thread:$0]  %s7875_s17, 16, %s98_s28, [#allocation9]  }
  0x34   :  { %6609 = dma.done.wait [#allocation3], 32  }
  0x35   :  { %6610 = vsyncadd [#allocation3], 4294967264 }
  0x36   :  { %6611 = dma.done.wait [#allocation6], 96  }
  0x37   :  { %6612 = vsyncadd [#allocation6], 4294967200 }
  0x38   :  { %6613 = dma.done.wait [#allocation9], 16  }
  0x39   :  { %6614 = vsyncadd [#allocation9], 4294967280  ;;  %v6625_v0 = vmov 0   ;;  %s7883_s23 = sld [smem:[#allocation15_spill]]  ;;  %v118_v9 = vlaneseq  ;;  %vm180_vm4 = vcmask 523264   ;;  %v6626_v15 = vmov 0.0  }
  0x3a   :  { %6244 = vset.pattern.permute.xlu1 %v6625_v0  ;;  %6243 = vset.pattern.permute.xlu0 %v6625_v0  ;;  %s7884_s0 = sld [smem:[#allocation16_spill]]  ;;  %v6249_v56 = vld [vmem:[%s7863_s5 + $0x34] ss:$8 sps:$4 sm:$0xff]   ;;  %v6251_v57 = vld [vmem:[%s7863_s5 + $0x30] ss:$8 sps:$4 sm:$0xff]   ;;  %vm439_vm5 = vcmask 130048  }
  0x3b   :  { %404 = vmatprep.mubr.bf16.mxu1 %v6625_v0  ;;  %v6776_v10 = vand.u32 127, %v118_v9  ;;  %s7885_s24 = sld [smem:[#allocation17_spill]]  ;;  %v6252_v58 = vld [vmem:[%s7863_s5 + $0x24] ss:$8 sps:$4 sm:$0xff]   ;;  %380 = vmatprep.subr.bf16.mxu1 %v6249_v56  ;;  %v6254_v59 = vld [vmem:[%s7863_s5 + $0x20] ss:$8 sps:$4 sm:$0xff]  }
  0x3c   :  { %381 = vmatpush1.bf16.msra.mxu1 %v6251_v57  ;;  %v6255_v60 = vld [vmem:[%s7863_s5 + $0x14] ss:$8 sps:$4 sm:$0xff]   ;;  %v6257_v61 = vld [vmem:[%s7863_s5 + $0x10] ss:$8 sps:$4 sm:$0xff]   ;;  %v6258_v62 = vld [vmem:[%s7863_s5 + $0x4] ss:$8 sps:$4 sm:$0xff]  }
  0x3d   :  { %382 = vmatprep.subr.bf16.mxu1 %v6252_v58  ;;  %v6260_v63 = vld [vmem:[%s7863_s5] ss:$8 sps:$4 sm:$0xff]   ;;  %s6627_s28 = smov 64   ;;  %s6628_s29 = smov 48   ;;  %vm5398_vm8 = vcmp.lt.s32.totalorder %v6776_v10, 64 }
  0x3e   :  { %s6630_s19 = smov 96   ;;  %s6631_s13 = smov 80  }
  0x3f   :  { %v116_v1 = vld [vmem:[%s7883_s23 + $0x10] sm:$0xff]  ;;  %v114_v2 = vld [vmem:[%s7883_s23] sm:$0xff]  ;;  %v117_v3 = vld [vmem:[%s7883_s23 + $0x18] sm:$0xff] }
  0x40   :  { %127 = vperm.xlu1 %6244, %v116_v1   ;;  %121 = vperm.xlu0 %6243, %v114_v2   ;;  %v115_v4 = vld [vmem:[%s7883_s23 + $0x8] sm:$0xff]  ;;  %v6245_v5 = vld [vmem:[%s7884_s0 + $0x18] sm:$0xff]   ;;  %v6246_v6 = vld [vmem:[%s7884_s0 + $0x10] sm:$0xff]  }
  0x41   :  { %5929 = vmatprep.subr.bf16.mxu0 %v6245_v5  ;;  %v6247_v7 = vld [vmem:[%s7884_s0 + $0x8] sm:$0xff]   ;;  %v6248_v8 = vld [vmem:[%s7884_s0] sm:$0xff]   ;;  %383 = vmatpush1.bf16.msra.mxu1 %v6254_v59  ;;  %s6629_s0 = smov 112  }
  0x42   :  { %5930 = vmatpush3.bf16.msra.mxu0 %v6245_v5  ;;  %v154_v23 = vld [vmem:[%s7885_s24] sm:$0xff]  ;;  %v155_v29 = vld [vmem:[%s7885_s24 + $0x8] sm:$0xff]  ;;  %384 = vmatprep.subr.bf16.mxu1 %v6255_v60 }
  0x43   :  { %5931 = vmatprep.subr.bf16.mxu0 %v6246_v6 }
  0x44   :  { %130 = vperm.xlu1 %6244, %v117_v3   ;;  %124 = vperm.xlu0 %6243, %v115_v4  }
  0x45   :  { %385 = vmatpush1.bf16.msra.mxu1 %v6257_v61 }
  0x46   :  { %5932 = vmatpush3.bf16.msra.mxu0 %v6246_v6  ;;  %386 = vmatprep.subr.bf16.mxu1 %v6258_v62 }
  0x47   :  { %5933 = vmatprep.subr.bf16.mxu0 %v6247_v7 }
  0x49   :  { %387 = vmatpush1.bf16.msra.mxu1 %v6260_v63 }
  0x4a   :  { %5934 = vmatpush3.bf16.msra.mxu0 %v6247_v7 }
  0x4b   :  { %5935 = vmatprep.subr.bf16.mxu0 %v6248_v8 }
  0x4e   :  { %5936 = vmatpush3.bf16.msra.mxu0 %v6248_v8 }
  0xbb   :  { %v128_v11 = vpop.permute.xlu1 %127  ;;  %v122_v12 = vpop.permute.xlu0 %121 }
  0xbc   :  { %vm134_vm0 = vcmp.eq.s32.totalorder %v128_v11, %v6776_v10  ;;  %vm132_vm1 = vcmp.eq.s32.totalorder %v122_v12, %v6776_v10 }
  0xbd   :  { %v5428_v16 = vsel %vm134_vm0, 1.0, %v6626_v15  ;;  %v5426_v18 = vsel %vm132_vm1, 1.0, %v6626_v15 }
  0xbf   :  { %v131_v13 = vpop.permute.xlu1 %130  ;;  %v125_v14 = vpop.permute.xlu0 %124 }
  0xc0   :  { %vm135_vm2 = vcmp.eq.s32.totalorder %v131_v13, %v6776_v10  ;;  %vm133_vm3 = vcmp.eq.s32.totalorder %v125_v14, %v6776_v10 }
  0xc1   :  { %v5429_v17 = vsel %vm135_vm2, 1.0, %v6626_v15  ;;  %v5427_v19 = vsel %vm133_vm3, 1.0, %v6626_v15 }
  0xc2   :  { %v145_v20 = vpack.c.bf16 %v5429_v17, %v5428_v16  ;;  %v144_v21 = vpack.c.bf16 %v5427_v19, %v5426_v18  ;;  %v5436_v17 = vld [vmem:[%s7861_s3] ss:$0 sm:$0xff] }
  0xc4   :  { %5937 = vmatprep.mubr.msk.bf16.mxu0 %vm180_vm4, %v144_v21 }
  0xc5   :  { %5938 = vmatmul.mubr.msk.bf16.vlgmr.msra.gmra.mxu0 %vm180_vm4, %v145_v20 }
 0x185   :  { %v5939_v22 = vpop.f32.mrf.mxu0 }
 0x186   :  { %v6789_v27 = vadd.f32 %v5939_v22, %v154_v23  ;;  %v5437_v22 = vld [vmem:[%s7862_s4] ss:$0 sm:$0xff] }
 0x187   :  { %v221_v24 = vpop.f32.mrf.mxu0 }
 0x188   :  { %v6787_v25 = vadd.f32 %v221_v24, %v154_v23  ;;  %v249_v34 = vsel %vm180_vm4, %v6789_v27, 0.0 }
 0x189   :  { %v5940_v26 = vpop.f32.mrf.mxu0 }
 0x18a   :  { %v243_v28 = vsel %vm180_vm4, %v6787_v25, 0.0  ;;  %v6798_v32 = vadd.f32 %v5940_v26, %v155_v29 }
 0x18b   :  { %v224_v30 = vpop.f32.mrf.mxu0  ;;  %244 = vadd.xlane.f32.xlu0 %v243_v28 }
 0x18c   :  { %v6796_v31 = vadd.f32 %v224_v30, %v155_v29  ;;  %v252_v35 = vsel %vm180_vm4, %v6798_v32, 0.0 }
 0x18e   :  { %v246_v33 = vsel %vm180_vm4, %v6796_v31, 0.0 }
 0x18f   :  { %247 = vadd.xlane.f32.xlu1 %v246_v33  ;;  %250 = vadd.xlane.f32.xlu0 %v249_v34 }
 0x193   :  { %253 = vadd.xlane.f32.xlu0 %v252_v35 }
 0x214   :  { %v245_v36 = vpop.xlane.xlu0 %244 }
 0x215   :  { %v256_v37 = vmul.f32 0.015625, %v245_v36 }
 0x217   :  { %v260_v38 = vsub.f32 %v6787_v25, %v256_v37 }
 0x218   :  { %v248_v39 = vpop.xlane.xlu1 %247  ;;  %v251_v40 = vpop.xlane.xlu0 %250 }
 0x219   :  { %v257_v41 = vmul.f32 0.015625, %v248_v39  ;;  %v258_v42 = vmul.f32 0.015625, %v251_v40  ;;  %v264_v43 = vmul.f32 %v260_v38, %v260_v38 }
 0x21b   :  { %v261_v44 = vsub.f32 %v6796_v31, %v257_v41  ;;  %v262_v45 = vsub.f32 %v6789_v27, %v258_v42  ;;  %v268_v46 = vsel %vm180_vm4, %v264_v43, 0.0 }
 0x21c   :  { %269 = vadd.xlane.f32.xlu1 %v268_v46  ;;  %v254_v47 = vpop.xlane.xlu0 %253 }
 0x21d   :  { %v259_v48 = vmul.f32 0.015625, %v254_v47  ;;  %v265_v49 = vmul.f32 %v261_v44, %v261_v44  ;;  %v266_v50 = vmul.f32 %v262_v45, %v262_v45 }
 0x21f   :  { %v263_v51 = vsub.f32 %v6798_v32, %v259_v48  ;;  %v271_v52 = vsel %vm180_vm4, %v265_v49, 0.0  ;;  %v274_v53 = vsel %vm180_vm4, %v266_v50, 0.0 }
 0x220   :  { %272 = vadd.xlane.f32.xlu0 %v271_v52  ;;  %275 = vadd.xlane.f32.xlu1 %v274_v53 }
 0x221   :  { %v267_v54 = vmul.f32 %v263_v51, %v263_v51 }
 0x223   :  { %v277_v55 = vsel %vm180_vm4, %v267_v54, 0.0 }
 0x224   :  { %278 = vadd.xlane.f32.xlu0 %v277_v55 }
 0x2a5   :  { %v270_v1 = vpop.xlane.xlu1 %269 }
 0x2a6   :  { %v280_v2 = vmul.f32 0.015625, %v270_v1 }
 0x2a8   :  { %v284_v3 = vadd.f32 1e-05, %v280_v2 }
 0x2a9   :  { %v276_v4 = vpop.xlane.xlu1 %275  ;;  %v273_v5 = vpop.xlane.xlu0 %272 }
 0x2aa   :  { %6341 = vrsqrt.f32 %v284_v3  ;;  %v282_v6 = vmul.f32 0.015625, %v276_v4  ;;  %v281_v7 = vmul.f32 0.015625, %v273_v5 }
 0x2ac   :  { %v285_v8 = vadd.f32 1e-05, %v281_v7  ;;  %v286_v11 = vadd.f32 1e-05, %v282_v6 }
 0x2ad   :  { %v279_v12 = vpop.xlane.xlu0 %278 }
 0x2ae   :  { %v283_v13 = vmul.f32 0.015625, %v279_v12  ;;  %6343 = vrsqrt.f32 %v285_v8 }
 0x2af   :  { %6345 = vrsqrt.f32 %v286_v11 }
 0x2b0   :  { %v287_v14 = vadd.f32 1e-05, %v283_v13 }
 0x2b2   :  { %6347 = vrsqrt.f32 %v287_v14 }
 0x2b7   :  { %v6342_v15 = vpop.eup %6341 }
 0x2b8   :  { %v292_v16 = vmul.f32 %v6342_v15, %v260_v38 }
 0x2ba   :  { %v302_v20 = vmul.f32 %v5436_v17, %v292_v16 }
 0x2bb   :  { %v6344_v18 = vpop.eup %6343 }
 0x2bc   :  { %v293_v19 = vmul.f32 %v6344_v18, %v261_v44  ;;  %v6346_v21 = vpop.eup %6345  ;;  %v312_v28 = vadd.f32 %v5437_v22, %v302_v20 }
 0x2bd   :  { %v294_v30 = vmul.f32 %v6346_v21, %v262_v45 }
 0x2be   :  { %v303_v24 = vmul.f32 %v5436_v17, %v293_v19 }
 0x2bf   :  { %v6348_v23 = vpop.eup %6347  ;;  %v304_v35 = vmul.f32 %v5436_v17, %v294_v30 }
 0x2c0   :  { %v295_v26 = vmul.f32 %v6348_v23, %v263_v51  ;;  %v313_v29 = vadd.f32 %v5437_v22, %v303_v24  ;;  %v6896_v51 = vshrl.u32 %v118_v9, 7 }
 0x2c1   :  { %v314_v37 = vadd.f32 %v5437_v22, %v304_v35 }
 0x2c2   :  { %v316_v33 = vpack.c.bf16 %v313_v29, %v312_v28  ;;  %v305_v34 = vmul.f32 %v5436_v17, %v295_v26  ;;  %v238_v52 = vadd.s32 8, %v6896_v51  ;;  %vm6906_vm7 = vcmp.le.s32.totalorder %v6776_v10, %v6896_v51 }
 0x2c4   :  { %5446 = vmatmul.mubr.msk.bf16.vlgmr.msra.gmra.mxu1 %vm180_vm4, %v316_v33  ;;  %v315_v36 = vadd.f32 %v5437_v22, %v305_v34  ;;  %vm6900_vm6 = vcmp.le.s32.totalorder %v6776_v10, %v238_v52 }
 0x2c5   :  { %414 = vmatprep.mubr.bf16.mxu1 %v6625_v0 }
 0x2c6   :  { %v317_v38 = vpack.c.bf16 %v315_v36, %v314_v37 }
 0x2cc   :  { %5447 = vmatmul.mubr.msk.bf16.gmra.mxu1 %vm180_vm4, %v317_v38 }
 0x384   :  { %v6847_v39 = vpop.f32.mrf.mxu1 }
 0x385   :  { %5945 = vmatprep.mubr.msk.f32.mxu1 %vm439_vm5, %v6847_v39 }
 0x386   :  { %v6851_v40 = vpop.f32.mrf.mxu1 }
 0x388   :  { %v6853_v41 = vpop.f32.mrf.mxu1 }
 0x389   :  { %437 = vrot.lane.b32.xlu1 %v6853_v41, %s6627_s28 }
 0x38a   :  { %v6857_v42 = vpop.f32.mrf.mxu1 }
 0x38c   :  { %v6859_v43 = vpop.f32.mrf.mxu1 }
 0x38d   :  { %435 = vrot.lane.b32.xlu1 %v6847_v39, %s6627_s28  ;;  %5952 = vmatprep.mubr.msk.f32.mxu0 %vm439_vm5, %v6859_v43 }
 0x38e   :  { %v6865_v44 = vpop.f32.mrf.mxu1 }
 0x390   :  { %v6867_v45 = vpop.f32.mrf.mxu1 }
 0x391   :  { %525 = vrot.lane.b32.xlu1 %v6859_v43, %s6627_s28  ;;  %527 = vrot.lane.b32.xlu0 %v6867_v45, %s6627_s28 }
 0x392   :  { %v6886_v50 = vpop.f32.mrf.mxu1 }
 0x3fb   :  { %v438_v46 = vpop.permute.xlu1 %437 }
 0x3fc   :  { %5941 = vmatprep.subr.msk.mxu1 %vm439_vm5, %v438_v46 }
 0x3fd   :  { %5942 = vmatpush3.xpose.msk.msra.mxu1 %vm439_vm5, %v438_v46 }
 0x3ff   :  { %v436_v47 = vpop.permute.xlu1 %435 }
 0x400   :  { %5943 = vmatprep.subr.msk.mxu1 %vm439_vm5, %v436_v47 }
 0x401   :  { %5944 = vmatpush3.xpose.msk.msra.mxu1 %vm439_vm5, %v436_v47 }
 0x402   :  { %5955 = vmatprep.subr.mxu1 %v6857_v42 }
 0x403   :  { %v528_v48 = vpop.permute.xlu0 %527  ;;  %v526_v49 = vpop.permute.xlu1 %525 }
 0x404   :  { %5946 = vmatmul.mubr.msk.f32.vlgmr.msra.gmra.mxu1 %vm439_vm5, %v6853_v41  ;;  %5948 = vmatprep.subr.msk.mxu0 %vm439_vm5, %v528_v48 }
 0x405   :  { %5949 = vmatpush3.xpose.msk.msra.mxu0 %vm439_vm5, %v528_v48  ;;  %5956 = vmatpush3.msra.mxu1 %v6857_v42 }
 0x406   :  { %5950 = vmatprep.subr.msk.mxu0 %vm439_vm5, %v526_v49  ;;  %5957 = vmatprep.subr.mxu1 %v6851_v40 }
 0x407   :  { %5958 = vmatpush3.msra.mxu1 %v6851_v40 }
 0x409   :  { %5951 = vmatpush3.xpose.msk.msra.mxu0 %vm439_vm5, %v526_v49 }
 0x40a   :  { %5962 = vmatprep.subr.mxu0 %v6886_v50 }
 0x40c   :  { %5953 = vmatmul.mubr.msk.f32.vlgmr.msra.gmra.mxu0 %vm439_vm5, %v6867_v45 }
 0x40d   :  { %5963 = vmatpush3.msra.mxu0 %v6886_v50 }
 0x40e   :  { %5964 = vmatprep.subr.mxu0 %v6865_v44 }
 0x40f   :  { %5965 = vmatpush3.msra.mxu0 %v6865_v44 }
 0x4c4   :  { %v5947_v54 = vpop.f32.mrf.mxu1 }
 0x4c5   :  { %v613_v55 = vmul.f32 0.25, %v5947_v54 }
 0x4c6   :  { %v514_v57 = vpop.f32.mrf.mxu1 }
 0x4c7   :  { %v612_v58 = vmul.f32 0.25, %v514_v57  ;;  %v621_v9 = vsel %vm6900_vm6, %v613_v55, -1e+30 }
 0x4c8   :  { %v627_v59 = vsel %vm439_vm5, %v621_v9, -inf }
 0x4c9   :  { %628 = vmax.xlane.f32.xlu1 %v627_v59  ;;  %v620_v60 = vsel %vm6906_vm7, %v612_v58, -1e+30 }
 0x4ca   :  { %v624_v61 = vsel %vm439_vm5, %v620_v60, -inf }
 0x4cb   :  { %625 = vmax.xlane.f32.xlu0 %v624_v61 }
 0x4cc   :  { %v5954_v62 = vpop.f32.mrf.mxu0 }
 0x4cd   :  { %v615_v1 = vmul.f32 0.25, %v5954_v62 }
 0x4ce   :  { %v603_v63 = vpop.f32.mrf.mxu0 }
 0x4cf   :  { %v614_v2 = vmul.f32 0.25, %v603_v63  ;;  %v623_v5 = vsel %vm6900_vm6, %v615_v1, -1e+30 }
 0x4d0   :  { %v633_v6 = vsel %vm439_vm5, %v623_v5, -inf }
 0x4d1   :  { %v622_v3 = vsel %vm6906_vm7, %v614_v2, -1e+30 }
 0x4d2   :  { %v630_v4 = vsel %vm439_vm5, %v622_v3, -inf }
 0x4d3   :  { %631 = vmax.xlane.f32.xlu0 %v630_v4 }
 0x4d7   :  { %634 = vmax.xlane.f32.xlu0 %v633_v6 }
 0x4da   :  { %838 = vrot.lane.b32.xlu1 %v6853_v41, %s6628_s29 }
 0x4de   :  { %836 = vrot.lane.b32.xlu1 %v6847_v39, %s6628_s29 }
 0x4e2   :  { %927 = vrot.lane.b32.xlu1 %v6859_v43, %s6628_s29 }
 0x4ed   :  { %929 = vrot.lane.b32.xlu0 %v6867_v45, %s6628_s29 }
 0x552   :  { %v629_v7 = vpop.xlane.xlu1 %628 }
 0x553   :  { %v637_v8 = vsub.f32 %v621_v9, %v629_v7 }
 0x554   :  { %v626_v11 = vpop.xlane.xlu0 %625 }
 0x555   :  { %v642_v12 = vmul.f32 1.442695, %v637_v8  ;;  %v636_v13 = vsub.f32 %v620_v60, %v626_v11 }
 0x556   :  { %v839_v14 = vpop.permute.xlu1 %838 }
 0x557   :  { %6349 = vpow2.f32 %v642_v12  ;;  %v640_v15 = vmul.f32 1.442695, %v636_v13  ;;  %5969 = vmatprep.subr.msk.mxu1 %vm439_vm5, %v839_v14 }
 0x559   :  { %6351 = vpow2.f32 %v640_v15 }
 0x55a   :  { %v837_v35 = vpop.permute.xlu1 %836 }
 0x55c   :  { %v632_v16 = vpop.xlane.xlu0 %631 }
 0x55d   :  { %v638_v29 = vsub.f32 %v622_v3, %v632_v16 }
 0x55e   :  { %v928_v36 = vpop.permute.xlu1 %927 }
 0x55f   :  { %v644_v30 = vmul.f32 1.442695, %v638_v29 }
 0x560   :  { %v635_v17 = vpop.xlane.xlu0 %634 }
 0x561   :  { %v639_v18 = vsub.f32 %v623_v5, %v635_v17 }
 0x563   :  { %v646_v19 = vmul.f32 1.442695, %v639_v18 }
 0x564   :  { %v6350_v20 = vpop.eup %6349  ;;  %v930_v21 = vpop.permute.xlu0 %929 }
 0x565   :  { %6353 = vpow2.f32 %v646_v19  ;;  %5976 = vmatprep.subr.msk.mxu0 %vm439_vm5, %v930_v21  ;;  %v651_v22 = vsel %vm439_vm5, %v6350_v20, 0.0 }
 0x566   :  { %v6352_v23 = vpop.eup %6351  ;;  %652 = vadd.xlane.f32.xlu0 %v651_v22  ;;  %6355 = vpow2.f32 %v644_v30 }
 0x567   :  { %v648_v24 = vsel %vm439_vm5, %v6352_v23, 0.0 }
 0x568   :  { %649 = vadd.xlane.f32.xlu1 %v648_v24 }
 0x572   :  { %v6354_v26 = vpop.eup %6353 }
 0x573   :  { %v657_v28 = vsel %vm439_vm5, %v6354_v26, 0.0  ;;  %v6356_v33 = vpop.eup %6355 }
 0x574   :  { %658 = vadd.xlane.f32.xlu0 %v657_v28  ;;  %v654_v34 = vsel %vm439_vm5, %v6356_v33, 0.0 }
 0x579   :  { %834 = vrot.lane.b32.xlu1 %v6853_v41, %s6629_s0 }
 0x58a   :  { %832 = vrot.lane.b32.xlu0 %v6847_v39, %s6629_s0 }
 0x58e   :  { %923 = vrot.lane.b32.xlu0 %v6859_v43, %s6629_s0 }
 0x59d   :  { %655 = vadd.xlane.f32.xlu1 %v654_v34 }
 0x5ae   :  { %925 = vrot.lane.b32.xlu1 %v6867_v45, %s6629_s0 }
 0x5ef   :  { %v653_v37 = vpop.xlane.xlu0 %652 }
 0x5f0   :  { %6357 = vrcp.f32 %v653_v37 }
 0x5f1   :  { %v650_v38 = vpop.xlane.xlu1 %649 }
 0x5f2   :  { %6359 = vrcp.f32 %v650_v38 }
 0x5f5   :  { %v835_v55 = vpop.permute.xlu1 %834 }
 0x5fd   :  { %v659_v46 = vpop.xlane.xlu0 %658  ;;  %v6358_v47 = vpop.eup %6357 }
 0x5fe   :  { %v665_v52 = vmul.f32 %v6358_v47, %v6350_v20  ;;  %6361 = vrcp.f32 %v659_v46 }
 0x5ff   :  { %v6360_v48 = vpop.eup %6359 }
 0x600   :  { %v664_v49 = vmul.f32 %v6360_v48, %v6352_v23 }
 0x601   :  { %v833_v54 = vpop.permute.xlu0 %832 }
 0x602   :  { %5959 = vmatprep.mubr.msk.f32.mxu1 %vm439_vm5, %v664_v49 }
 0x603   :  { %5960 = vmatmul.mubr.msk.f32.vlgmr.msra.gmra.mxu1 %vm439_vm5, %v665_v52 }
 0x604   :  { %5970 = vmatpush3.xpose.msk.msra.mxu1 %vm439_vm5, %v839_v14  ;;  %5973 = vmatprep.mubr.msk.f32.mxu1 %vm439_vm5, %v833_v54 }
 0x605   :  { %5971 = vmatprep.subr.msk.mxu1 %vm439_vm5, %v837_v35  ;;  %v924_v61 = vpop.permute.xlu0 %923 }
 0x608   :  { %5972 = vmatpush3.xpose.msk.msra.mxu1 %vm439_vm5, %v837_v35 }
 0x60b   :  { %5974 = vmatmul.mubr.msk.f32.vlgmr.msra.gmra.mxu1 %vm439_vm5, %v835_v55  ;;  %v6362_v58 = vpop.eup %6361 }
 0x60c   :  { %v667_v60 = vmul.f32 %v6362_v58, %v6354_v26 }
 0x626   :  { %v656_v57 = vpop.xlane.xlu1 %655 }
 0x627   :  { %6363 = vrcp.f32 %v656_v57 }
 0x62a   :  { %v926_v62 = vpop.permute.xlu1 %925 }
 0x634   :  { %v6364_v9 = vpop.eup %6363 }
 0x635   :  { %v666_v59 = vmul.f32 %v6364_v9, %v6356_v33 }
 0x637   :  { %5966 = vmatprep.mubr.msk.f32.mxu0 %vm439_vm5, %v666_v59 }
 0x638   :  { %5967 = vmatmul.mubr.msk.f32.vlgmr.msra.gmra.mxu0 %vm439_vm5, %v667_v60 }
 0x639   :  { %5977 = vmatpush3.xpose.msk.msra.mxu0 %vm439_vm5, %v930_v21  ;;  %5980 = vmatprep.mubr.msk.f32.mxu0 %vm439_vm5, %v924_v61  ;;  %v6261_v61 = vld [vmem:[%s7864_s6 + $0x8] sm:$0xff]  }
 0x63a   :  { %5978 = vmatprep.subr.msk.mxu0 %vm439_vm5, %v928_v36 }
 0x63d   :  { %5979 = vmatpush3.xpose.msk.msra.mxu0 %vm439_vm5, %v928_v36 }
 0x640   :  { %5981 = vmatmul.mubr.msk.f32.vlgmr.msra.gmra.mxu0 %vm439_vm5, %v926_v62 }
 0x6c3   :  { %v6958_v63 = vpop.f32.mrf.mxu1 }
 0x6c5   :  { %v6960_v1 = vpop.f32.mrf.mxu1 }
 0x6c6   :  { %v830_v2 = vpack.c.bf16 %v6958_v63, %v6960_v1 }
 0x6cb   :  { %v5975_v3 = vpop.f32.mrf.mxu1 }
 0x6cc   :  { %v1015_v4 = vmul.f32 0.25, %v5975_v3 }
 0x6cd   :  { %v914_v5 = vpop.f32.mrf.mxu1 }
 0x6ce   :  { %v1014_v6 = vmul.f32 0.25, %v914_v5  ;;  %v1019_v7 = vsel %vm6900_vm6, %v1015_v4, -1e+30 }
 0x6cf   :  { %v1025_v8 = vsel %vm439_vm5, %v1019_v7, -inf }
 0x6d0   :  { %1026 = vmax.xlane.f32.xlu1 %v1025_v8  ;;  %v1018_v11 = vsel %vm6906_vm7, %v1014_v6, -1e+30 }
 0x6d1   :  { %v1022_v12 = vsel %vm439_vm5, %v1018_v11, -inf }
 0x6d2   :  { %1023 = vmax.xlane.f32.xlu0 %v1022_v12 }
 0x6e1   :  { %1070 = vrot.lane.b32.xlu1 %v6857_v42, %s6629_s0 }
 0x6f8   :  { %v6972_v13 = vpop.f32.mrf.mxu0 }
 0x6fa   :  { %v6974_v14 = vpop.f32.mrf.mxu0 }
 0x6fb   :  { %v831_v15 = vpack.c.bf16 %v6972_v13, %v6974_v14 }
 0x700   :  { %v5982_v16 = vpop.f32.mrf.mxu0 }
 0x701   :  { %v1017_v18 = vmul.f32 0.25, %v5982_v16  ;;  %v6262_v16 = vld [vmem:[%s7864_s6] sm:$0xff]  }
 0x702   :  { %v1005_v17 = vpop.f32.mrf.mxu0 }
 0x703   :  { %v1016_v19 = vmul.f32 0.25, %v1005_v17  ;;  %v1021_v22 = vsel %vm6900_vm6, %v1017_v18, -1e+30 }
 0x704   :  { %v1031_v23 = vsel %vm439_vm5, %v1021_v22, -inf }
 0x705   :  { %v1020_v20 = vsel %vm6906_vm7, %v1016_v19, -1e+30 }
 0x706   :  { %v1028_v21 = vsel %vm439_vm5, %v1020_v20, -inf }
 0x707   :  { %1029 = vmax.xlane.f32.xlu0 %v1028_v21 }
 0x70b   :  { %1032 = vmax.xlane.f32.xlu0 %v1031_v23 }
 0x759   :  { %v1027_v24 = vpop.xlane.xlu1 %1026 }
 0x75a   :  { %v1035_v26 = vsub.f32 %v1019_v7, %v1027_v24 }
 0x75b   :  { %v1024_v28 = vpop.xlane.xlu0 %1023 }
 0x75c   :  { %v1040_v29 = vmul.f32 1.442695, %v1035_v26  ;;  %v1034_v30 = vsub.f32 %v1018_v11, %v1024_v28 }
 0x75d   :  { %v1071_v33 = vpop.permute.xlu1 %1070 }
 0x75e   :  { %6365 = vpow2.f32 %v1040_v29  ;;  %v1038_v34 = vmul.f32 1.442695, %v1034_v30  ;;  %5983 = vmatprep.subr.mxu1 %v1071_v33 }
 0x75f   :  { %5984 = vmatpush3.msra.mxu1 %v1071_v33 }
 0x760   :  { %6367 = vpow2.f32 %v1038_v34 }
 0x76b   :  { %v6366_v35 = vpop.eup %6365 }
 0x76c   :  { %v1049_v36 = vsel %vm439_vm5, %v6366_v35, 0.0 }
 0x76d   :  { %v6368_v37 = vpop.eup %6367  ;;  %1050 = vadd.xlane.f32.xlu0 %v1049_v36 }
 0x76e   :  { %v1046_v38 = vsel %vm439_vm5, %v6368_v37, 0.0 }
 0x76f   :  { %1047 = vadd.xlane.f32.xlu1 %v1046_v38 }
 0x780   :  { %1068 = vrot.lane.b32.xlu1 %v6851_v40, %s6629_s0 }
 0x790   :  { %v1030_v46 = vpop.xlane.xlu0 %1029 }
 0x791   :  { %v1036_v47 = vsub.f32 %v1020_v20, %v1030_v46 }
 0x793   :  { %v1042_v48 = vmul.f32 1.442695, %v1036_v47 }
 0x794   :  { %v1033_v49 = vpop.xlane.xlu0 %1032 }
 0x795   :  { %6369 = vpow2.f32 %v1042_v48  ;;  %v1037_v52 = vsub.f32 %v1021_v22, %v1033_v49 }
 0x797   :  { %v1044_v54 = vmul.f32 1.442695, %v1037_v52 }
 0x799   :  { %6371 = vpow2.f32 %v1044_v54 }
 0x7a2   :  { %v6370_v55 = vpop.eup %6369 }
 0x7a3   :  { %v1052_v57 = vsel %vm439_vm5, %v6370_v55, 0.0 }
 0x7a4   :  { %1053 = vadd.xlane.f32.xlu1 %v1052_v57 }
 0x7a6   :  { %v6372_v58 = vpop.eup %6371 }
 0x7a7   :  { %v1055_v9 = vsel %vm439_vm5, %v6372_v58, 0.0 }
 0x7a8   :  { %1056 = vadd.xlane.f32.xlu0 %v1055_v9 }
 0x7b5   :  { %1157 = vrot.lane.b32.xlu1 %v6865_v44, %s6629_s0 }
 0x7b9   :  { %1465 = vrot.lane.b32.xlu1 %v6867_v45, %s6618_s30 }
 0x7bd   :  { %1463 = vrot.lane.b32.xlu1 %v6859_v43, %s6618_s30 }
 0x7be   :  { %1159 = vrot.lane.b32.xlu0 %v6886_v50, %s6629_s0 }
 0x7c1   :  { %1370 = vrot.lane.b32.xlu1 %v6853_v41, %s6630_s19 }
 0x7c2   :  { %1374 = vrot.lane.b32.xlu0 %v6853_v41, %s6618_s30 }
 0x7c5   :  { %1461 = vrot.lane.b32.xlu1 %v6867_v45, %s6630_s19 }
 0x7c6   :  { %1372 = vrot.lane.b32.xlu0 %v6847_v39, %s6618_s30 }
 0x7ca   :  { %1368 = vrot.lane.b32.xlu0 %v6847_v39, %s6630_s19 }
 0x7ce   :  { %1459 = vrot.lane.b32.xlu0 %v6859_v43, %s6630_s19 }
 0x7f6   :  { %v1051_v59 = vpop.xlane.xlu0 %1050 }
 0x7f7   :  { %6373 = vrcp.f32 %v1051_v59 }
 0x7f8   :  { %v1048_v60 = vpop.xlane.xlu1 %1047 }
 0x7f9   :  { %6375 = vrcp.f32 %v1048_v60 }
 0x7fc   :  { %v1069_v62 = vpop.permute.xlu1 %1068 }
 0x7fd   :  { %5985 = vmatprep.subr.mxu1 %v1069_v62 }
 0x7fe   :  { %5986 = vmatpush3.msra.mxu1 %v1069_v62 }
 0x7ff   :  { %5997 = vmatprep.subr.bf16.mxu1 %v6261_v61 }
 0x804   :  { %v6374_v3 = vpop.eup %6373 }
 0x805   :  { %v1063_v6 = vmul.f32 %v6374_v3, %v6366_v35 }
 0x806   :  { %v6376_v4 = vpop.eup %6375 }
 0x807   :  { %v1062_v5 = vmul.f32 %v6376_v4, %v6368_v37 }
 0x809   :  { %5987 = vmatprep.mubr.msk.f32.mxu1 %vm439_vm5, %v1062_v5 }
 0x80a   :  { %5988 = vmatmul.mubr.msk.f32.vlgmr.msra.gmra.mxu1 %vm439_vm5, %v1063_v6 }
 0x80b   :  { %5998 = vmatpush3.bf16.msra.mxu1 %v6261_v61 }
 0x82d   :  { %v1054_v7 = vpop.xlane.xlu1 %1053 }
 0x82e   :  { %6377 = vrcp.f32 %v1054_v7 }
 0x831   :  { %v1057_v8 = vpop.xlane.xlu0 %1056  ;;  %v1158_v11 = vpop.permute.xlu1 %1157 }
 0x832   :  { %6379 = vrcp.f32 %v1057_v8 }
 0x835   :  { %v1160_v12 = vpop.permute.xlu0 %1159  ;;  %v1466_v19 = vpop.permute.xlu1 %1465 }
 0x836   :  { %5990 = vmatprep.subr.mxu0 %v1160_v12 }
 0x837   :  { %5991 = vmatpush3.msra.mxu0 %v1160_v12 }
 0x838   :  { %5992 = vmatprep.subr.mxu0 %v1158_v11 }
 0x839   :  { %5993 = vmatpush3.msra.mxu0 %v1158_v11  ;;  %v1375_v17 = vpop.permute.xlu0 %1374  ;;  %v1464_v24 = vpop.permute.xlu1 %1463 }
 0x83a   :  { %6009 = vmatprep.subr.msk.mxu1 %vm439_vm5, %v1375_v17  ;;  %6003 = vmatprep.subr.bf16.mxu0 %v6262_v16 }
 0x83b   :  { %v6378_v18 = vpop.eup %6377 }
 0x83c   :  { %v1064_v20 = vmul.f32 %v6378_v18, %v6370_v55 }
 0x83d   :  { %v1373_v21 = vpop.permute.xlu0 %1372  ;;  %v1371_v29 = vpop.permute.xlu1 %1370 }
 0x83e   :  { %5994 = vmatprep.mubr.msk.f32.mxu0 %vm439_vm5, %v1064_v20 }
 0x83f   :  { %v6380_v22 = vpop.eup %6379 }
 0x840   :  { %v1065_v23 = vmul.f32 %v6380_v22, %v6372_v58 }
 0x841   :  { %v1369_v26 = vpop.permute.xlu0 %1368  ;;  %v1462_v63 = vpop.permute.xlu1 %1461 }
 0x842   :  { %5995 = vmatmul.mubr.msk.f32.vlgmr.msra.gmra.mxu0 %vm439_vm5, %v1065_v23 }
 0x843   :  { %6004 = vmatpush3.bf16.msra.mxu0 %v6262_v16  ;;  %6005 = vmatprep.mubr.msk.bf16.mxu0 %vm439_vm5, %v830_v2 }
 0x844   :  { %6016 = vmatprep.subr.msk.mxu0 %vm439_vm5, %v1466_v19 }
 0x845   :  { %v1460_v28 = vpop.permute.xlu0 %1459 }
 0x846   :  { %6006 = vmatmul.mubr.msk.bf16.vlgmr.msra.gmra.mxu0 %vm439_vm5, %v831_v15 }
 0x847   :  { %6017 = vmatpush3.xpose.msk.msra.mxu0 %vm439_vm5, %v1466_v19  ;;  %6020 = vmatprep.mubr.msk.f32.mxu0 %vm439_vm5, %v1460_v28 }
 0x848   :  { %6018 = vmatprep.subr.msk.mxu0 %vm439_vm5, %v1464_v24 }
 0x84b   :  { %6019 = vmatpush3.xpose.msk.msra.mxu0 %vm439_vm5, %v1464_v24 }
 0x84e   :  { %6021 = vmatmul.mubr.msk.f32.vlgmr.msra.gmra.mxu0 %vm439_vm5, %v1462_v63 }
 0x8ca   :  { %v5989_v1 = vpop.f32.mrf.mxu1 }
 0x8cc   :  { %v1146_v2 = vpop.f32.mrf.mxu1 }
 0x8cd   :  { %v1244_v30 = vpack.c.bf16 %v5989_v1, %v1146_v2 }
 0x8cf   :  { %5999 = vmatprep.mubr.msk.bf16.mxu1 %vm439_vm5, %v1244_v30 }
 0x902   :  { %v5996_v13 = vpop.f32.mrf.mxu0 }
 0x904   :  { %v1235_v14 = vpop.f32.mrf.mxu0 }
 0x905   :  { %v1245_v15 = vpack.c.bf16 %v5996_v13, %v1235_v14 }
 0x906   :  { %v7036_v33 = vpop.f32.mrf.mxu0 }
 0x907   :  { %6000 = vmatmul.mubr.msk.bf16.vlgmr.msra.gmra.mxu1 %vm439_vm5, %v1245_v15 }
 0x908   :  { %6010 = vmatpush3.xpose.msk.msra.mxu1 %vm439_vm5, %v1375_v17  ;;  %v7040_v34 = vpop.f32.mrf.mxu0  ;;  %6013 = vmatprep.mubr.msk.f32.mxu1 %vm439_vm5, %v1369_v26 }
 0x909   :  { %6011 = vmatprep.subr.msk.mxu1 %vm439_vm5, %v1373_v21 }
 0x90a   :  { %v7044_v35 = vpop.f32.mrf.mxu0 }
 0x90c   :  { %6012 = vmatpush3.xpose.msk.msra.mxu1 %vm439_vm5, %v1373_v21  ;;  %v7047_v36 = vpop.f32.mrf.mxu0 }
 0x90e   :  { %v6022_v37 = vpop.f32.mrf.mxu0 }
 0x90f   :  { %6014 = vmatmul.mubr.msk.f32.vlgmr.msra.gmra.mxu1 %vm439_vm5, %v1371_v29  ;;  %v1553_v62 = vmul.f32 0.25, %v6022_v37 }
 0x910   :  { %v1541_v38 = vpop.f32.mrf.mxu0 }
 0x911   :  { %v1552_v46 = vmul.f32 0.25, %v1541_v38  ;;  %v1557_v11 = vsel %vm6900_vm6, %v1553_v62, -1e+30 }
 0x912   :  { %v1567_v16 = vsel %vm439_vm5, %v1557_v11, -inf }
 0x913   :  { %v1556_v47 = vsel %vm6906_vm7, %v1552_v46, -1e+30  ;;  %v6263_v46 = vld [vmem:[%s7864_s6 + $0x10] sm:$0xff]  }
 0x914   :  { %v1564_v48 = vsel %vm439_vm5, %v1556_v47, -inf }
 0x915   :  { %1565 = vmax.xlane.f32.xlu0 %v1564_v48 }
 0x99e   :  { %v1566_v49 = vpop.xlane.xlu0 %1565 }
 0x99f   :  { %v1572_v52 = vsub.f32 %v1556_v47, %v1566_v49 }
 0x9a1   :  { %v1578_v54 = vmul.f32 1.442695, %v1572_v52 }
 0x9a3   :  { %6381 = vpow2.f32 %v1578_v54 }
 0x9b0   :  { %v6382_v6 = vpop.eup %6381 }
 0x9b1   :  { %v1588_v12 = vsel %vm439_vm5, %v6382_v6, 0.0 }
 0x9c7   :  { %v7053_v55 = vpop.f32.mrf.mxu1 }
 0x9c9   :  { %v7055_v57 = vpop.f32.mrf.mxu1 }
 0x9cb   :  { %v7057_v58 = vpop.f32.mrf.mxu1 }
 0x9cd   :  { %v7059_v9 = vpop.f32.mrf.mxu1 }
 0x9cf   :  { %v6015_v59 = vpop.f32.mrf.mxu1 }
 0x9d0   :  { %v1551_v60 = vmul.f32 0.25, %v6015_v59 }
 0x9d1   :  { %v1450_v61 = vpop.f32.mrf.mxu1 }
 0x9d2   :  { %v1550_v3 = vmul.f32 0.25, %v1450_v61  ;;  %v1555_v4 = vsel %vm6900_vm6, %v1551_v60, -1e+30 }
 0x9d3   :  { %v1561_v5 = vsel %vm439_vm5, %v1555_v4, -inf }
 0x9d4   :  { %1562 = vmax.xlane.f32.xlu1 %v1561_v5  ;;  %v1554_v7 = vsel %vm6906_vm7, %v1550_v3, -1e+30 }
 0x9d5   :  { %v1558_v8 = vsel %vm439_vm5, %v1554_v7, -inf }
 0x9d6   :  { %1559 = vmax.xlane.f32.xlu0 %v1558_v8 }
 0x9d8   :  { %1589 = vadd.xlane.f32.xlu1 %v1588_v12 }
 0x9da   :  { %1568 = vmax.xlane.f32.xlu0 %v1567_v16 }
 0x9e9   :  { %1604 = vrot.lane.b32.xlu1 %v6857_v42, %s6630_s19 }
 0x9ed   :  { %1602 = vrot.lane.b32.xlu1 %v6851_v40, %s6630_s19 }
 0xa5d   :  { %v1563_v17 = vpop.xlane.xlu1 %1562 }
 0xa5e   :  { %v1571_v21 = vsub.f32 %v1555_v4, %v1563_v17 }
 0xa5f   :  { %v1560_v18 = vpop.xlane.xlu0 %1559 }
 0xa60   :  { %v1570_v19 = vsub.f32 %v1554_v7, %v1560_v18  ;;  %v1576_v28 = vmul.f32 1.442695, %v1571_v21 }
 0xa61   :  { %v1590_v20 = vpop.xlane.xlu1 %1589 }
 0xa62   :  { %v1574_v22 = vmul.f32 1.442695, %v1570_v19  ;;  %6383 = vrcp.f32 %v1590_v20 }
 0xa63   :  { %v1569_v23 = vpop.xlane.xlu0 %1568 }
 0xa64   :  { %6385 = vpow2.f32 %v1574_v22  ;;  %v1573_v24 = vsub.f32 %v1557_v11, %v1569_v23 }
 0xa65   :  { %v1605_v26 = vpop.permute.xlu1 %1604 }
 0xa66   :  { %v1580_v29 = vmul.f32 1.442695, %v1573_v24  ;;  %6023 = vmatprep.subr.mxu1 %v1605_v26 }
 0xa67   :  { %6024 = vmatpush3.msra.mxu1 %v1605_v26 }
 0xa68   :  { %6387 = vpow2.f32 %v1580_v29 }
 0xa69   :  { %v1603_v63 = vpop.permute.xlu1 %1602  ;;  %6389 = vpow2.f32 %v1576_v28 }
 0xa6a   :  { %6025 = vmatprep.subr.mxu1 %v1603_v63 }
 0xa6b   :  { %6026 = vmatpush3.msra.mxu1 %v1603_v63 }
 0xa6c   :  { %6037 = vmatprep.subr.bf16.mxu1 %v6263_v46 }
 0xa6f   :  { %v6384_v1 = vpop.eup %6383 }
 0xa70   :  { %v1600_v30 = vmul.f32 %v6384_v1, %v6382_v6 }
 0xa71   :  { %v6386_v2 = vpop.eup %6385 }
 0xa72   :  { %v1582_v13 = vsel %vm439_vm5, %v6386_v2, 0.0  ;;  %6034 = vmatprep.mubr.msk.f32.mxu0 %vm439_vm5, %v1600_v30 }
 0xa73   :  { %1583 = vadd.xlane.f32.xlu1 %v1582_v13 }
 0xa75   :  { %v6388_v14 = vpop.eup %6387 }
 0xa76   :  { %v1591_v15 = vsel %vm439_vm5, %v6388_v14, 0.0  ;;  %v6390_v37 = vpop.eup %6389 }
 0xa77   :  { %1592 = vadd.xlane.f32.xlu0 %v1591_v15  ;;  %v1585_v38 = vsel %vm439_vm5, %v6390_v37, 0.0 }
 0xa7b   :  { %1586 = vadd.xlane.f32.xlu0 %v1585_v38 }
 0xa84   :  { %1689 = vrot.lane.b32.xlu1 %v6865_v44, %s6630_s19 }
 0xa88   :  { %1940 = vrot.lane.b32.xlu1 %v6867_v45, %s6621_s2 }
 0xa8c   :  { %1938 = vrot.lane.b32.xlu1 %v6859_v43, %s6621_s2 }
 0xa90   :  { %1845 = vrot.lane.b32.xlu1 %v6853_v41, %s6631_s13 }
 0xa91   :  { %1691 = vrot.lane.b32.xlu0 %v6886_v50, %s6630_s19 }
 0xa94   :  { %1936 = vrot.lane.b32.xlu1 %v6867_v45, %s6631_s13 }
 0xa95   :  { %1849 = vrot.lane.b32.xlu0 %v6853_v41, %s6621_s2 }
 0xa99   :  { %1847 = vrot.lane.b32.xlu0 %v6847_v39, %s6621_s2 }
 0xa9d   :  { %1843 = vrot.lane.b32.xlu0 %v6847_v39, %s6631_s13 }
 0xaa1   :  { %1934 = vrot.lane.b32.xlu0 %v6859_v43, %s6631_s13 }
 0xafc   :  { %v1584_v47 = vpop.xlane.xlu1 %1583 }
 0xafd   :  { %6391 = vrcp.f32 %v1584_v47 }
 0xb00   :  { %v1593_v48 = vpop.xlane.xlu0 %1592  ;;  %v1690_v45 = vpop.permute.xlu1 %1689 }
 0xb01   :  { %6393 = vrcp.f32 %v1593_v48 }
 0xb04   :  { %v1587_v49 = vpop.xlane.xlu0 %1586  ;;  %v1941_v59 = vpop.permute.xlu1 %1940 }
 0xb05   :  { %6395 = vrcp.f32 %v1587_v49 }
 0xb08   :  { %v1692_v52 = vpop.permute.xlu0 %1691  ;;  %v1939_v3 = vpop.permute.xlu1 %1938 }
 0xb09   :  { %6030 = vmatprep.subr.mxu0 %v1692_v52 }
 0xb0a   :  { %v6392_v41 = vpop.eup %6391  ;;  %6031 = vmatpush3.msra.mxu0 %v1692_v52 }
 0xb0b   :  { %6032 = vmatprep.subr.mxu0 %v1690_v45  ;;  %v1598_v54 = vmul.f32 %v6392_v41, %v6386_v2 }
 0xb0c   :  { %6033 = vmatpush3.msra.mxu0 %v1690_v45  ;;  %v1850_v60 = vpop.permute.xlu0 %1849  ;;  %v1846_v6 = vpop.permute.xlu1 %1845  ;;  %v1365_v45 = vadd.f32 %v7044_v35, %v7057_v58 }
 0xb0d   :  { %6027 = vmatprep.mubr.msk.f32.mxu1 %vm439_vm5, %v1598_v54  ;;  %6043 = vmatprep.subr.msk.mxu0 %vm439_vm5, %v1850_v60 }
 0xb0e   :  { %v6394_v39 = vpop.eup %6393 }
 0xb0f   :  { %v1601_v43 = vmul.f32 %v6394_v39, %v6388_v14 }
 0xb10   :  { %v1848_v61 = vpop.permute.xlu0 %1847  ;;  %v1937_v29 = vpop.permute.xlu1 %1936 }
 0xb11   :  { %6035 = vmatmul.mubr.msk.f32.vlgmr.msra.gmra.mxu0 %vm439_vm5, %v1601_v43 }
 0xb12   :  { %v6396_v62 = vpop.eup %6395  ;;  %6044 = vmatpush3.xpose.msk.msra.mxu0 %vm439_vm5, %v1850_v60 }
 0xb13   :  { %6045 = vmatprep.subr.msk.mxu0 %vm439_vm5, %v1848_v61  ;;  %v1599_v4 = vmul.f32 %v6396_v62, %v6390_v37  ;;  %v1362_v37 = vadd.f32 %v7036_v33, %v7053_v55 }
 0xb14   :  { %v1844_v5 = vpop.permute.xlu0 %1843 }
 0xb15   :  { %6028 = vmatmul.mubr.msk.f32.vlgmr.msra.gmra.mxu1 %vm439_vm5, %v1599_v4  ;;  %6047 = vmatprep.mubr.msk.f32.mxu0 %vm439_vm5, %v1844_v5 }
 0xb16   :  { %6038 = vmatpush3.bf16.msra.mxu1 %v6263_v46  ;;  %6046 = vmatpush3.xpose.msk.msra.mxu0 %vm439_vm5, %v1848_v61  ;;  %v1354_v46 = vadd.f32 %v7040_v34, %v7055_v57 }
 0xb17   :  { %6050 = vmatprep.subr.msk.mxu1 %vm439_vm5, %v1941_v59 }
 0xb18   :  { %v1935_v20 = vpop.permute.xlu0 %1934 }
 0xb19   :  { %6048 = vmatmul.mubr.msk.f32.vlgmr.msra.gmra.mxu0 %vm439_vm5, %v1846_v6 }
 0xbd1   :  { %v6036_v7 = vpop.f32.mrf.mxu0 }
 0xbd3   :  { %v1767_v11 = vpop.f32.mrf.mxu0 }
 0xbd4   :  { %v1777_v17 = vpack.c.bf16 %v6036_v7, %v1767_v11 }
 0xbd5   :  { %v6029_v8 = vpop.f32.mrf.mxu1 }
 0xbd7   :  { %v1680_v12 = vpop.f32.mrf.mxu1 }
 0xbd8   :  { %v1776_v16 = vpack.c.bf16 %v6029_v8, %v1680_v12 }
 0xbd9   :  { %v6049_v18 = vpop.f32.mrf.mxu0 }
 0xbda   :  { %v2026_v19 = vmul.f32 0.25, %v6049_v18  ;;  %6039 = vmatprep.mubr.msk.bf16.mxu1 %vm439_vm5, %v1776_v16 }
 0xbdb   :  { %v1925_v21 = vpop.f32.mrf.mxu0  ;;  %6040 = vmatmul.mubr.msk.bf16.vlgmr.msra.gmra.mxu1 %vm439_vm5, %v1777_v17 }
 0xbdc   :  { %v2025_v22 = vmul.f32 0.25, %v1925_v21  ;;  %6051 = vmatpush3.xpose.msk.msra.mxu1 %vm439_vm5, %v1941_v59  ;;  %6054 = vmatprep.mubr.msk.f32.mxu1 %vm439_vm5, %v1935_v20  ;;  %v2030_v23 = vsel %vm6900_vm6, %v2026_v19, -1e+30 }
 0xbdd   :  { %6052 = vmatprep.subr.msk.mxu1 %vm439_vm5, %v1939_v3  ;;  %v2036_v24 = vsel %vm439_vm5, %v2030_v23, -inf }
 0xbde   :  { %2037 = vmax.xlane.f32.xlu1 %v2036_v24  ;;  %v2029_v26 = vsel %vm6906_vm7, %v2025_v22, -1e+30 }
 0xbdf   :  { %v2033_v28 = vsel %vm439_vm5, %v2029_v26, -inf }
 0xbe0   :  { %6053 = vmatpush3.xpose.msk.msra.mxu1 %vm439_vm5, %v1939_v3  ;;  %2034 = vmax.xlane.f32.xlu0 %v2033_v28 }
 0xbe3   :  { %6055 = vmatmul.mubr.msk.f32.vlgmr.msra.gmra.mxu1 %vm439_vm5, %v1937_v29 }
 0xc67   :  { %v2038_v14 = vpop.xlane.xlu1 %2037 }
 0xc68   :  { %v2046_v15 = vsub.f32 %v2030_v23, %v2038_v14 }
 0xc69   :  { %v2035_v63 = vpop.xlane.xlu0 %2034 }
 0xc6a   :  { %v2045_v1 = vsub.f32 %v2029_v26, %v2035_v63  ;;  %v2051_v48 = vmul.f32 1.442695, %v2046_v15 }
 0xc6c   :  { %v2049_v2 = vmul.f32 1.442695, %v2045_v1 }
 0xc6e   :  { %6397 = vpow2.f32 %v2049_v2 }
 0xc6f   :  { %6399 = vpow2.f32 %v2051_v48 }
 0xc7b   :  { %v6398_v30 = vpop.eup %6397 }
 0xc7c   :  { %v2057_v13 = vsel %vm439_vm5, %v6398_v30, 0.0 }
 0xc7d   :  { %2058 = vadd.xlane.f32.xlu1 %v2057_v13  ;;  %v6264_v13 = vld [vmem:[%s7864_s6 + $0x18] sm:$0xff]  }
 0xc8e   :  { %2079 = vrot.lane.b32.xlu1 %v6857_v42, %s6631_s13 }
 0xc92   :  { %2077 = vrot.lane.b32.xlu1 %v6851_v40, %s6631_s13  ;;  %v1357_v40 = vadd.f32 %v7047_v36, %v7059_v9  ;;  %v6400_v9 = vpop.eup %6399 }
 0xc93   :  { %v2060_v39 = vsel %vm439_vm5, %v6400_v9, 0.0 }
 0xc9b   :  { %v6041_v38 = vpop.f32.mrf.mxu1 }
 0xc9c   :  { %v7134_v47 = vadd.f32 %v6041_v38, %v1362_v37 }
 0xc9d   :  { %v1824_v49 = vpop.f32.mrf.mxu1 }
 0xc9e   :  { %v7138_v42 = vadd.f32 %v1824_v49, %v1354_v46 }
 0xc9f   :  { %v6042_v52 = vpop.f32.mrf.mxu1 }
 0xca0   :  { %v7142_v41 = vadd.f32 %v6042_v52, %v1365_v45 }
 0xca1   :  { %v1827_v33 = vpop.f32.mrf.mxu1 }
 0xca2   :  { %v7144_v55 = vadd.f32 %v1827_v33, %v1357_v40 }
 0xca3   :  { %v6056_v34 = vpop.f32.mrf.mxu1 }
 0xca4   :  { %v2028_v54 = vmul.f32 0.25, %v6056_v34  ;;  %v5508_v34 = vld [vmem:[#allocation2] ss:$0 sm:$0xff] }
 0xca5   :  { %v2016_v57 = vpop.f32.mrf.mxu1 }
 0xca6   :  { %v2027_v59 = vmul.f32 0.25, %v2016_v57  ;;  %v2032_v58 = vsel %vm6900_vm6, %v2028_v54, -1e+30 }
 0xca7   :  { %v2042_v36 = vsel %vm439_vm5, %v2032_v58, -inf }
 0xca8   :  { %v2031_v60 = vsel %vm6906_vm7, %v2027_v59, -1e+30 }
 0xca9   :  { %v2039_v35 = vsel %vm439_vm5, %v2031_v60, -inf }
 0xcaa   :  { %2040 = vmax.xlane.f32.xlu0 %v2039_v35 }
 0xcae   :  { %2043 = vmax.xlane.f32.xlu0 %v2042_v36 }
 0xcb2   :  { %2061 = vadd.xlane.f32.xlu0 %v2060_v39 }
 0xd06   :  { %v2059_v43 = vpop.xlane.xlu1 %2058 }
 0xd07   :  { %6401 = vrcp.f32 %v2059_v43 }
 0xd0a   :  { %v2080_v61 = vpop.permute.xlu1 %2079 }
 0xd0b   :  { %6057 = vmatprep.subr.mxu0 %v2080_v61 }
 0xd0c   :  { %6058 = vmatpush3.msra.mxu0 %v2080_v61 }
 0xd0e   :  { %v2078_v62 = vpop.permute.xlu1 %2077 }
 0xd0f   :  { %6059 = vmatprep.subr.mxu0 %v2078_v62 }
 0xd10   :  { %6060 = vmatpush3.msra.mxu0 %v2078_v62 }
 0xd11   :  { %6071 = vmatprep.subr.bf16.mxu0 %v6264_v13 }
 0xd14   :  { %v6402_v3 = vpop.eup %6401 }
 0xd15   :  { %v2073_v4 = vmul.f32 %v6402_v3, %v6398_v30 }
 0xd17   :  { %6061 = vmatprep.mubr.msk.f32.mxu0 %vm439_vm5, %v2073_v4 }
 0xd33   :  { %v2041_v5 = vpop.xlane.xlu0 %2040 }
 0xd34   :  { %v2047_v6 = vsub.f32 %v2031_v60, %v2041_v5 }
 0xd36   :  { %v2053_v7 = vmul.f32 1.442695, %v2047_v6 }
 0xd37   :  { %v2044_v8 = vpop.xlane.xlu0 %2043 }
 0xd38   :  { %6403 = vpow2.f32 %v2053_v7  ;;  %v2048_v11 = vsub.f32 %v2032_v58, %v2044_v8 }
 0xd3a   :  { %v2055_v12 = vmul.f32 1.442695, %v2048_v11 }
 0xd3b   :  { %v2062_v16 = vpop.xlane.xlu0 %2061 }
 0xd3c   :  { %6405 = vpow2.f32 %v2055_v12 }
 0xd3d   :  { %6407 = vrcp.f32 %v2062_v16 }
 0xd45   :  { %v6404_v17 = vpop.eup %6403 }
 0xd46   :  { %v2063_v18 = vsel %vm439_vm5, %v6404_v17, 0.0 }
 0xd47   :  { %2064 = vadd.xlane.f32.xlu1 %v2063_v18 }
 0xd49   :  { %v6406_v19 = vpop.eup %6405 }
 0xd4a   :  { %v6408_v20 = vpop.eup %6407  ;;  %v2066_v21 = vsel %vm439_vm5, %v6406_v19, 0.0 }
 0xd4b   :  { %2067 = vadd.xlane.f32.xlu0 %v2066_v21  ;;  %v2074_v22 = vmul.f32 %v6408_v20, %v6400_v9  ;;  %v6267_v20 = vld [vmem:[%s7868_s10 + $0x34] ss:$8 sps:$4 sm:$0xff]   ;;  %v6265_v21 = vld [vmem:[%s7868_s10 + $0x30] ss:$8 sps:$4 sm:$0xff]  }
 0xd4d   :  { %6062 = vmatmul.mubr.msk.f32.vlgmr.msra.gmra.mxu0 %vm439_vm5, %v2074_v22  ;;  %v6270_v22 = vld [vmem:[%s7868_s10 + $0x24] ss:$8 sps:$4 sm:$0xff]  }
 0xd4e   :  { %6072 = vmatpush3.bf16.msra.mxu0 %v6264_v13  ;;  %v6283_v13 = vld [vmem:[%s7870_s12 + $0x60] sm:$0xff]  }
 0xd58   :  { %2164 = vrot.lane.b32.xlu1 %v6865_v44, %s6631_s13 }
 0xd61   :  { %2166 = vrot.lane.b32.xlu0 %v6886_v50, %s6631_s13 }
 0xdd0   :  { %v2065_v23 = vpop.xlane.xlu1 %2064 }
 0xdd1   :  { %6409 = vrcp.f32 %v2065_v23  ;;  %v6268_v23 = vld [vmem:[%s7868_s10 + $0x20] ss:$8 sps:$4 sm:$0xff]  }
 0xdd4   :  { %v2068_v24 = vpop.xlane.xlu0 %2067  ;;  %v2165_v28 = vpop.permute.xlu1 %2164 }
 0xdd5   :  { %6411 = vrcp.f32 %v2068_v24  ;;  %v6273_v24 = vld [vmem:[%s7868_s10 + $0x14] ss:$8 sps:$4 sm:$0xff]  }
 0xdd8   :  { %v2167_v26 = vpop.permute.xlu0 %2166 }
 0xdd9   :  { %6064 = vmatprep.subr.mxu1 %v2167_v26 }
 0xdda   :  { %6065 = vmatpush3.msra.mxu1 %v2167_v26  ;;  %v6271_v26 = vld [vmem:[%s7868_s10 + $0x10] ss:$8 sps:$4 sm:$0xff]  }
 0xddb   :  { %6066 = vmatprep.subr.mxu1 %v2165_v28 }
 0xddc   :  { %6067 = vmatpush3.msra.mxu1 %v2165_v28  ;;  %v6276_v28 = vld [vmem:[%s7868_s10 + $0x4] ss:$8 sps:$4 sm:$0xff]  }
 0xddd   :  { %2483 = vmatprep.subr.bf16.mxu1 %v6267_v20  ;;  %v6292_v20 = vld [vmem:[%s7870_s12] sm:$0xff]  }
 0xdde   :  { %v6410_v29 = vpop.eup %6409 }
 0xddf   :  { %v2075_v63 = vmul.f32 %v6410_v29, %v6404_v17  ;;  %v6274_v29 = vld [vmem:[%s7868_s10] ss:$8 sps:$4 sm:$0xff]  }
 0xde1   :  { %6068 = vmatprep.mubr.msk.f32.mxu1 %vm439_vm5, %v2075_v63  ;;  %v6277_v63 = vld [vmem:[%s7870_s12 + $0x78] sm:$0xff]  }
 0xde2   :  { %v6412_v1 = vpop.eup %6411  ;;  %5791 = vmatprep.subr.bf16.mxu0 %v6277_v63 }
 0xde3   :  { %v2076_v2 = vmul.f32 %v6412_v1, %v6406_v19  ;;  %v6278_v1 = vld [vmem:[%s7870_s12 + $0x38] sm:$0xff]  }
 0xde5   :  { %6069 = vmatmul.mubr.msk.f32.vlgmr.msra.gmra.mxu1 %vm439_vm5, %v2076_v2  ;;  %v6279_v2 = vld [vmem:[%s7870_s12 + $0x70] sm:$0xff]  }
 0xde6   :  { %2507 = vmatprep.mubr.bf16.mxu1 %v6625_v0  ;;  %2484 = vmatpush1.bf16.msra.mxu1 %v6265_v21  ;;  %v2425_v21 = vsub.s32 1, %v6896_v51 }
 0xde7   :  { %2485 = vmatprep.subr.bf16.mxu1 %v6270_v22  ;;  %v2421_v22 = vsub.s32 0, %v6896_v51 }
 0xdea   :  { %2486 = vmatpush1.bf16.msra.mxu1 %v6268_v23  ;;  %v2417_v23 = vld [vmem:[#allocation5] sm:$0x3] }
 0xdeb   :  { %2487 = vmatprep.subr.bf16.mxu1 %v6273_v24 }
 0xdee   :  { %2488 = vmatpush1.bf16.msra.mxu1 %v6271_v26  ;;  %v2426_v26 = vrot.slane %v2417_v23, %v2425_v21 }
 0xdef   :  { %2489 = vmatprep.subr.bf16.mxu1 %v6276_v28  ;;  %v2422_v28 = vrot.slane %v2417_v23, %v2421_v22 }
 0xdf2   :  { %2490 = vmatpush1.bf16.msra.mxu1 %v6274_v29 }
 0xe0d   :  { %v6063_v44 = vpop.f32.mrf.mxu0 }
 0xe0f   :  { %v2155_v50 = vpop.f32.mrf.mxu0 }
 0xe10   :  { %v2251_v30 = vpack.c.bf16 %v6063_v44, %v2155_v50  ;;  %v6280_v44 = vld [vmem:[%s7870_s12 + $0x30] sm:$0xff]   ;;  %v6281_v50 = vld [vmem:[%s7870_s12 + $0x68] sm:$0xff]  }
 0xe12   :  { %6073 = vmatprep.mubr.msk.bf16.mxu0 %vm439_vm5, %v2251_v30  ;;  %v6282_v30 = vld [vmem:[%s7870_s12 + $0x28] sm:$0xff]  }
 0xea5   :  { %v6070_v14 = vpop.f32.mrf.mxu1 }
 0xea7   :  { %v2242_v15 = vpop.f32.mrf.mxu1 }
 0xea8   :  { %v2252_v37 = vpack.c.bf16 %v6070_v14, %v2242_v15  ;;  %v6284_v14 = vld [vmem:[%s7870_s12 + $0x20] sm:$0xff]   ;;  %v6285_v15 = vld [vmem:[%s7870_s12 + $0x58] sm:$0xff]  }
 0xeaa   :  { %6074 = vmatmul.mubr.msk.bf16.vlgmr.msra.gmra.mxu0 %vm439_vm5, %v2252_v37  ;;  %v6286_v37 = vld [vmem:[%s7870_s12 + $0x18] sm:$0xff]  }
 0xeab   :  { %5792 = vmatpush3.bf16.msra.mxu0 %v6278_v1 }
 0xeac   :  { %5793 = vmatprep.subr.bf16.mxu0 %v6279_v2 }
 0xeaf   :  { %5794 = vmatpush3.bf16.msra.mxu0 %v6280_v44 }
 0xeb0   :  { %5795 = vmatprep.subr.bf16.mxu0 %v6281_v50 }
 0xeb3   :  { %5796 = vmatpush3.bf16.msra.mxu0 %v6282_v30 }
 0xeb4   :  { %5797 = vmatprep.subr.bf16.mxu0 %v6283_v13 }
 0xeb7   :  { %5798 = vmatpush3.bf16.msra.mxu0 %v6284_v14 }
 0xeb8   :  { %5799 = vmatprep.subr.bf16.mxu0 %v6285_v15 }
 0xebb   :  { %5800 = vmatpush3.bf16.msra.mxu0 %v6286_v37 }
 0xf6a   :  { %v6075_v38 = vpop.f32.mrf.mxu0 }
 0xf6b   :  { %v2316_v46 = vadd.f32 %v6075_v38, %v7134_v47 }
 0xf6c   :  { %v2299_v48 = vpop.f32.mrf.mxu0 }
 0xf6d   :  { %v2314_v49 = vadd.f32 %v2299_v48, %v7138_v42  ;;  %v2320_v52 = vadd.f32 %v2316_v46, %v6789_v27 }
 0xf6e   :  { %v6076_v45 = vpop.f32.mrf.mxu0 }
 0xf6f   :  { %v2318_v40 = vadd.f32 %v2314_v49, %v6787_v25  ;;  %v2317_v33 = vadd.f32 %v6076_v45, %v7142_v41  ;;  %v7177_v60 = vadd.f32 %v5508_v34, %v2320_v52 }
 0xf70   :  { %v2302_v57 = vpop.f32.mrf.mxu0 }
 0xf71   :  { %v7174_v54 = vadd.f32 %v5508_v34, %v2318_v40  ;;  %v2315_v59 = vadd.f32 %v2302_v57, %v7144_v55  ;;  %v2321_v47 = vadd.f32 %v2317_v33, %v6798_v32  ;;  %v2341_v41 = vsel %vm180_vm4, %v7177_v60, 0.0 }
 0xf73   :  { %v2319_v35 = vadd.f32 %v2315_v59, %v6796_v31  ;;  %v2335_v42 = vsel %vm180_vm4, %v7174_v54, 0.0  ;;  %v7185_v25 = vadd.f32 %v5508_v34, %v2321_v47 }
 0xf74   :  { %2336 = vadd.xlane.f32.xlu0 %v2335_v42 }
 0xf75   :  { %v7183_v27 = vadd.f32 %v5508_v34, %v2319_v35  ;;  %v2344_v32 = vsel %vm180_vm4, %v7185_v25, 0.0 }
 0xf77   :  { %v2338_v55 = vsel %vm180_vm4, %v7183_v27, 0.0 }
 0xf78   :  { %2342 = vadd.xlane.f32.xlu0 %v2341_v41  ;;  %2339 = vadd.xlane.f32.xlu1 %v2338_v55  ;;  %v5509_v41 = vld [vmem:[%s7866_s8] ss:$0 sm:$0xff] }
 0xf7c   :  { %2345 = vadd.xlane.f32.xlu0 %v2344_v32 }
 0xffd   :  { %v2337_v31 = vpop.xlane.xlu0 %2336 }
 0xffe   :  { %v2347_v58 = vmul.f32 0.015625, %v2337_v31 }
0x1000   :  { %v7194_v36 = vsub.f32 %v7174_v54, %v2347_v58 }
0x1001   :  { %v2343_v9 = vpop.xlane.xlu0 %2342  ;;  %v2340_v39 = vpop.xlane.xlu1 %2339 }
0x1002   :  { %v2349_v43 = vmul.f32 0.015625, %v2343_v9  ;;  %v2348_v61 = vmul.f32 0.015625, %v2340_v39  ;;  %v2355_v62 = vmul.f32 %v7194_v36, %v7194_v36  ;;  %v5510_v9 = vld [vmem:[%s7867_s9] ss:$0 sm:$0xff] }
0x1004   :  { %v7199_v3 = vsub.f32 %v7177_v60, %v2349_v43  ;;  %v7202_v4 = vsub.f32 %v7183_v27, %v2348_v61  ;;  %v2359_v5 = vsel %vm180_vm4, %v2355_v62, 0.0 }
0x1005   :  { %v2346_v6 = vpop.xlane.xlu0 %2345  ;;  %2360 = vadd.xlane.f32.xlu1 %v2359_v5 }
0x1006   :  { %v2350_v7 = vmul.f32 0.015625, %v2346_v6  ;;  %v2357_v8 = vmul.f32 %v7199_v3, %v7199_v3  ;;  %v2356_v11 = vmul.f32 %v7202_v4, %v7202_v4 }
0x1008   :  { %v7210_v12 = vsub.f32 %v7185_v25, %v2350_v7  ;;  %v2365_v16 = vsel %vm180_vm4, %v2357_v8, 0.0  ;;  %v2362_v17 = vsel %vm180_vm4, %v2356_v11, 0.0 }
0x1009   :  { %2366 = vadd.xlane.f32.xlu1 %v2365_v16  ;;  %2363 = vadd.xlane.f32.xlu0 %v2362_v17  ;;  %v6289_v17 = vld [vmem:[%s7870_s12 + $0x48] sm:$0xff]  }
0x100a   :  { %v2358_v18 = vmul.f32 %v7210_v12, %v7210_v12 }
0x100c   :  { %v2368_v19 = vsel %vm180_vm4, %v2358_v18, 0.0  ;;  %v6290_v18 = vld [vmem:[%s7870_s12 + $0x8] sm:$0xff]  }
0x100d   :  { %2369 = vadd.xlane.f32.xlu0 %v2368_v19  ;;  %v6291_v19 = vld [vmem:[%s7870_s12 + $0x40] sm:$0xff]  }
0x108e   :  { %v2361_v38 = vpop.xlane.xlu1 %2360 }
0x108f   :  { %v2371_v46 = vmul.f32 0.015625, %v2361_v38 }
0x1091   :  { %v2375_v48 = vadd.f32 1e-05, %v2371_v46 }
0x1092   :  { %v2364_v49 = vpop.xlane.xlu0 %2363  ;;  %v2367_v45 = vpop.xlane.xlu1 %2366 }
0x1093   :  { %6413 = vrsqrt.f32 %v2375_v48  ;;  %v2372_v52 = vmul.f32 0.015625, %v2364_v49  ;;  %v2373_v40 = vmul.f32 0.015625, %v2367_v45 }
0x1095   :  { %v2376_v33 = vadd.f32 1e-05, %v2372_v52  ;;  %v2377_v34 = vadd.f32 1e-05, %v2373_v40 }
0x1096   :  { %v2370_v57 = vpop.xlane.xlu0 %2369 }
0x1097   :  { %6415 = vrsqrt.f32 %v2376_v33  ;;  %v2374_v59 = vmul.f32 0.015625, %v2370_v57 }
0x1098   :  { %6417 = vrsqrt.f32 %v2377_v34 }
0x1099   :  { %v2378_v47 = vadd.f32 1e-05, %v2374_v59 }
0x109b   :  { %6419 = vrsqrt.f32 %v2378_v47 }
0x10a0   :  { %v6414_v35 = vpop.eup %6413 }
0x10a1   :  { %v2383_v42 = vmul.f32 %v6414_v35, %v7194_v36 }
0x10a3   :  { %v2393_v31 = vmul.f32 %v5509_v41, %v2383_v42 }
0x10a4   :  { %v6416_v55 = vpop.eup %6415 }
0x10a5   :  { %v2384_v32 = vmul.f32 %v6416_v55, %v7202_v4  ;;  %v6418_v58 = vpop.eup %6417  ;;  %v2403_v61 = vadd.f32 %v5510_v9, %v2393_v31 }
0x10a6   :  { %v2385_v5 = vmul.f32 %v6418_v58, %v7199_v3  ;;  %v6287_v3 = vld [vmem:[%s7870_s12 + $0x50] sm:$0xff]  }
0x10a7   :  { %v2394_v39 = vmul.f32 %v5509_v41, %v2384_v32  ;;  %5801 = vmatprep.subr.bf16.mxu0 %v6287_v3 }
0x10a8   :  { %v6420_v43 = vpop.eup %6419  ;;  %v2395_v8 = vmul.f32 %v5509_v41, %v2385_v5 }
0x10a9   :  { %v2404_v62 = vadd.f32 %v5510_v9, %v2394_v39  ;;  %v2386_v36 = vmul.f32 %v6420_v43, %v7210_v12  ;;  %v6288_v12 = vld [vmem:[%s7870_s12 + $0x10] sm:$0xff]  }
0x10aa   :  { %v2405_v11 = vadd.f32 %v5510_v9, %v2395_v8  ;;  %5802 = vmatpush3.bf16.msra.mxu0 %v6288_v12 }
0x10ab   :  { %v2407_v6 = vpack.c.bf16 %v2404_v62, %v2403_v61  ;;  %v2396_v7 = vmul.f32 %v5509_v41, %v2386_v36  ;;  %5803 = vmatprep.subr.bf16.mxu0 %v6289_v17 }
0x10ad   :  { %5519 = vmatmul.mubr.msk.bf16.vlgmr.msra.gmra.mxu1 %vm180_vm4, %v2407_v6  ;;  %v2406_v4 = vadd.f32 %v5510_v9, %v2396_v7  ;;  %v5537_v9 = vld [vmem:[#allocation7] ss:$0 sm:$0xff] }
0x10ae   :  { %2517 = vmatprep.mubr.bf16.mxu1 %v6625_v0  ;;  %5804 = vmatpush3.bf16.msra.mxu0 %v6290_v18 }
0x10af   :  { %v2408_v16 = vpack.c.bf16 %v2406_v4, %v2405_v11  ;;  %5805 = vmatprep.subr.bf16.mxu0 %v6291_v19 }
0x10b2   :  { %5806 = vmatpush3.bf16.msra.mxu0 %v6292_v20 }
0x10b5   :  { %5520 = vmatmul.mubr.msk.bf16.gmra.mxu1 %vm180_vm4, %v2408_v16 }
0x10b6   :  { %2897 = vmatprep.mubr.bf16.mxu1 %v6625_v0 }
0x116d   :  { %v2509_v24 = vpop.f32.mrf.mxu1 }
0x116e   :  { %v2510_v44 = vadd.f32 %v2509_v24, %v2422_v28 }
0x116f   :  { %v2511_v29 = vpop.f32.mrf.mxu1 }
0x1170   :  { %v2512_v1 = vadd.f32 %v2511_v29, %v2426_v26  ;;  %v2528_v38 = vmax.f32 %v2510_v44, 0.0 }
0x1171   :  { %v2513_v63 = vpop.f32.mrf.mxu1 }
0x1172   :  { %v2514_v2 = vadd.f32 %v2513_v63, %v2422_v28  ;;  %v2529_v15 = vmax.f32 %v2512_v1, 0.0 }
0x1173   :  { %v2515_v50 = vpop.f32.mrf.mxu1 }
0x1174   :  { %v2516_v30 = vadd.f32 %v2515_v50, %v2426_v26  ;;  %v2530_v13 = vmax.f32 %v2514_v2, 0.0 }
0x1175   :  { %v2519_v14 = vpop.f32.mrf.mxu1 }
0x1176   :  { %v2531_v37 = vmax.f32 %v2516_v30, 0.0  ;;  %v2536_v49 = vpack.c.bf16 %v2530_v13, %v2528_v38  ;;  %v2520_v33 = vadd.f32 %v2519_v14, %v2422_v28 }
0x1177   :  { %v2521_v46 = vpop.f32.mrf.mxu1 }
0x1178   :  { %v2537_v48 = vpack.c.bf16 %v2531_v37, %v2529_v15  ;;  %v2522_v52 = vadd.f32 %v2521_v46, %v2426_v26  ;;  %v2532_v42 = vmax.f32 %v2520_v33, 0.0  ;;  %v6296_v33 = vld [vmem:[%s7863_s5 + $0x60] ss:$8 sps:$4 sm:$0xff]  }
0x1179   :  { %v2523_v45 = vpop.f32.mrf.mxu1 }
0x117a   :  { %v2524_v40 = vadd.f32 %v2523_v45, %v2422_v28  ;;  %2700 = vmatprep.mubr.bf16.mxu0 %v2537_v48  ;;  %v2533_v47 = vmax.f32 %v2522_v52, 0.0  ;;  %v6295_v45 = vld [vmem:[%s7863_s5 + $0x74] ss:$8 sps:$4 sm:$0xff]   ;;  %v6293_v52 = vld [vmem:[%s7863_s5 + $0x70] ss:$8 sps:$4 sm:$0xff]  }
0x117b   :  { %v2525_v34 = vpop.f32.mrf.mxu1  ;;  %2701 = vmatmul.mubr.bf16.vlgmr.msra.gmra.mxu0 %v2536_v49  ;;  %2873 = vmatprep.subr.bf16.mxu1 %v6295_v45 }
0x117c   :  { %v2526_v57 = vadd.f32 %v2525_v34, %v2426_v26  ;;  %v2534_v59 = vmax.f32 %v2524_v40, 0.0  ;;  %2874 = vmatpush1.bf16.msra.mxu1 %v6293_v52  ;;  %v6298_v40 = vld [vmem:[%s7863_s5 + $0x64] ss:$8 sps:$4 sm:$0xff]   ;;  %v6301_v34 = vld [vmem:[%s7863_s5 + $0x54] ss:$8 sps:$4 sm:$0xff]  }
0x117d   :  { %2875 = vmatprep.subr.bf16.mxu1 %v6298_v40 }
0x117e   :  { %v2535_v35 = vmax.f32 %v2526_v57, 0.0  ;;  %v2538_v55 = vpack.c.bf16 %v2534_v59, %v2532_v42  ;;  %v6299_v57 = vld [vmem:[%s7863_s5 + $0x50] ss:$8 sps:$4 sm:$0xff]   ;;  %v6302_v59 = vld [vmem:[%s7863_s5 + $0x40] ss:$8 sps:$4 sm:$0xff]  }
0x1180   :  { %v2539_v41 = vpack.c.bf16 %v2535_v35, %v2533_v47  ;;  %2876 = vmatpush1.bf16.msra.mxu1 %v6296_v33  ;;  %v6304_v47 = vld [vmem:[%s7863_s5 + $0x44] ss:$8 sps:$4 sm:$0xff]  }
0x1181   :  { %2877 = vmatprep.subr.bf16.mxu1 %v6301_v34 }
0x1182   :  { %2708 = vmatprep.mubr.bf16.mxu0 %v2539_v41 }
0x1183   :  { %2709 = vmatmul.mubr.bf16.gmra.mxu0 %v2538_v55 }
0x1184   :  { %2878 = vmatpush1.bf16.msra.mxu1 %v6299_v57 }
0x1185   :  { %2879 = vmatprep.subr.bf16.mxu1 %v6304_v47 }
0x1188   :  { %2880 = vmatpush1.bf16.msra.mxu1 %v6302_v59 }
0x123b   :  { %v5807_v32 = vpop.f32.mrf.mxu0 }
0x123d   :  { %v5808_v31 = vpop.f32.mrf.mxu0 }
0x123e   :  { %v5809_v58 = vadd.f32 %v5808_v31, %v5807_v32 }
0x123f   :  { %v5810_v39 = vpop.f32.mrf.mxu0 }
0x1240   :  { %v2717_v43 = vadd.f32 %v5809_v58, %v7174_v54 }
0x1241   :  { %v5811_v61 = vpop.f32.mrf.mxu0 }
0x1242   :  { %v7310_v62 = vadd.f32 %v5537_v9, %v2717_v43  ;;  %v5812_v5 = vadd.f32 %v5811_v61, %v5810_v39 }
0x1243   :  { %v5813_v36 = vpop.f32.mrf.mxu0 }
0x1244   :  { %v2718_v6 = vadd.f32 %v5812_v5, %v7183_v27  ;;  %v2736_v7 = vsel %vm180_vm4, %v7310_v62, 0.0 }
0x1245   :  { %2737 = vadd.xlane.f32.xlu1 %v2736_v7  ;;  %v5814_v8 = vpop.f32.mrf.mxu0  ;;  %v5540_v7 = vld [vmem:[%s7861_s3 + $0x1] ss:$0 sm:$0xff] }
0x1246   :  { %v7315_v4 = vadd.f32 %v5537_v9, %v2718_v6  ;;  %v5815_v11 = vadd.f32 %v5814_v8, %v5813_v36 }
0x1247   :  { %v5816_v16 = vpop.f32.mrf.mxu0 }
0x1248   :  { %v2719_v3 = vadd.f32 %v5815_v11, %v7177_v60  ;;  %v2739_v54 = vsel %vm180_vm4, %v7315_v4, 0.0 }
0x1249   :  { %2740 = vadd.xlane.f32.xlu0 %v2739_v54  ;;  %v5817_v12 = vpop.f32.mrf.mxu0 }
0x124a   :  { %v7320_v17 = vadd.f32 %v5537_v9, %v2719_v3  ;;  %v5818_v18 = vadd.f32 %v5817_v12, %v5816_v16  ;;  %v5541_v3 = vld [vmem:[%s7862_s4 + $0x1] ss:$0 sm:$0xff] }
0x124c   :  { %v2720_v27 = vadd.f32 %v5818_v18, %v7185_v25  ;;  %v2742_v19 = vsel %vm180_vm4, %v7320_v17, 0.0 }
0x124d   :  { %2743 = vadd.xlane.f32.xlu1 %v2742_v19 }
0x124e   :  { %v7325_v20 = vadd.f32 %v5537_v9, %v2720_v27 }
0x1250   :  { %v2745_v23 = vsel %vm180_vm4, %v7325_v20, 0.0 }
0x1251   :  { %2746 = vadd.xlane.f32.xlu0 %v2745_v23 }
0x12ce   :  { %v2738_v60 = vpop.xlane.xlu1 %2737 }
0x12cf   :  { %v2748_v24 = vmul.f32 0.015625, %v2738_v60 }
0x12d1   :  { %v2752_v26 = vsub.f32 %v7310_v62, %v2748_v24 }
0x12d2   :  { %v2741_v28 = vpop.xlane.xlu0 %2740 }
0x12d3   :  { %v2749_v29 = vmul.f32 0.015625, %v2741_v28  ;;  %v2756_v63 = vmul.f32 %v2752_v26, %v2752_v26 }
0x12d5   :  { %v2753_v1 = vsub.f32 %v7315_v4, %v2749_v29  ;;  %v2760_v25 = vsel %vm180_vm4, %v2756_v63, 0.0 }
0x12d6   :  { %2761 = vadd.xlane.f32.xlu1 %v2760_v25  ;;  %v2744_v2 = vpop.xlane.xlu1 %2743 }
0x12d7   :  { %v2750_v44 = vmul.f32 0.015625, %v2744_v2  ;;  %v2757_v50 = vmul.f32 %v2753_v1, %v2753_v1 }
0x12d9   :  { %v2754_v30 = vsub.f32 %v7320_v17, %v2750_v44  ;;  %v2763_v13 = vsel %vm180_vm4, %v2757_v50, 0.0 }
0x12da   :  { %2764 = vadd.xlane.f32.xlu0 %v2763_v13  ;;  %v2747_v14 = vpop.xlane.xlu0 %2746 }
0x12db   :  { %v2751_v15 = vmul.f32 0.015625, %v2747_v14  ;;  %v2758_v37 = vmul.f32 %v2754_v30, %v2754_v30 }
0x12dd   :  { %v2755_v38 = vsub.f32 %v7325_v20, %v2751_v15  ;;  %v2766_v46 = vsel %vm180_vm4, %v2758_v37, 0.0 }
0x12de   :  { %2767 = vadd.xlane.f32.xlu1 %v2766_v46 }
0x12df   :  { %v2759_v48 = vmul.f32 %v2755_v38, %v2755_v38 }
0x12e1   :  { %v2769_v49 = vsel %vm180_vm4, %v2759_v48, 0.0 }
0x12e2   :  { %2770 = vadd.xlane.f32.xlu0 %v2769_v49 }
0x135f   :  { %v2762_v35 = vpop.xlane.xlu1 %2761 }
0x1360   :  { %v2772_v42 = vmul.f32 0.015625, %v2762_v35 }
0x1362   :  { %v2776_v41 = vadd.f32 1e-05, %v2772_v42 }
0x1363   :  { %v2765_v55 = vpop.xlane.xlu0 %2764 }
0x1364   :  { %6421 = vrsqrt.f32 %v2776_v41  ;;  %v2773_v32 = vmul.f32 0.015625, %v2765_v55 }
0x1366   :  { %v2777_v31 = vadd.f32 1e-05, %v2773_v32 }
0x1367   :  { %v2768_v58 = vpop.xlane.xlu1 %2767 }
0x1368   :  { %6423 = vrsqrt.f32 %v2777_v31  ;;  %v2774_v9 = vmul.f32 0.015625, %v2768_v58 }
0x136a   :  { %v2778_v39 = vadd.f32 1e-05, %v2774_v9 }
0x136b   :  { %v2771_v43 = vpop.xlane.xlu0 %2770 }
0x136c   :  { %6425 = vrsqrt.f32 %v2778_v39  ;;  %v2775_v61 = vmul.f32 0.015625, %v2771_v43 }
0x136e   :  { %v2779_v5 = vadd.f32 1e-05, %v2775_v61 }
0x1370   :  { %6427 = vrsqrt.f32 %v2779_v5 }
0x1371   :  { %v6422_v36 = vpop.eup %6421 }
0x1372   :  { %v2784_v6 = vmul.f32 %v6422_v36, %v2752_v26 }
0x1374   :  { %v2794_v11 = vmul.f32 %v5540_v7, %v2784_v6 }
0x1375   :  { %v6424_v8 = vpop.eup %6423 }
0x1376   :  { %v2785_v16 = vmul.f32 %v6424_v8, %v2753_v1  ;;  %v2804_v18 = vadd.f32 %v5541_v3, %v2794_v11 }
0x1378   :  { %v2795_v54 = vmul.f32 %v5540_v7, %v2785_v16 }
0x1379   :  { %v6426_v12 = vpop.eup %6425 }
0x137a   :  { %v2805_v27 = vadd.f32 %v5541_v3, %v2795_v54  ;;  %v2786_v19 = vmul.f32 %v6426_v12, %v2754_v30 }
0x137c   :  { %v2808_v23 = vpack.c.bf16 %v2805_v27, %v2804_v18  ;;  %v2796_v26 = vmul.f32 %v5540_v7, %v2786_v19 }
0x137d   :  { %v6428_v60 = vpop.eup %6427 }
0x137e   :  { %5558 = vmatmul.mubr.msk.bf16.vlgmr.msra.gmra.mxu1 %vm180_vm4, %v2808_v23  ;;  %v2787_v24 = vmul.f32 %v6428_v60, %v2755_v38  ;;  %v2806_v29 = vadd.f32 %v5541_v3, %v2796_v26 }
0x137f   :  { %2907 = vmatprep.mubr.bf16.mxu1 %v6625_v0 }
0x1380   :  { %v2797_v28 = vmul.f32 %v5540_v7, %v2787_v24 }
0x1382   :  { %v2807_v63 = vadd.f32 %v5541_v3, %v2797_v28 }
0x1384   :  { %v2809_v1 = vpack.c.bf16 %v2807_v63, %v2806_v29 }
0x1386   :  { %5559 = vmatmul.mubr.msk.bf16.gmra.mxu1 %vm180_vm4, %v2809_v1 }
0x143e   :  { %v7370_v25 = vpop.f32.mrf.mxu1 }
0x143f   :  { %6081 = vmatprep.mubr.msk.f32.mxu1 %vm439_vm5, %v7370_v25 }
0x1440   :  { %v7374_v2 = vpop.f32.mrf.mxu1 }
0x1442   :  { %v7376_v44 = vpop.f32.mrf.mxu1 }
0x1443   :  { %2931 = vrot.lane.b32.xlu1 %v7376_v44, %s6627_s28 }
0x1444   :  { %v7380_v50 = vpop.f32.mrf.mxu1 }
0x1446   :  { %v7382_v30 = vpop.f32.mrf.mxu1 }
0x1447   :  { %2929 = vrot.lane.b32.xlu1 %v7370_v25, %s6627_s28  ;;  %6088 = vmatprep.mubr.msk.f32.mxu0 %vm439_vm5, %v7382_v30 }
0x1448   :  { %v7388_v13 = vpop.f32.mrf.mxu1 }
0x144a   :  { %v7390_v14 = vpop.f32.mrf.mxu1 }
0x144b   :  { %3018 = vrot.lane.b32.xlu1 %v7382_v30, %s6627_s28  ;;  %3020 = vrot.lane.b32.xlu0 %v7390_v14, %s6627_s28 }
0x144c   :  { %v7409_v48 = vpop.f32.mrf.mxu1 }
0x14b5   :  { %v2932_v15 = vpop.permute.xlu1 %2931 }
0x14b6   :  { %6077 = vmatprep.subr.msk.mxu1 %vm439_vm5, %v2932_v15 }
0x14b7   :  { %6078 = vmatpush3.xpose.msk.msra.mxu1 %vm439_vm5, %v2932_v15 }
0x14b9   :  { %v2930_v37 = vpop.permute.xlu1 %2929 }
0x14ba   :  { %6079 = vmatprep.subr.msk.mxu1 %vm439_vm5, %v2930_v37 }
0x14bb   :  { %6080 = vmatpush3.xpose.msk.msra.mxu1 %vm439_vm5, %v2930_v37 }
0x14bc   :  { %6091 = vmatprep.subr.mxu1 %v7380_v50 }
0x14bd   :  { %v3021_v38 = vpop.permute.xlu0 %3020  ;;  %v3019_v46 = vpop.permute.xlu1 %3018 }
0x14be   :  { %6082 = vmatmul.mubr.msk.f32.vlgmr.msra.gmra.mxu1 %vm439_vm5, %v7376_v44  ;;  %6084 = vmatprep.subr.msk.mxu0 %vm439_vm5, %v3021_v38 }
0x14bf   :  { %6085 = vmatpush3.xpose.msk.msra.mxu0 %vm439_vm5, %v3021_v38  ;;  %6092 = vmatpush3.msra.mxu1 %v7380_v50 }
0x14c0   :  { %6086 = vmatprep.subr.msk.mxu0 %vm439_vm5, %v3019_v46  ;;  %6093 = vmatprep.subr.mxu1 %v7374_v2 }
0x14c1   :  { %6094 = vmatpush3.msra.mxu1 %v7374_v2 }
0x14c3   :  { %6087 = vmatpush3.xpose.msk.msra.mxu0 %vm439_vm5, %v3019_v46 }
0x14c4   :  { %6098 = vmatprep.subr.mxu0 %v7409_v48 }
0x14c6   :  { %6089 = vmatmul.mubr.msk.f32.vlgmr.msra.gmra.mxu0 %vm439_vm5, %v7390_v14 }
0x14c7   :  { %6099 = vmatpush3.msra.mxu0 %v7409_v48 }
0x14c8   :  { %6100 = vmatprep.subr.mxu0 %v7388_v13 }
0x14c9   :  { %6101 = vmatpush3.msra.mxu0 %v7388_v13 }
0x157e   :  { %v6083_v49 = vpop.f32.mrf.mxu1 }
0x157f   :  { %v3106_v45 = vmul.f32 0.25, %v6083_v49 }
0x1580   :  { %v3007_v52 = vpop.f32.mrf.mxu1 }
0x1581   :  { %v3110_v40 = vsel %vm6900_vm6, %v3106_v45, -1e+30  ;;  %v3105_v33 = vmul.f32 0.25, %v3007_v52 }
0x1582   :  { %v3116_v34 = vsel %vm439_vm5, %v3110_v40, -inf }
0x1583   :  { %v3109_v57 = vsel %vm6906_vm7, %v3105_v33, -1e+30  ;;  %3117 = vmax.xlane.f32.xlu1 %v3116_v34 }
0x1584   :  { %v3113_v59 = vsel %vm439_vm5, %v3109_v57, -inf }
0x1585   :  { %3114 = vmax.xlane.f32.xlu0 %v3113_v59 }
0x1586   :  { %v6090_v47 = vpop.f32.mrf.mxu0 }
0x1587   :  { %v3108_v42 = vmul.f32 0.25, %v6090_v47 }
0x1588   :  { %v3096_v35 = vpop.f32.mrf.mxu0 }
0x1589   :  { %v3107_v41 = vmul.f32 0.25, %v3096_v35  ;;  %v3112_v31 = vsel %vm6900_vm6, %v3108_v42, -1e+30 }
0x158a   :  { %v3122_v58 = vsel %vm439_vm5, %v3112_v31, -inf }
0x158b   :  { %v3111_v55 = vsel %vm6906_vm7, %v3107_v41, -1e+30 }
0x158c   :  { %v3119_v32 = vsel %vm439_vm5, %v3111_v55, -inf }
0x158d   :  { %3120 = vmax.xlane.f32.xlu0 %v3119_v32 }
0x1591   :  { %3123 = vmax.xlane.f32.xlu0 %v3122_v58 }
0x1594   :  { %3327 = vrot.lane.b32.xlu1 %v7376_v44, %s6628_s29 }
0x1598   :  { %3325 = vrot.lane.b32.xlu1 %v7370_v25, %s6628_s29 }
0x159c   :  { %3416 = vrot.lane.b32.xlu1 %v7382_v30, %s6628_s29 }
0x15a7   :  { %3418 = vrot.lane.b32.xlu0 %v7390_v14, %s6628_s29 }
0x160c   :  { %v3118_v9 = vpop.xlane.xlu1 %3117 }
0x160d   :  { %v3126_v39 = vsub.f32 %v3110_v40, %v3118_v9 }
0x160e   :  { %v3115_v43 = vpop.xlane.xlu0 %3114 }
0x160f   :  { %v3131_v61 = vmul.f32 1.442695, %v3126_v39  ;;  %v3125_v5 = vsub.f32 %v3109_v57, %v3115_v43 }
0x1610   :  { %v3328_v36 = vpop.permute.xlu1 %3327 }
0x1611   :  { %6429 = vpow2.f32 %v3131_v61  ;;  %v3129_v6 = vmul.f32 1.442695, %v3125_v5  ;;  %6105 = vmatprep.subr.msk.mxu1 %vm439_vm5, %v3328_v36 }
0x1613   :  { %6431 = vpow2.f32 %v3129_v6 }
0x1614   :  { %v3326_v29 = vpop.permute.xlu1 %3325 }
0x1616   :  { %v3121_v7 = vpop.xlane.xlu0 %3120 }
0x1617   :  { %v3127_v60 = vsub.f32 %v3111_v55, %v3121_v7 }
0x1618   :  { %v3417_v63 = vpop.permute.xlu1 %3416 }
0x1619   :  { %v3133_v24 = vmul.f32 1.442695, %v3127_v60 }
0x161a   :  { %v3124_v8 = vpop.xlane.xlu0 %3123 }
0x161b   :  { %v3128_v11 = vsub.f32 %v3112_v31, %v3124_v8 }
0x161d   :  { %v3135_v16 = vmul.f32 1.442695, %v3128_v11 }
0x161e   :  { %v6430_v3 = vpop.eup %6429  ;;  %v3419_v54 = vpop.permute.xlu0 %3418 }
0x161f   :  { %6433 = vpow2.f32 %v3135_v16  ;;  %6112 = vmatprep.subr.msk.mxu0 %vm439_vm5, %v3419_v54  ;;  %v3140_v12 = vsel %vm439_vm5, %v6430_v3, 0.0 }
0x1620   :  { %v6432_v18 = vpop.eup %6431  ;;  %3141 = vadd.xlane.f32.xlu0 %v3140_v12  ;;  %6435 = vpow2.f32 %v3133_v24 }
0x1621   :  { %v3137_v27 = vsel %vm439_vm5, %v6432_v18, 0.0 }
0x1622   :  { %3138 = vadd.xlane.f32.xlu1 %v3137_v27 }
0x162c   :  { %v6434_v19 = vpop.eup %6433 }
0x162d   :  { %v3146_v23 = vsel %vm439_vm5, %v6434_v19, 0.0  ;;  %v6436_v26 = vpop.eup %6435 }
0x162e   :  { %3147 = vadd.xlane.f32.xlu0 %v3146_v23  ;;  %v3143_v28 = vsel %vm439_vm5, %v6436_v26, 0.0 }
0x1633   :  { %3323 = vrot.lane.b32.xlu1 %v7376_v44, %s6629_s0 }
0x1644   :  { %3321 = vrot.lane.b32.xlu0 %v7370_v25, %s6629_s0 }
0x1648   :  { %3412 = vrot.lane.b32.xlu0 %v7382_v30, %s6629_s0 }
0x1657   :  { %3144 = vadd.xlane.f32.xlu1 %v3143_v28 }
0x1668   :  { %3414 = vrot.lane.b32.xlu1 %v7390_v14, %s6629_s0 }
0x16a9   :  { %v3142_v1 = vpop.xlane.xlu0 %3141 }
0x16aa   :  { %6437 = vrcp.f32 %v3142_v1 }
0x16ab   :  { %v3139_v15 = vpop.xlane.xlu1 %3138 }
0x16ac   :  { %6439 = vrcp.f32 %v3139_v15 }
0x16af   :  { %v3324_v40 = vpop.permute.xlu1 %3323 }
0x16b7   :  { %v3148_v37 = vpop.xlane.xlu0 %3147  ;;  %v6438_v38 = vpop.eup %6437 }
0x16b8   :  { %v3154_v45 = vmul.f32 %v6438_v38, %v6430_v3  ;;  %6441 = vrcp.f32 %v3148_v37 }
0x16b9   :  { %v6440_v46 = vpop.eup %6439 }
0x16ba   :  { %v3153_v49 = vmul.f32 %v6440_v46, %v6432_v18 }
0x16bb   :  { %v3322_v52 = vpop.permute.xlu0 %3321 }
0x16bc   :  { %6095 = vmatprep.mubr.msk.f32.mxu1 %vm439_vm5, %v3153_v49 }
0x16bd   :  { %6096 = vmatmul.mubr.msk.f32.vlgmr.msra.gmra.mxu1 %vm439_vm5, %v3154_v45 }
0x16be   :  { %6106 = vmatpush3.xpose.msk.msra.mxu1 %vm439_vm5, %v3328_v36  ;;  %6109 = vmatprep.mubr.msk.f32.mxu1 %vm439_vm5, %v3322_v52 }
0x16bf   :  { %6107 = vmatprep.subr.msk.mxu1 %vm439_vm5, %v3326_v29  ;;  %v3413_v35 = vpop.permute.xlu0 %3412 }
0x16c2   :  { %6108 = vmatpush3.xpose.msk.msra.mxu1 %vm439_vm5, %v3326_v29 }
0x16c5   :  { %6110 = vmatmul.mubr.msk.f32.vlgmr.msra.gmra.mxu1 %vm439_vm5, %v3324_v40  ;;  %v6442_v34 = vpop.eup %6441 }
0x16c6   :  { %v3156_v47 = vmul.f32 %v6442_v34, %v6434_v19 }
0x16e0   :  { %v3145_v33 = vpop.xlane.xlu1 %3144 }
0x16e1   :  { %6443 = vrcp.f32 %v3145_v33 }
0x16e4   :  { %v3415_v42 = vpop.permute.xlu1 %3414 }
0x16ee   :  { %v6444_v57 = vpop.eup %6443 }
0x16ef   :  { %v3155_v59 = vmul.f32 %v6444_v57, %v6436_v26 }
0x16f1   :  { %6102 = vmatprep.mubr.msk.f32.mxu0 %vm439_vm5, %v3155_v59 }
0x16f2   :  { %6103 = vmatmul.mubr.msk.f32.vlgmr.msra.gmra.mxu0 %vm439_vm5, %v3156_v47 }
0x16f3   :  { %6113 = vmatpush3.xpose.msk.msra.mxu0 %vm439_vm5, %v3419_v54  ;;  %6116 = vmatprep.mubr.msk.f32.mxu0 %vm439_vm5, %v3413_v35 }
0x16f4   :  { %6114 = vmatprep.subr.msk.mxu0 %vm439_vm5, %v3417_v63 }
0x16f7   :  { %6115 = vmatpush3.xpose.msk.msra.mxu0 %vm439_vm5, %v3417_v63 }
0x16fa   :  { %6117 = vmatmul.mubr.msk.f32.vlgmr.msra.gmra.mxu0 %vm439_vm5, %v3415_v42 }
0x177d   :  { %v7466_v41 = vpop.f32.mrf.mxu1 }
0x177f   :  { %v7468_v55 = vpop.f32.mrf.mxu1 }
0x1780   :  { %v3319_v32 = vpack.c.bf16 %v7466_v41, %v7468_v55 }
0x1785   :  { %v6111_v31 = vpop.f32.mrf.mxu1 }
0x1786   :  { %v3504_v58 = vmul.f32 0.25, %v6111_v31  ;;  %v6305_v31 = vld [vmem:[%s7864_s6 + $0x28] sm:$0xff]  }
0x1787   :  { %v3403_v9 = vpop.f32.mrf.mxu1 }
0x1788   :  { %v3508_v39 = vsel %vm6900_vm6, %v3504_v58, -1e+30  ;;  %v3503_v43 = vmul.f32 0.25, %v3403_v9 }
0x1789   :  { %v3514_v61 = vsel %vm439_vm5, %v3508_v39, -inf }
0x178a   :  { %v3507_v5 = vsel %vm6906_vm7, %v3503_v43, -1e+30  ;;  %3515 = vmax.xlane.f32.xlu1 %v3514_v61 }
0x178b   :  { %v3511_v36 = vsel %vm439_vm5, %v3507_v5, -inf }
0x178c   :  { %3512 = vmax.xlane.f32.xlu0 %v3511_v36 }
0x179b   :  { %3559 = vrot.lane.b32.xlu1 %v7380_v50, %s6629_s0 }
0x17b2   :  { %v7480_v6 = vpop.f32.mrf.mxu0 }
0x17b4   :  { %v7482_v7 = vpop.f32.mrf.mxu0 }
0x17b5   :  { %v3320_v8 = vpack.c.bf16 %v7480_v6, %v7482_v7 }
0x17ba   :  { %v6118_v11 = vpop.f32.mrf.mxu0 }
0x17bb   :  { %v3506_v3 = vmul.f32 0.25, %v6118_v11 }
0x17bc   :  { %v3494_v16 = vpop.f32.mrf.mxu0 }
0x17bd   :  { %v3505_v54 = vmul.f32 0.25, %v3494_v16  ;;  %v3510_v27 = vsel %vm6900_vm6, %v3506_v3, -1e+30  ;;  %v6306_v3 = vld [vmem:[%s7864_s6 + $0x20] sm:$0xff]  }
0x17be   :  { %v3520_v19 = vsel %vm439_vm5, %v3510_v27, -inf }
0x17bf   :  { %v3509_v12 = vsel %vm6906_vm7, %v3505_v54, -1e+30 }
0x17c0   :  { %v3517_v18 = vsel %vm439_vm5, %v3509_v12, -inf }
0x17c1   :  { %3518 = vmax.xlane.f32.xlu0 %v3517_v18 }
0x17c5   :  { %3521 = vmax.xlane.f32.xlu0 %v3520_v19 }
0x1813   :  { %v3516_v23 = vpop.xlane.xlu1 %3515 }
0x1814   :  { %v3524_v60 = vsub.f32 %v3508_v39, %v3516_v23 }
0x1815   :  { %v3513_v24 = vpop.xlane.xlu0 %3512 }
0x1816   :  { %v3529_v26 = vmul.f32 1.442695, %v3524_v60  ;;  %v3523_v28 = vsub.f32 %v3507_v5, %v3513_v24 }
0x1817   :  { %v3560_v29 = vpop.permute.xlu1 %3559 }
0x1818   :  { %6445 = vpow2.f32 %v3529_v26  ;;  %v3527_v63 = vmul.f32 1.442695, %v3523_v28  ;;  %6119 = vmatprep.subr.mxu1 %v3560_v29 }
0x1819   :  { %6120 = vmatpush3.msra.mxu1 %v3560_v29 }
0x181a   :  { %6447 = vpow2.f32 %v3527_v63 }
0x1825   :  { %v6446_v1 = vpop.eup %6445 }
0x1826   :  { %v3538_v15 = vsel %vm439_vm5, %v6446_v1, 0.0 }
0x1827   :  { %v6448_v37 = vpop.eup %6447  ;;  %3539 = vadd.xlane.f32.xlu0 %v3538_v15 }
0x1828   :  { %v3535_v38 = vsel %vm439_vm5, %v6448_v37, 0.0 }
0x1829   :  { %3536 = vadd.xlane.f32.xlu1 %v3535_v38 }
0x183a   :  { %3557 = vrot.lane.b32.xlu1 %v7374_v2, %s6629_s0 }
0x184a   :  { %v3519_v46 = vpop.xlane.xlu0 %3518 }
0x184b   :  { %v3525_v49 = vsub.f32 %v3509_v12, %v3519_v46 }
0x184d   :  { %v3531_v45 = vmul.f32 1.442695, %v3525_v49 }
0x184e   :  { %v3522_v52 = vpop.xlane.xlu0 %3521 }
0x184f   :  { %6449 = vpow2.f32 %v3531_v45  ;;  %v3526_v40 = vsub.f32 %v3510_v27, %v3522_v52 }
0x1851   :  { %v3533_v33 = vmul.f32 1.442695, %v3526_v40 }
0x1853   :  { %6451 = vpow2.f32 %v3533_v33 }
0x185c   :  { %v6450_v34 = vpop.eup %6449 }
0x185d   :  { %v3541_v57 = vsel %vm439_vm5, %v6450_v34, 0.0 }
0x185e   :  { %3542 = vadd.xlane.f32.xlu1 %v3541_v57 }
0x1860   :  { %v6452_v59 = vpop.eup %6451 }
0x1861   :  { %v3544_v47 = vsel %vm439_vm5, %v6452_v59, 0.0 }
0x1862   :  { %3545 = vadd.xlane.f32.xlu0 %v3544_v47 }
0x186f   :  { %3646 = vrot.lane.b32.xlu1 %v7388_v13, %s6629_s0 }
0x1873   :  { %3954 = vrot.lane.b32.xlu1 %v7390_v14, %s6618_s30 }
0x1877   :  { %3952 = vrot.lane.b32.xlu1 %v7382_v30, %s6618_s30 }
0x1878   :  { %3648 = vrot.lane.b32.xlu0 %v7409_v48, %s6629_s0 }
0x187b   :  { %3859 = vrot.lane.b32.xlu1 %v7376_v44, %s6630_s19 }
0x187c   :  { %3863 = vrot.lane.b32.xlu0 %v7376_v44, %s6618_s30 }
0x187f   :  { %3950 = vrot.lane.b32.xlu1 %v7390_v14, %s6630_s19 }
0x1880   :  { %3861 = vrot.lane.b32.xlu0 %v7370_v25, %s6618_s30 }
0x1884   :  { %3857 = vrot.lane.b32.xlu0 %v7370_v25, %s6630_s19 }
0x1888   :  { %3948 = vrot.lane.b32.xlu0 %v7382_v30, %s6630_s19 }
0x18b0   :  { %v3540_v35 = vpop.xlane.xlu0 %3539 }
0x18b1   :  { %6453 = vrcp.f32 %v3540_v35 }
0x18b2   :  { %v3537_v42 = vpop.xlane.xlu1 %3536 }
0x18b3   :  { %6455 = vrcp.f32 %v3537_v42 }
0x18b6   :  { %v3558_v58 = vpop.permute.xlu1 %3557 }
0x18b7   :  { %6121 = vmatprep.subr.mxu1 %v3558_v58 }
0x18b8   :  { %6122 = vmatpush3.msra.mxu1 %v3558_v58 }
0x18b9   :  { %6133 = vmatprep.subr.bf16.mxu1 %v6305_v31 }
0x18be   :  { %v6454_v9 = vpop.eup %6453 }
0x18bf   :  { %v3552_v61 = vmul.f32 %v6454_v9, %v6446_v1 }
0x18c0   :  { %v6456_v39 = vpop.eup %6455 }
0x18c1   :  { %v3551_v43 = vmul.f32 %v6456_v39, %v6448_v37 }
0x18c3   :  { %6123 = vmatprep.mubr.msk.f32.mxu1 %vm439_vm5, %v3551_v43 }
0x18c4   :  { %6124 = vmatmul.mubr.msk.f32.vlgmr.msra.gmra.mxu1 %vm439_vm5, %v3552_v61 }
0x18c5   :  { %6134 = vmatpush3.bf16.msra.mxu1 %v6305_v31 }
0x18e7   :  { %v3543_v5 = vpop.xlane.xlu1 %3542 }
0x18e8   :  { %6457 = vrcp.f32 %v3543_v5 }
0x18eb   :  { %v3546_v36 = vpop.xlane.xlu0 %3545  ;;  %v3647_v11 = vpop.permute.xlu1 %3646 }
0x18ec   :  { %6459 = vrcp.f32 %v3546_v36 }
0x18ef   :  { %v3649_v16 = vpop.permute.xlu0 %3648  ;;  %v3955_v18 = vpop.permute.xlu1 %3954 }
0x18f0   :  { %6126 = vmatprep.subr.mxu0 %v3649_v16 }
0x18f1   :  { %6127 = vmatpush3.msra.mxu0 %v3649_v16 }
0x18f2   :  { %6128 = vmatprep.subr.mxu0 %v3647_v11 }
0x18f3   :  { %v3864_v54 = vpop.permute.xlu0 %3863  ;;  %6129 = vmatpush3.msra.mxu0 %v3647_v11  ;;  %v3953_v24 = vpop.permute.xlu1 %3952 }
0x18f4   :  { %6145 = vmatprep.subr.msk.mxu1 %vm439_vm5, %v3864_v54  ;;  %6139 = vmatprep.subr.bf16.mxu0 %v6306_v3 }
0x18f5   :  { %v6458_v12 = vpop.eup %6457 }
0x18f6   :  { %v3553_v27 = vmul.f32 %v6458_v12, %v6450_v34 }
0x18f7   :  { %v3862_v19 = vpop.permute.xlu0 %3861  ;;  %v3860_v29 = vpop.permute.xlu1 %3859 }
0x18f8   :  { %6130 = vmatprep.mubr.msk.f32.mxu0 %vm439_vm5, %v3553_v27 }
0x18f9   :  { %v6460_v23 = vpop.eup %6459 }
0x18fa   :  { %v3554_v60 = vmul.f32 %v6460_v23, %v6452_v59 }
0x18fb   :  { %v3858_v26 = vpop.permute.xlu0 %3857  ;;  %v3951_v41 = vpop.permute.xlu1 %3950 }
0x18fc   :  { %6131 = vmatmul.mubr.msk.f32.vlgmr.msra.gmra.mxu0 %vm439_vm5, %v3554_v60 }
0x18fd   :  { %6140 = vmatpush3.bf16.msra.mxu0 %v6306_v3  ;;  %6141 = vmatprep.mubr.msk.bf16.mxu0 %vm439_vm5, %v3319_v32 }
0x18fe   :  { %6152 = vmatprep.subr.msk.mxu0 %vm439_vm5, %v3955_v18 }
0x18ff   :  { %v3949_v28 = vpop.permute.xlu0 %3948 }
0x1900   :  { %6142 = vmatmul.mubr.msk.bf16.vlgmr.msra.gmra.mxu0 %vm439_vm5, %v3320_v8 }
0x1901   :  { %6153 = vmatpush3.xpose.msk.msra.mxu0 %vm439_vm5, %v3955_v18  ;;  %6156 = vmatprep.mubr.msk.f32.mxu0 %vm439_vm5, %v3949_v28 }
0x1902   :  { %6154 = vmatprep.subr.msk.mxu0 %vm439_vm5, %v3953_v24 }
0x1905   :  { %6155 = vmatpush3.xpose.msk.msra.mxu0 %vm439_vm5, %v3953_v24 }
0x1908   :  { %6157 = vmatmul.mubr.msk.f32.vlgmr.msra.gmra.mxu0 %vm439_vm5, %v3951_v41 }
0x1984   :  { %v6125_v55 = vpop.f32.mrf.mxu1 }
0x1986   :  { %v3635_v32 = vpop.f32.mrf.mxu1 }
0x1987   :  { %v3733_v63 = vpack.c.bf16 %v6125_v55, %v3635_v32 }
0x1989   :  { %6135 = vmatprep.mubr.msk.bf16.mxu1 %vm439_vm5, %v3733_v63 }
0x19bc   :  { %v6132_v6 = vpop.f32.mrf.mxu0 }
0x19be   :  { %v3724_v7 = vpop.f32.mrf.mxu0 }
0x19bf   :  { %v3734_v8 = vpack.c.bf16 %v6132_v6, %v3724_v7 }
0x19c0   :  { %v7544_v1 = vpop.f32.mrf.mxu0 }
0x19c1   :  { %6136 = vmatmul.mubr.msk.bf16.vlgmr.msra.gmra.mxu1 %vm439_vm5, %v3734_v8 }
0x19c2   :  { %6146 = vmatpush3.xpose.msk.msra.mxu1 %vm439_vm5, %v3864_v54  ;;  %v7548_v15 = vpop.f32.mrf.mxu0  ;;  %6149 = vmatprep.mubr.msk.f32.mxu1 %vm439_vm5, %v3858_v26 }
0x19c3   :  { %6147 = vmatprep.subr.msk.mxu1 %vm439_vm5, %v3862_v19 }
0x19c4   :  { %v7552_v37 = vpop.f32.mrf.mxu0 }
0x19c6   :  { %6148 = vmatpush3.xpose.msk.msra.mxu1 %vm439_vm5, %v3862_v19  ;;  %v7555_v38 = vpop.f32.mrf.mxu0 }
0x19c8   :  { %v6158_v46 = vpop.f32.mrf.mxu0 }
0x19c9   :  { %6150 = vmatmul.mubr.msk.f32.vlgmr.msra.gmra.mxu1 %vm439_vm5, %v3860_v29  ;;  %v4042_v39 = vmul.f32 0.25, %v6158_v46 }
0x19ca   :  { %v4030_v49 = vpop.f32.mrf.mxu0 }
0x19cb   :  { %v4041_v45 = vmul.f32 0.25, %v4030_v49  ;;  %v4046_v3 = vsel %vm6900_vm6, %v4042_v39, -1e+30 }
0x19cc   :  { %v4056_v12 = vsel %vm439_vm5, %v4046_v3, -inf }
0x19cd   :  { %v4045_v52 = vsel %vm6906_vm7, %v4041_v45, -1e+30 }
0x19ce   :  { %v4053_v40 = vsel %vm439_vm5, %v4045_v52, -inf }
0x19cf   :  { %4054 = vmax.xlane.f32.xlu0 %v4053_v40  ;;  %v6307_v40 = vld [vmem:[%s7864_s6 + $0x30] sm:$0xff]  }
0x1a58   :  { %v4055_v33 = vpop.xlane.xlu0 %4054 }
0x1a59   :  { %v4061_v34 = vsub.f32 %v4045_v52, %v4055_v33 }
0x1a5b   :  { %v4067_v57 = vmul.f32 1.442695, %v4061_v34 }
0x1a5d   :  { %6461 = vpow2.f32 %v4067_v57 }
0x1a6a   :  { %v6462_v36 = vpop.eup %6461 }
0x1a6b   :  { %v4077_v54 = vsel %vm439_vm5, %v6462_v36, 0.0 }
0x1a81   :  { %v7561_v59 = vpop.f32.mrf.mxu1 }
0x1a83   :  { %v7563_v47 = vpop.f32.mrf.mxu1 }
0x1a85   :  { %v7565_v35 = vpop.f32.mrf.mxu1 }
0x1a87   :  { %v7567_v42 = vpop.f32.mrf.mxu1 }
0x1a89   :  { %v6151_v31 = vpop.f32.mrf.mxu1 }
0x1a8a   :  { %v4040_v58 = vmul.f32 0.25, %v6151_v31 }
0x1a8b   :  { %v3939_v9 = vpop.f32.mrf.mxu1 }
0x1a8c   :  { %v4044_v43 = vsel %vm6900_vm6, %v4040_v58, -1e+30  ;;  %v4039_v61 = vmul.f32 0.25, %v3939_v9 }
0x1a8d   :  { %v4050_v5 = vsel %vm439_vm5, %v4044_v43, -inf }
0x1a8e   :  { %v4043_v11 = vsel %vm6906_vm7, %v4039_v61, -1e+30  ;;  %4051 = vmax.xlane.f32.xlu1 %v4050_v5 }
0x1a8f   :  { %v4047_v16 = vsel %vm439_vm5, %v4043_v11, -inf }
0x1a90   :  { %4048 = vmax.xlane.f32.xlu0 %v4047_v16 }
0x1a92   :  { %4078 = vadd.xlane.f32.xlu1 %v4077_v54 }
0x1a94   :  { %4057 = vmax.xlane.f32.xlu0 %v4056_v12 }
0x1aa3   :  { %4093 = vrot.lane.b32.xlu1 %v7380_v50, %s6630_s19 }
0x1aa7   :  { %4091 = vrot.lane.b32.xlu1 %v7374_v2, %s6630_s19 }
0x1b17   :  { %v4052_v18 = vpop.xlane.xlu1 %4051 }
0x1b18   :  { %v4060_v60 = vsub.f32 %v4044_v43, %v4052_v18 }
0x1b19   :  { %v4049_v27 = vpop.xlane.xlu0 %4048 }
0x1b1a   :  { %v4059_v19 = vsub.f32 %v4043_v11, %v4049_v27  ;;  %v4065_v41 = vmul.f32 1.442695, %v4060_v60 }
0x1b1b   :  { %v4079_v23 = vpop.xlane.xlu1 %4078 }
0x1b1c   :  { %v4063_v24 = vmul.f32 1.442695, %v4059_v19  ;;  %6463 = vrcp.f32 %v4079_v23 }
0x1b1d   :  { %v4058_v26 = vpop.xlane.xlu0 %4057 }
0x1b1e   :  { %6465 = vpow2.f32 %v4063_v24  ;;  %v4062_v28 = vsub.f32 %v4046_v3, %v4058_v26 }
0x1b1f   :  { %v4094_v29 = vpop.permute.xlu1 %4093 }
0x1b20   :  { %v4069_v55 = vmul.f32 1.442695, %v4062_v28  ;;  %6159 = vmatprep.subr.mxu1 %v4094_v29 }
0x1b21   :  { %6160 = vmatpush3.msra.mxu1 %v4094_v29 }
0x1b22   :  { %6467 = vpow2.f32 %v4069_v55 }
0x1b23   :  { %v4092_v32 = vpop.permute.xlu1 %4091  ;;  %6469 = vpow2.f32 %v4065_v41 }
0x1b24   :  { %6161 = vmatprep.subr.mxu1 %v4092_v32 }
0x1b25   :  { %6162 = vmatpush3.msra.mxu1 %v4092_v32 }
0x1b26   :  { %6173 = vmatprep.subr.bf16.mxu1 %v6307_v40 }
0x1b29   :  { %v6464_v63 = vpop.eup %6463 }
0x1b2a   :  { %v4089_v7 = vmul.f32 %v6464_v63, %v6462_v36 }
0x1b2b   :  { %v6466_v6 = vpop.eup %6465 }
0x1b2c   :  { %v4071_v8 = vsel %vm439_vm5, %v6466_v6, 0.0  ;;  %6170 = vmatprep.mubr.msk.f32.mxu0 %vm439_vm5, %v4089_v7 }
0x1b2d   :  { %4072 = vadd.xlane.f32.xlu1 %v4071_v8 }
0x1b2f   :  { %v6468_v46 = vpop.eup %6467 }
0x1b30   :  { %v4080_v49 = vsel %vm439_vm5, %v6468_v46, 0.0  ;;  %v6470_v45 = vpop.eup %6469 }
0x1b31   :  { %4081 = vadd.xlane.f32.xlu0 %v4080_v49  ;;  %v4074_v52 = vsel %vm439_vm5, %v6470_v45, 0.0 }
0x1b35   :  { %4075 = vadd.xlane.f32.xlu0 %v4074_v52 }
0x1b3e   :  { %4178 = vrot.lane.b32.xlu1 %v7388_v13, %s6630_s19 }
0x1b42   :  { %4429 = vrot.lane.b32.xlu1 %v7390_v14, %s6621_s2 }
0x1b46   :  { %4427 = vrot.lane.b32.xlu1 %v7382_v30, %s6621_s2 }
0x1b4a   :  { %4334 = vrot.lane.b32.xlu1 %v7376_v44, %s6631_s13 }
0x1b4b   :  { %4180 = vrot.lane.b32.xlu0 %v7409_v48, %s6630_s19 }
0x1b4e   :  { %4425 = vrot.lane.b32.xlu1 %v7390_v14, %s6631_s13 }
0x1b4f   :  { %4338 = vrot.lane.b32.xlu0 %v7376_v44, %s6621_s2 }
0x1b53   :  { %4336 = vrot.lane.b32.xlu0 %v7370_v25, %s6621_s2 }
0x1b57   :  { %4332 = vrot.lane.b32.xlu0 %v7370_v25, %s6631_s13 }
0x1b5b   :  { %4423 = vrot.lane.b32.xlu0 %v7382_v30, %s6631_s13 }
0x1bb6   :  { %v4073_v33 = vpop.xlane.xlu1 %4072 }
0x1bb7   :  { %6471 = vrcp.f32 %v4073_v33 }
0x1bba   :  { %v4082_v34 = vpop.xlane.xlu0 %4081  ;;  %v4179_v14 = vpop.permute.xlu1 %4178 }
0x1bbb   :  { %6473 = vrcp.f32 %v4082_v34  ;;  %v3843_v34 = vadd.f32 %v7548_v15, %v7563_v47 }
0x1bbe   :  { %v4076_v57 = vpop.xlane.xlu0 %4075  ;;  %v4430_v9 = vpop.permute.xlu1 %4429 }
0x1bbf   :  { %6475 = vrcp.f32 %v4076_v57 }
0x1bc2   :  { %v4181_v31 = vpop.permute.xlu0 %4180  ;;  %v4428_v5 = vpop.permute.xlu1 %4427 }
0x1bc3   :  { %6166 = vmatprep.subr.mxu0 %v4181_v31 }
0x1bc4   :  { %v6472_v44 = vpop.eup %6471  ;;  %6167 = vmatpush3.msra.mxu0 %v4181_v31 }
0x1bc5   :  { %6168 = vmatprep.subr.mxu0 %v4179_v14  ;;  %v4087_v58 = vmul.f32 %v6472_v44, %v6466_v6  ;;  %v3854_v44 = vadd.f32 %v7552_v37, %v7565_v35 }
0x1bc6   :  { %v4339_v39 = vpop.permute.xlu0 %4338  ;;  %6169 = vmatpush3.msra.mxu0 %v4179_v14  ;;  %v4335_v16 = vpop.permute.xlu1 %4334 }
0x1bc7   :  { %6163 = vmatprep.mubr.msk.f32.mxu1 %vm439_vm5, %v4087_v58  ;;  %6179 = vmatprep.subr.msk.mxu0 %vm439_vm5, %v4339_v39 }
0x1bc8   :  { %v6474_v25 = vpop.eup %6473 }
0x1bc9   :  { %v4090_v30 = vmul.f32 %v6474_v25, %v6468_v46 }
0x1bca   :  { %v4337_v43 = vpop.permute.xlu0 %4336  ;;  %v4426_v63 = vpop.permute.xlu1 %4425 }
0x1bcb   :  { %6171 = vmatmul.mubr.msk.f32.vlgmr.msra.gmra.mxu0 %vm439_vm5, %v4090_v30 }
0x1bcc   :  { %v6476_v61 = vpop.eup %6475  ;;  %6180 = vmatpush3.xpose.msk.msra.mxu0 %vm439_vm5, %v4339_v39 }
0x1bcd   :  { %6181 = vmatprep.subr.msk.mxu0 %vm439_vm5, %v4337_v43  ;;  %v4088_v36 = vmul.f32 %v6476_v61, %v6470_v45 }
0x1bce   :  { %v4333_v11 = vpop.permute.xlu0 %4332 }
0x1bcf   :  { %6164 = vmatmul.mubr.msk.f32.vlgmr.msra.gmra.mxu1 %vm439_vm5, %v4088_v36  ;;  %6183 = vmatprep.mubr.msk.f32.mxu0 %vm439_vm5, %v4333_v11 }
0x1bd0   :  { %6174 = vmatpush3.bf16.msra.mxu1 %v6307_v40  ;;  %6182 = vmatpush3.xpose.msk.msra.mxu0 %vm439_vm5, %v4337_v43  ;;  %v3851_v40 = vadd.f32 %v7544_v1, %v7561_v59 }
0x1bd1   :  { %6186 = vmatprep.subr.msk.mxu1 %vm439_vm5, %v4430_v9 }
0x1bd2   :  { %v4424_v24 = vpop.permute.xlu0 %4423 }
0x1bd3   :  { %6184 = vmatmul.mubr.msk.f32.vlgmr.msra.gmra.mxu0 %vm439_vm5, %v4335_v16 }
0x1c8b   :  { %v6172_v3 = vpop.f32.mrf.mxu0 }
0x1c8d   :  { %v4256_v12 = vpop.f32.mrf.mxu0 }
0x1c8e   :  { %v4266_v19 = vpack.c.bf16 %v6172_v3, %v4256_v12 }
0x1c8f   :  { %v6165_v54 = vpop.f32.mrf.mxu1 }
0x1c91   :  { %v4169_v18 = vpop.f32.mrf.mxu1 }
0x1c92   :  { %v4265_v27 = vpack.c.bf16 %v6165_v54, %v4169_v18 }
0x1c93   :  { %v6185_v23 = vpop.f32.mrf.mxu0 }
0x1c94   :  { %v4515_v60 = vmul.f32 0.25, %v6185_v23  ;;  %6175 = vmatprep.mubr.msk.bf16.mxu1 %vm439_vm5, %v4265_v27 }
0x1c95   :  { %v4414_v26 = vpop.f32.mrf.mxu0  ;;  %6176 = vmatmul.mubr.msk.bf16.vlgmr.msra.gmra.mxu1 %vm439_vm5, %v4266_v19 }
0x1c96   :  { %v4519_v28 = vsel %vm6900_vm6, %v4515_v60, -1e+30  ;;  %v4514_v29 = vmul.f32 0.25, %v4414_v26  ;;  %6187 = vmatpush3.xpose.msk.msra.mxu1 %vm439_vm5, %v4430_v9  ;;  %6190 = vmatprep.mubr.msk.f32.mxu1 %vm439_vm5, %v4424_v24 }
0x1c97   :  { %6188 = vmatprep.subr.msk.mxu1 %vm439_vm5, %v4428_v5  ;;  %v4525_v41 = vsel %vm439_vm5, %v4519_v28, -inf }
0x1c98   :  { %v4518_v55 = vsel %vm6906_vm7, %v4514_v29, -1e+30  ;;  %4526 = vmax.xlane.f32.xlu1 %v4525_v41 }
0x1c99   :  { %v4522_v32 = vsel %vm439_vm5, %v4518_v55, -inf }
0x1c9a   :  { %6189 = vmatpush3.xpose.msk.msra.mxu1 %vm439_vm5, %v4428_v5  ;;  %4523 = vmax.xlane.f32.xlu0 %v4522_v32 }
0x1c9d   :  { %6191 = vmatmul.mubr.msk.f32.vlgmr.msra.gmra.mxu1 %vm439_vm5, %v4426_v63 }
0x1d21   :  { %v4527_v45 = vpop.xlane.xlu1 %4526 }
0x1d22   :  { %v4535_v52 = vsub.f32 %v4519_v28, %v4527_v45 }
0x1d23   :  { %v4524_v6 = vpop.xlane.xlu0 %4523 }
0x1d24   :  { %v4534_v7 = vsub.f32 %v4518_v55, %v4524_v6  ;;  %v4540_v14 = vmul.f32 1.442695, %v4535_v52 }
0x1d26   :  { %v4538_v8 = vmul.f32 1.442695, %v4534_v7 }
0x1d28   :  { %6477 = vpow2.f32 %v4538_v8 }
0x1d29   :  { %6479 = vpow2.f32 %v4540_v14 }
0x1d35   :  { %v6478_v46 = vpop.eup %6477 }
0x1d36   :  { %v4546_v49 = vsel %vm439_vm5, %v6478_v46, 0.0 }
0x1d37   :  { %4547 = vadd.xlane.f32.xlu1 %v4546_v49  ;;  %v6308_v49 = vld [vmem:[%s7864_s6 + $0x38] sm:$0xff]  }
0x1d48   :  { %4568 = vrot.lane.b32.xlu1 %v7380_v50, %s6631_s13 }
0x1d4c   :  { %4566 = vrot.lane.b32.xlu1 %v7374_v2, %s6631_s13  ;;  %v3846_v2 = vadd.f32 %v7555_v38, %v7567_v42  ;;  %v6480_v42 = vpop.eup %6479 }
0x1d4d   :  { %v4549_v43 = vsel %vm439_vm5, %v6480_v42, 0.0 }
0x1d55   :  { %v6177_v33 = vpop.f32.mrf.mxu1 }
0x1d56   :  { %v7642_v57 = vadd.f32 %v6177_v33, %v3851_v40 }
0x1d57   :  { %v4313_v31 = vpop.f32.mrf.mxu1 }
0x1d58   :  { %v7646_v50 = vadd.f32 %v4313_v31, %v3843_v34 }
0x1d59   :  { %v6178_v58 = vpop.f32.mrf.mxu1 }
0x1d5a   :  { %v7650_v9 = vadd.f32 %v6178_v58, %v3854_v44 }
0x1d5b   :  { %v4316_v1 = vpop.f32.mrf.mxu1 }
0x1d5c   :  { %v7652_v59 = vadd.f32 %v4316_v1, %v3846_v2 }
0x1d5d   :  { %v6192_v15 = vpop.f32.mrf.mxu1 }
0x1d5e   :  { %v4517_v39 = vmul.f32 0.25, %v6192_v15  ;;  %v5628_v15 = vld [vmem:[#allocation2 + $0x1] ss:$0 sm:$0xff] }
0x1d5f   :  { %v4505_v47 = vpop.f32.mrf.mxu1 }
0x1d60   :  { %v4516_v25 = vmul.f32 0.25, %v4505_v47  ;;  %v4521_v35 = vsel %vm6900_vm6, %v4517_v39, -1e+30 }
0x1d61   :  { %v4531_v38 = vsel %vm439_vm5, %v4521_v35, -inf }
0x1d62   :  { %v4520_v30 = vsel %vm6906_vm7, %v4516_v25, -1e+30 }
0x1d63   :  { %v4528_v37 = vsel %vm439_vm5, %v4520_v30, -inf }
0x1d64   :  { %4529 = vmax.xlane.f32.xlu0 %v4528_v37 }
0x1d68   :  { %4532 = vmax.xlane.f32.xlu0 %v4531_v38 }
0x1d6c   :  { %4550 = vadd.xlane.f32.xlu0 %v4549_v43 }
0x1dc0   :  { %v4548_v61 = vpop.xlane.xlu1 %4547 }
0x1dc1   :  { %6481 = vrcp.f32 %v4548_v61 }
0x1dc4   :  { %v4569_v5 = vpop.permute.xlu1 %4568 }
0x1dc5   :  { %6193 = vmatprep.subr.mxu0 %v4569_v5 }
0x1dc6   :  { %6194 = vmatpush3.msra.mxu0 %v4569_v5 }
0x1dc8   :  { %v4567_v56 = vpop.permute.xlu1 %4566 }
0x1dc9   :  { %6195 = vmatprep.subr.mxu0 %v4567_v56 }
0x1dca   :  { %6196 = vmatpush3.msra.mxu0 %v4567_v56 }
0x1dcb   :  { %6207 = vmatprep.subr.bf16.mxu0 %v6308_v49 }
0x1dce   :  { %v6482_v36 = vpop.eup %6481 }
0x1dcf   :  { %v4562_v11 = vmul.f32 %v6482_v36, %v6478_v46 }
0x1dd1   :  { %6197 = vmatprep.mubr.msk.f32.mxu0 %vm439_vm5, %v4562_v11 }
0x1ded   :  { %v4530_v53 = vpop.xlane.xlu0 %4529 }
0x1dee   :  { %v4536_v16 = vsub.f32 %v4520_v30, %v4530_v53 }
0x1df0   :  { %v4542_v3 = vmul.f32 1.442695, %v4536_v16 }
0x1df1   :  { %v4533_v54 = vpop.xlane.xlu0 %4532 }
0x1df2   :  { %6483 = vpow2.f32 %v4542_v3  ;;  %v4537_v12 = vsub.f32 %v4521_v35, %v4533_v54 }
0x1df4   :  { %v4544_v18 = vmul.f32 1.442695, %v4537_v12 }
0x1df5   :  { %v4551_v27 = vpop.xlane.xlu0 %4550 }
0x1df6   :  { %6485 = vpow2.f32 %v4544_v18 }
0x1df7   :  { %6487 = vrcp.f32 %v4551_v27 }
0x1dff   :  { %v6484_v19 = vpop.eup %6483 }
0x1e00   :  { %v4552_v23 = vsel %vm439_vm5, %v6484_v19, 0.0 }
0x1e01   :  { %4553 = vadd.xlane.f32.xlu1 %v4552_v23 }
0x1e03   :  { %v6486_v60 = vpop.eup %6485 }
0x1e04   :  { %v6488_v24 = vpop.eup %6487  ;;  %v4555_v26 = vsel %vm439_vm5, %v6486_v60, 0.0 }
0x1e05   :  { %4556 = vadd.xlane.f32.xlu0 %v4555_v26  ;;  %v4563_v28 = vmul.f32 %v6488_v24, %v6480_v42  ;;  %v6311_v24 = vld [vmem:[%s7868_s10 + $0x74] ss:$8 sps:$4 sm:$0xff]   ;;  %v6309_v26 = vld [vmem:[%s7868_s10 + $0x70] ss:$8 sps:$4 sm:$0xff]  }
0x1e07   :  { %6198 = vmatmul.mubr.msk.f32.vlgmr.msra.gmra.mxu0 %vm439_vm5, %v4563_v28  ;;  %v6314_v28 = vld [vmem:[%s7868_s10 + $0x64] ss:$8 sps:$4 sm:$0xff]  }
0x1e08   :  { %6208 = vmatpush3.bf16.msra.mxu0 %v6308_v49  ;;  %v6327_v49 = vld [vmem:[%s7870_s12 + $0xe0] sm:$0xff]  }
0x1e12   :  { %4653 = vrot.lane.b32.xlu1 %v7388_v13, %s6631_s13 }
0x1e1b   :  { %4655 = vrot.lane.b32.xlu0 %v7409_v48, %s6631_s13 }
0x1e8a   :  { %v4554_v29 = vpop.xlane.xlu1 %4553 }
0x1e8b   :  { %6489 = vrcp.f32 %v4554_v29  ;;  %v6312_v29 = vld [vmem:[%s7868_s10 + $0x60] ss:$8 sps:$4 sm:$0xff]  }
0x1e8e   :  { %v4557_v41 = vpop.xlane.xlu0 %4556  ;;  %v4654_v32 = vpop.permute.xlu1 %4653 }
0x1e8f   :  { %6491 = vrcp.f32 %v4557_v41  ;;  %v6317_v41 = vld [vmem:[%s7868_s10 + $0x54] ss:$8 sps:$4 sm:$0xff]  }
0x1e92   :  { %v4656_v55 = vpop.permute.xlu0 %4655 }
0x1e93   :  { %6200 = vmatprep.subr.mxu1 %v4656_v55 }
0x1e94   :  { %6201 = vmatpush3.msra.mxu1 %v4656_v55  ;;  %v6315_v55 = vld [vmem:[%s7868_s10 + $0x50] ss:$8 sps:$4 sm:$0xff]  }
0x1e95   :  { %6202 = vmatprep.subr.mxu1 %v4654_v32 }
0x1e96   :  { %6203 = vmatpush3.msra.mxu1 %v4654_v32  ;;  %v6320_v32 = vld [vmem:[%s7868_s10 + $0x44] ss:$8 sps:$4 sm:$0xff]  }
0x1e97   :  { %4977 = vmatprep.subr.bf16.mxu1 %v6311_v24  ;;  %v4911_v24 = vld [vmem:[#allocation5 + $0x2] sm:$0x3] }
0x1e98   :  { %v6490_v63 = vpop.eup %6489 }
0x1e99   :  { %v4564_v6 = vmul.f32 %v6490_v63, %v6484_v19  ;;  %v6318_v63 = vld [vmem:[%s7868_s10 + $0x40] ss:$8 sps:$4 sm:$0xff]  }
0x1e9b   :  { %6204 = vmatprep.mubr.msk.f32.mxu1 %vm439_vm5, %v4564_v6  ;;  %v6321_v6 = vld [vmem:[%s7870_s12 + $0xf8] sm:$0xff]  }
0x1e9c   :  { %v6492_v7 = vpop.eup %6491  ;;  %5895 = vmatprep.subr.bf16.mxu0 %v6321_v6 }
0x1e9d   :  { %v4565_v8 = vmul.f32 %v6492_v7, %v6486_v60  ;;  %v6322_v7 = vld [vmem:[%s7870_s12 + $0xb8] sm:$0xff]  }
0x1e9f   :  { %6205 = vmatmul.mubr.msk.f32.vlgmr.msra.gmra.mxu1 %vm439_vm5, %v4565_v8  ;;  %v6323_v8 = vld [vmem:[%s7870_s12 + $0xf0] sm:$0xff]  }
0x1ea0   :  { %5001 = vmatprep.mubr.bf16.mxu1 %v6625_v0  ;;  %4978 = vmatpush1.bf16.msra.mxu1 %v6309_v26 }
0x1ea1   :  { %4979 = vmatprep.subr.bf16.mxu1 %v6314_v28  ;;  %v4920_v28 = vrot.slane %v4911_v24, %v2425_v21 }
0x1ea4   :  { %4980 = vmatpush1.bf16.msra.mxu1 %v6312_v29  ;;  %v4916_v29 = vrot.slane %v4911_v24, %v2421_v22 }
0x1ea5   :  { %4981 = vmatprep.subr.bf16.mxu1 %v6317_v41 }
0x1ea8   :  { %4982 = vmatpush1.bf16.msra.mxu1 %v6315_v55 }
0x1ea9   :  { %4983 = vmatprep.subr.bf16.mxu1 %v6320_v32 }
0x1eac   :  { %4984 = vmatpush1.bf16.msra.mxu1 %v6318_v63 }
0x1ec7   :  { %v6199_v13 = vpop.f32.mrf.mxu0 }
0x1ec9   :  { %v4644_v48 = vpop.f32.mrf.mxu0 }
0x1eca   :  { %v4740_v46 = vpack.c.bf16 %v6199_v13, %v4644_v48  ;;  %v6324_v13 = vld [vmem:[%s7870_s12 + $0xb0] sm:$0xff]   ;;  %v6325_v48 = vld [vmem:[%s7870_s12 + $0xe8] sm:$0xff]  }
0x1ecc   :  { %6209 = vmatprep.mubr.msk.bf16.mxu0 %vm439_vm5, %v4740_v46  ;;  %v6326_v46 = vld [vmem:[%s7870_s12 + $0xa8] sm:$0xff]  }
0x1f5f   :  { %v6206_v45 = vpop.f32.mrf.mxu1 }
0x1f61   :  { %v4731_v52 = vpop.f32.mrf.mxu1 }
0x1f62   :  { %v4741_v40 = vpack.c.bf16 %v6206_v45, %v4731_v52  ;;  %v6328_v45 = vld [vmem:[%s7870_s12 + $0xa0] sm:$0xff]   ;;  %v6329_v52 = vld [vmem:[%s7870_s12 + $0xd8] sm:$0xff]  }
0x1f64   :  { %6210 = vmatmul.mubr.msk.bf16.vlgmr.msra.gmra.mxu0 %vm439_vm5, %v4741_v40  ;;  %v6330_v40 = vld [vmem:[%s7870_s12 + $0x98] sm:$0xff]  }
0x1f65   :  { %5896 = vmatpush3.bf16.msra.mxu0 %v6322_v7 }
0x1f66   :  { %5897 = vmatprep.subr.bf16.mxu0 %v6323_v8 }
0x1f69   :  { %5898 = vmatpush3.bf16.msra.mxu0 %v6324_v13 }
0x1f6a   :  { %5899 = vmatprep.subr.bf16.mxu0 %v6325_v48 }
0x1f6d   :  { %5900 = vmatpush3.bf16.msra.mxu0 %v6326_v46 }
0x1f6e   :  { %5901 = vmatprep.subr.bf16.mxu0 %v6327_v49 }
0x1f71   :  { %5902 = vmatpush3.bf16.msra.mxu0 %v6328_v45 }
0x1f72   :  { %5903 = vmatprep.subr.bf16.mxu0 %v6329_v52 }
0x1f75   :  { %5904 = vmatpush3.bf16.msra.mxu0 %v6330_v40 }
0x2024   :  { %v6211_v33 = vpop.f32.mrf.mxu0 }
0x2025   :  { %v4805_v34 = vadd.f32 %v6211_v33, %v7642_v57 }
0x2026   :  { %v4788_v14 = vpop.f32.mrf.mxu0 }
0x2027   :  { %v4803_v31 = vadd.f32 %v4788_v14, %v7646_v50  ;;  %v4809_v58 = vadd.f32 %v4805_v34, %v7320_v17 }
0x2028   :  { %v6212_v44 = vpop.f32.mrf.mxu0 }
0x2029   :  { %v4807_v2 = vadd.f32 %v4803_v31, %v7310_v62  ;;  %v4806_v1 = vadd.f32 %v6212_v44, %v7650_v9  ;;  %v7685_v30 = vadd.f32 %v5628_v15, %v4809_v58 }
0x202a   :  { %v4791_v47 = vpop.f32.mrf.mxu0 }
0x202b   :  { %v7682_v39 = vadd.f32 %v5628_v15, %v4807_v2  ;;  %v4804_v25 = vadd.f32 %v4791_v47, %v7652_v59  ;;  %v4810_v57 = vadd.f32 %v4806_v1, %v7325_v20  ;;  %v4833_v9 = vsel %vm180_vm4, %v7685_v30, 0.0 }
0x202d   :  { %v4808_v37 = vadd.f32 %v4804_v25, %v7315_v4  ;;  %v4827_v50 = vsel %vm180_vm4, %v7682_v39, 0.0  ;;  %v7693_v62 = vadd.f32 %v5628_v15, %v4810_v57 }
0x202e   :  { %4828 = vadd.xlane.f32.xlu0 %v4827_v50 }
0x202f   :  { %v7691_v17 = vadd.f32 %v5628_v15, %v4808_v37  ;;  %v4836_v20 = vsel %vm180_vm4, %v7693_v62, 0.0 }
0x2031   :  { %v4830_v59 = vsel %vm180_vm4, %v7691_v17, 0.0 }
0x2032   :  { %4834 = vadd.xlane.f32.xlu0 %v4833_v9  ;;  %4831 = vadd.xlane.f32.xlu1 %v4830_v59  ;;  %v5631_v9 = vld [vmem:[%s7866_s8 + $0x1] ss:$0 sm:$0xff] }
0x2036   :  { %4837 = vadd.xlane.f32.xlu0 %v4836_v20 }
0x20b7   :  { %v4829_v4 = vpop.xlane.xlu0 %4828 }
0x20b8   :  { %v4839_v35 = vmul.f32 0.015625, %v4829_v4 }
0x20ba   :  { %v7702_v38 = vsub.f32 %v7682_v39, %v4839_v35 }
0x20bb   :  { %v4835_v42 = vpop.xlane.xlu0 %4834  ;;  %v4832_v43 = vpop.xlane.xlu1 %4831 }
0x20bc   :  { %v4841_v61 = vmul.f32 0.015625, %v4835_v42  ;;  %v4840_v5 = vmul.f32 0.015625, %v4832_v43  ;;  %v4847_v56 = vmul.f32 %v7702_v38, %v7702_v38  ;;  %v5632_v42 = vld [vmem:[%s7867_s9 + $0x1] ss:$0 sm:$0xff] }
0x20be   :  { %v7707_v36 = vsub.f32 %v7685_v30, %v4841_v61  ;;  %v7710_v11 = vsub.f32 %v7691_v17, %v4840_v5  ;;  %v4851_v53 = vsel %vm180_vm4, %v4847_v56, 0.0 }
0x20bf   :  { %v4838_v16 = vpop.xlane.xlu0 %4837  ;;  %4852 = vadd.xlane.f32.xlu1 %v4851_v53 }
0x20c0   :  { %v4842_v3 = vmul.f32 0.015625, %v4838_v16  ;;  %v4849_v54 = vmul.f32 %v7707_v36, %v7707_v36  ;;  %v4848_v12 = vmul.f32 %v7710_v11, %v7710_v11 }
0x20c2   :  { %v7718_v18 = vsub.f32 %v7693_v62, %v4842_v3  ;;  %v4857_v27 = vsel %vm180_vm4, %v4849_v54, 0.0  ;;  %v4854_v19 = vsel %vm180_vm4, %v4848_v12, 0.0 }
0x20c3   :  { %4858 = vadd.xlane.f32.xlu1 %v4857_v27  ;;  %4855 = vadd.xlane.f32.xlu0 %v4854_v19  ;;  %v6331_v19 = vld [vmem:[%s7870_s12 + $0xd0] sm:$0xff]  }
0x20c4   :  { %v4850_v23 = vmul.f32 %v7718_v18, %v7718_v18  ;;  %5905 = vmatprep.subr.bf16.mxu0 %v6331_v19 }
0x20c6   :  { %v4860_v60 = vsel %vm180_vm4, %v4850_v23, 0.0  ;;  %v6335_v23 = vld [vmem:[%s7870_s12 + $0xc0] sm:$0xff]  }
0x20c7   :  { %4861 = vadd.xlane.f32.xlu0 %v4860_v60  ;;  %v6336_v60 = vld [vmem:[%s7870_s12 + $0x80] sm:$0xff]  }
0x2148   :  { %v4853_v33 = vpop.xlane.xlu1 %4852 }
0x2149   :  { %v4863_v34 = vmul.f32 0.015625, %v4853_v33 }
0x214b   :  { %v4867_v14 = vadd.f32 1e-05, %v4863_v34 }
0x214c   :  { %v4856_v31 = vpop.xlane.xlu0 %4855  ;;  %v4859_v44 = vpop.xlane.xlu1 %4858 }
0x214d   :  { %6493 = vrsqrt.f32 %v4867_v14  ;;  %v4864_v58 = vmul.f32 0.015625, %v4856_v31  ;;  %v4865_v2 = vmul.f32 0.015625, %v4859_v44 }
0x214f   :  { %v4868_v1 = vadd.f32 1e-05, %v4864_v58  ;;  %v4869_v15 = vadd.f32 1e-05, %v4865_v2 }
0x2150   :  { %v4862_v47 = vpop.xlane.xlu0 %4861 }
0x2151   :  { %6495 = vrsqrt.f32 %v4868_v1  ;;  %v4866_v25 = vmul.f32 0.015625, %v4862_v47 }
0x2152   :  { %6497 = vrsqrt.f32 %v4869_v15 }
0x2153   :  { %v4870_v57 = vadd.f32 1e-05, %v4866_v25 }
0x2155   :  { %6499 = vrsqrt.f32 %v4870_v57 }
0x215a   :  { %v6494_v37 = vpop.eup %6493 }
0x215b   :  { %v4875_v50 = vmul.f32 %v6494_v37, %v7702_v38 }
0x215d   :  { %v4885_v4 = vmul.f32 %v5631_v9, %v4875_v50 }
0x215e   :  { %v6496_v59 = vpop.eup %6495 }
0x215f   :  { %v4876_v20 = vmul.f32 %v6496_v59, %v7710_v11  ;;  %v6498_v35 = vpop.eup %6497  ;;  %v4895_v5 = vadd.f32 %v5632_v42, %v4885_v4 }
0x2160   :  { %v4877_v53 = vmul.f32 %v6498_v35, %v7707_v36  ;;  %v6332_v36 = vld [vmem:[%s7870_s12 + $0x90] sm:$0xff]  }
0x2161   :  { %v4886_v43 = vmul.f32 %v5631_v9, %v4876_v20  ;;  %5906 = vmatpush3.bf16.msra.mxu0 %v6332_v36 }
0x2162   :  { %v6500_v61 = vpop.eup %6499  ;;  %v4887_v54 = vmul.f32 %v5631_v9, %v4877_v53 }
0x2163   :  { %v4896_v56 = vadd.f32 %v5632_v42, %v4886_v43  ;;  %v4878_v38 = vmul.f32 %v6500_v61, %v7718_v18  ;;  %v6333_v18 = vld [vmem:[%s7870_s12 + $0xc8] sm:$0xff]  }
0x2164   :  { %v4897_v12 = vadd.f32 %v5632_v42, %v4887_v54  ;;  %5907 = vmatprep.subr.bf16.mxu0 %v6333_v18 }
0x2165   :  { %v4899_v16 = vpack.c.bf16 %v4896_v56, %v4895_v5  ;;  %v4888_v3 = vmul.f32 %v5631_v9, %v4878_v38  ;;  %v5699_v9 = vld [vmem:[#allocation7 + $0x1] ss:$0 sm:$0xff] }
0x2167   :  { %5649 = vmatmul.mubr.msk.bf16.vlgmr.msra.gmra.mxu1 %vm180_vm4, %v4899_v16  ;;  %v4898_v11 = vadd.f32 %v5632_v42, %v4888_v3 }
0x2168   :  { %5011 = vmatprep.mubr.bf16.mxu1 %v6625_v0  ;;  %v6334_v0 = vld [vmem:[%s7870_s12 + $0x88] sm:$0xff]  }
0x2169   :  { %v4900_v27 = vpack.c.bf16 %v4898_v11, %v4897_v12  ;;  %5908 = vmatpush3.bf16.msra.mxu0 %v6334_v0 }
0x216a   :  { %5909 = vmatprep.subr.bf16.mxu0 %v6335_v23 }
0x216d   :  { %5910 = vmatpush3.bf16.msra.mxu0 %v6336_v60 }
0x216f   :  { %5650 = vmatmul.mubr.msk.bf16.gmra.mxu1 %vm180_vm4, %v4900_v27 }
0x2227   :  { %v5003_v26 = vpop.f32.mrf.mxu1 }
0x2228   :  { %v5004_v6 = vadd.f32 %v5003_v26, %v4916_v29 }
0x2229   :  { %v5005_v41 = vpop.f32.mrf.mxu1 }
0x222a   :  { %v5006_v32 = vadd.f32 %v5005_v41, %v4920_v28  ;;  %v5022_v45 = vmax.f32 %v5004_v6, 0.0 }
0x222b   :  { %v5007_v55 = vpop.f32.mrf.mxu1 }
0x222c   :  { %v5008_v63 = vadd.f32 %v5007_v55, %v4916_v29  ;;  %v5023_v46 = vmax.f32 %v5006_v32, 0.0 }
0x222d   :  { %v5009_v7 = vpop.f32.mrf.mxu1 }
0x222e   :  { %v5010_v8 = vadd.f32 %v5009_v7, %v4920_v28  ;;  %v5024_v13 = vmax.f32 %v5008_v63, 0.0 }
0x222f   :  { %v5013_v48 = vpop.f32.mrf.mxu1 }
0x2230   :  { %v5025_v49 = vmax.f32 %v5010_v8, 0.0  ;;  %v5030_v33 = vpack.c.bf16 %v5024_v13, %v5022_v45  ;;  %v5014_v51 = vadd.f32 %v5013_v48, %v4916_v29  ;;  %v6339_v45 = vld [vmem:[%s7874_s16 + $0x8] sm:$0xff]  }
0x2231   :  { %v5015_v52 = vpop.f32.mrf.mxu1 }
0x2232   :  { %v5031_v40 = vpack.c.bf16 %v5025_v49, %v5023_v46  ;;  %v5016_v21 = vadd.f32 %v5015_v52, %v4920_v28  ;;  %v5026_v1 = vmax.f32 %v5014_v51, 0.0  ;;  %v6337_v46 = vld [vmem:[%s7874_s16 + $0x18] sm:$0xff]   ;;  %v6338_v49 = vld [vmem:[%s7874_s16 + $0x10] sm:$0xff]   ;;  %v6340_v52 = vld [vmem:[%s7874_s16] sm:$0xff]  }
0x2233   :  { %v5017_v34 = vpop.f32.mrf.mxu1  ;;  %6213 = vmatprep.subr.bf16.mxu1 %v6337_v46 }
0x2234   :  { %v5018_v14 = vadd.f32 %v5017_v34, %v4916_v29  ;;  %5195 = vmatprep.mubr.bf16.mxu0 %v5031_v40  ;;  %v5027_v58 = vmax.f32 %v5016_v21, 0.0  ;;  %6214 = vmatpush3.bf16.msra.mxu1 %v6337_v46 }
0x2235   :  { %v5019_v22 = vpop.f32.mrf.mxu1  ;;  %5196 = vmatmul.mubr.bf16.vlgmr.msra.gmra.mxu0 %v5030_v33  ;;  %6215 = vmatprep.subr.bf16.mxu1 %v6338_v49 }
0x2236   :  { %v5020_v31 = vadd.f32 %v5019_v22, %v4920_v28  ;;  %v5028_v44 = vmax.f32 %v5018_v14, 0.0 }
0x2238   :  { %v5029_v2 = vmax.f32 %v5020_v31, 0.0  ;;  %v5032_v47 = vpack.c.bf16 %v5028_v44, %v5026_v1  ;;  %6216 = vmatpush3.bf16.msra.mxu1 %v6338_v49 }
0x2239   :  { %6217 = vmatprep.subr.bf16.mxu1 %v6339_v45 }
0x223a   :  { %v5033_v15 = vpack.c.bf16 %v5029_v2, %v5027_v58 }
0x223c   :  { %5203 = vmatprep.mubr.bf16.mxu0 %v5033_v15  ;;  %6218 = vmatpush3.bf16.msra.mxu1 %v6339_v45 }
0x223d   :  { %5204 = vmatmul.mubr.bf16.gmra.mxu0 %v5032_v47  ;;  %6219 = vmatprep.subr.bf16.mxu1 %v6340_v52 }
0x2240   :  { %6220 = vmatpush3.bf16.msra.mxu1 %v6340_v52 }
0x22f5   :  { %v5911_v25 = vpop.f32.mrf.mxu0 }
0x22f7   :  { %v5912_v57 = vpop.f32.mrf.mxu0 }
0x22f8   :  { %v5913_v37 = vadd.f32 %v5912_v57, %v5911_v25  ;;  %v5700_v25 = vld [vmem:[%s7872_s14] ss:$0 sm:$0xff]  ;;  %s6632_s14 = smov [#allocation10]  }
0x22f9   :  { %v5914_v50 = vpop.f32.mrf.mxu0 }
0x22fa   :  { %v5212_v59 = vadd.f32 %v5913_v37, %v7682_v39 }
0x22fb   :  { %v5915_v20 = vpop.f32.mrf.mxu0 }
0x22fc   :  { %v5916_v4 = vadd.f32 %v5915_v20, %v5914_v50  ;;  %v5224_v35 = vadd.f32 %v5699_v9, %v5212_v59 }
0x22fd   :  { %v5917_v42 = vpop.f32.mrf.mxu0 }
0x22fe   :  { %v5213_v43 = vadd.f32 %v5916_v4, %v7691_v17  ;;  %v5230_v61 = vsel %vm180_vm4, %v5224_v35, 0.0 }
0x22ff   :  { %5231 = vadd.xlane.f32.xlu1 %v5230_v61  ;;  %v5918_v5 = vpop.f32.mrf.mxu0 }
0x2300   :  { %v5919_v56 = vadd.f32 %v5918_v5, %v5917_v42  ;;  %v5225_v53 = vadd.f32 %v5699_v9, %v5213_v43 }
0x2301   :  { %v5920_v38 = vpop.f32.mrf.mxu0 }
0x2302   :  { %v5214_v16 = vadd.f32 %v5919_v56, %v7685_v30  ;;  %v5233_v3 = vsel %vm180_vm4, %v5225_v53, 0.0 }
0x2303   :  { %5234 = vadd.xlane.f32.xlu0 %v5233_v3  ;;  %v5921_v54 = vpop.f32.mrf.mxu0 }
0x2304   :  { %v5922_v39 = vadd.f32 %v5921_v54, %v5920_v38  ;;  %v5226_v11 = vadd.f32 %v5699_v9, %v5214_v16  ;;  %v5702_v54 = vld [vmem:[#allocation8] ss:$0 sm:$0xff] }
0x2306   :  { %v5215_v12 = vadd.f32 %v5922_v39, %v7693_v62  ;;  %v5236_v27 = vsel %vm180_vm4, %v5226_v11, 0.0 }
0x2307   :  { %5237 = vadd.xlane.f32.xlu1 %v5236_v27 }
0x2308   :  { %v5227_v17 = vadd.f32 %v5699_v9, %v5215_v12  ;;  %v5701_v9 = vld [vmem:[%s7873_s15] ss:$0 sm:$0xff]  ;;  %s5412_s15 = sshll.u32 %s6632_s14, 4  ;;  %s5413_s15 = int_to_ptr.vmem [resolvable:$true] %s5412_s15 }
0x2309   :  { %s6589_s22 = scalar_lea.vmem %s5413_s15, 512  ;;  %p6594_p7 = scmp.lt.s32.totalorder %s5413_s15, %s5413_s15 }
0x230a   :  { %v5239_v19 = vsel %vm180_vm4, %v5227_v17, 0.0  ;;  %p6590_p6 = scmp.ne.s32.totalorder %s5413_s15, %s6589_s22  ;;  %p6595_p8 = scmp.lt.s32.totalorder %s6589_s22, %s6589_s22 }
0x230b   :  { %5240 = vadd.xlane.f32.xlu0 %v5239_v19 }
0x230c   :  { %p6596_p9 = por %p6595_p8, %p6594_p7 }
0x230e   :  { %p6597_p10 = pnand %p6596_p9, %p6590_p6 }
0x2388   :  { %v5232_v36 = vpop.xlane.xlu1 %5231 }
0x2389   :  { %v5242_v18 = vmul.f32 0.015625, %v5232_v36 }
0x238b   :  { %v5246_v0 = vsub.f32 %v5224_v35, %v5242_v18 }
0x238c   :  { %v5235_v23 = vpop.xlane.xlu0 %5234 }
0x238d   :  { %v5243_v30 = vmul.f32 0.015625, %v5235_v23  ;;  %v5250_v60 = vmul.f32 %v5246_v0, %v5246_v0 }
0x238f   :  { %v5247_v24 = vsub.f32 %v5225_v53, %v5243_v30  ;;  %v5254_v26 = vsel %vm180_vm4, %v5250_v60, 0.0 }
0x2390   :  { %5255 = vadd.xlane.f32.xlu1 %v5254_v26  ;;  %v5238_v28 = vpop.xlane.xlu1 %5237 }
0x2391   :  { %v5244_v29 = vmul.f32 0.015625, %v5238_v28  ;;  %v5251_v62 = vmul.f32 %v5247_v24, %v5247_v24 }
0x2393   :  { %v5248_v41 = vsub.f32 %v5226_v11, %v5244_v29  ;;  %v5257_v55 = vsel %vm180_vm4, %v5251_v62, 0.0 }
0x2394   :  { %5258 = vadd.xlane.f32.xlu0 %v5257_v55  ;;  %v5241_v32 = vpop.xlane.xlu0 %5240 }
0x2395   :  { %v5245_v63 = vmul.f32 0.015625, %v5241_v32  ;;  %v5252_v6 = vmul.f32 %v5248_v41, %v5248_v41 }
0x2397   :  { %v5249_v7 = vsub.f32 %v5227_v17, %v5245_v63  ;;  %v5260_v8 = vsel %vm180_vm4, %v5252_v6, 0.0 }
0x2398   :  { %5261 = vadd.xlane.f32.xlu1 %v5260_v8 }
0x2399   :  { %v5253_v13 = vmul.f32 %v5249_v7, %v5249_v7 }
0x239b   :  { %v5263_v48 = vsel %vm180_vm4, %v5253_v13, 0.0 }
0x239c   :  { %5264 = vadd.xlane.f32.xlu0 %v5263_v48 }
0x2419   :  { %v5256_v40 = vpop.xlane.xlu1 %5255 }
0x241a   :  { %v5266_v33 = vmul.f32 0.015625, %v5256_v40 }
0x241c   :  { %v5270_v34 = vadd.f32 1e-05, %v5266_v33 }
0x241d   :  { %v5259_v21 = vpop.xlane.xlu0 %5258 }
0x241e   :  { %6501 = vrsqrt.f32 %v5270_v34  ;;  %v5267_v14 = vmul.f32 0.015625, %v5259_v21 }
0x2420   :  { %v5271_v51 = vadd.f32 1e-05, %v5267_v14 }
0x2421   :  { %v5262_v22 = vpop.xlane.xlu1 %5261 }
0x2422   :  { %6503 = vrsqrt.f32 %v5271_v51  ;;  %v5268_v31 = vmul.f32 0.015625, %v5262_v22 }
0x2424   :  { %v5272_v44 = vadd.f32 1e-05, %v5268_v31 }
0x2425   :  { %v5265_v58 = vpop.xlane.xlu0 %5264 }
0x2426   :  { %6505 = vrsqrt.f32 %v5272_v44  ;;  %v5269_v2 = vmul.f32 0.015625, %v5265_v58 }
0x2428   :  { %v5273_v1 = vadd.f32 1e-05, %v5269_v2 }
0x242a   :  { %6507 = vrsqrt.f32 %v5273_v1 }
0x242b   :  { %v6502_v15 = vpop.eup %6501 }
0x242c   :  { %v5278_v47 = vmul.f32 %v6502_v15, %v5246_v0 }
0x242e   :  { %v5288_v50 = vmul.f32 %v5700_v25, %v5278_v47 }
0x242f   :  { %v6504_v57 = vpop.eup %6503 }
0x2430   :  { %v5279_v37 = vmul.f32 %v6504_v57, %v5247_v24  ;;  %v5298_v35 = vadd.f32 %v5701_v9, %v5288_v50 }
0x2432   :  { %v5289_v59 = vmul.f32 %v5700_v25, %v5279_v37 }
0x2433   :  { %v6506_v20 = vpop.eup %6505 }
0x2434   :  { %v5280_v4 = vmul.f32 %v6506_v20, %v5248_v41  ;;  %v5299_v42 = vadd.f32 %v5701_v9, %v5289_v59 }
0x2436   :  { %v5302_v43 = vpack.c.bf16 %v5299_v42, %v5298_v35  ;;  %v5290_v56 = vmul.f32 %v5700_v25, %v5280_v4 }
0x2437   :  { %v6508_v61 = vpop.eup %6507 }
0x2438   :  { %v5281_v5 = vmul.f32 %v6508_v61, %v5249_v7  ;;  %6221 = vmatprep.mubr.msk.bf16.mxu1 %vm180_vm4, %v5302_v43  ;;  %v5300_v38 = vadd.f32 %v5701_v9, %v5290_v56 }
0x243a   :  { %v5291_v53 = vmul.f32 %v5700_v25, %v5281_v5 }
0x243c   :  { %v5301_v16 = vadd.f32 %v5701_v9, %v5291_v53 }
0x243e   :  { %v5303_v3 = vpack.c.bf16 %v5301_v16, %v5300_v38 }
0x2440   :  { %6222 = vmatmul.mubr.msk.bf16.vlgmr.msra.gmra.mxu1 %vm180_vm4, %v5303_v3 }
0x2500   :  { %v6223_v39 = vpop.f32.mrf.mxu1 }
0x2501   :  { %v5392_v11 = vadd.f32 %v6223_v39, %v5702_v54 }
0x2502   :  { %v5383_v12 = vpop.f32.mrf.mxu1 }
0x2503   :  { %v5401_v27 = vsel %vm5398_vm8, %v5392_v11, -1e+30  ;;  %v5384_v17 = vadd.f32 %v5702_v54, %v5383_v12 }
0x2504   :  { %5405 = vst [vmem:[#allocation10 + $0x10] sm:$0xff] %v5401_v27  ;;  %v6224_v19 = vpop.f32.mrf.mxu1 }
0x2505   :  { %v5399_v36 = vsel %vm5398_vm8, %v5384_v17, -1e+30  ;;  %v5395_v18 = vadd.f32 %v6224_v19, %v5702_v54 }
0x2506   :  { %5403 = vst [vmem:[#allocation10] sm:$0xff] %v5399_v36  ;;  %v5386_v0 = vpop.f32.mrf.mxu1 }
0x2507   :  { %v5402_v23 = vsel %vm5398_vm8, %v5395_v18, -1e+30  ;;  %v5387_v30 = vadd.f32 %v5702_v54, %v5386_v0 }
0x2508   :  { %5406 = vst [vmem:[#allocation10 + $0x18] sm:$0xff] %v5402_v23 }
0x2509   :  { %v5400_v60 = vsel %vm5398_vm8, %v5387_v30, -1e+30 }
0x250a   :  { %5404 = vst [vmem:[#allocation10 + $0x8] sm:$0xff] %v5400_v60 }
0x250b   :  { %6600 = shalt.err (!%p6597_p10)
}
0x250c   :  { %s6633_s23 = smov 128   ;;  %s6634_s24 = smov 8  }
0x250d   :  { %5418 = dma.vmem_to_hbm [thread:$0]  %s5413_s15, 512, %s7876_s18, [#allocation4], %s6633_s23, %s6633_s23, %s6634_s24  }
0x250e   :  { %6615 = dma.done.wait [#allocation4], 512  }
0x250f   :  { %6616 = vsyncadd [#allocation4], 4294966784 }
0x2510   :  { %5422 = vsyncpa [#allocation3], 1 }
0x2511   :  { %5423 = vsyncpa [#allocation6], 1 }
0x2512   :  { %5424 = vsyncpa [#allocation9], 1 }
0x2513   :  { %5425 = vsyncpa [#allocation4], 1 }

</bundles_post_ra>
